<compile_context>
chip_gen: v7x
topology: tpu7x:2x2x1
jax: 0.10.0
libtpu: 0.0.40
codegen_flags: <defaults>
</compile_context>

<pallas_src>
import math

import jax
import jax.numpy as jnp
import numpy as np
from jax import lax
from jax.experimental import pallas as pl
from jax.experimental.pallas import tpu as pltpu


def _round_up(x, m):
    return (x + m - 1) // m * m


# ----------------------------------------------------------------------------
# Pallas kernel: one (batch_block, time_block) tile of the bidirectional masked GRU.
# Inputs already contain the hoisted input projection gi = x @ W_ih + b_ih.
# ----------------------------------------------------------------------------
def _bigru_block_kernel(lens_ref, gif_ref, gib_ref, whh_ref, bhh_ref,
                        of_ref, ob_ref, h_sc):
    t = pl.program_id(1)
    n_t = pl.num_programs(1)
    TB = gif_ref.shape[0]
    Hp = h_sc.shape[-1]

    # New batch block starts when the (inner) time index resets.
    @pl.when(t == 0)
    def _():
        h_sc[...] = jnp.zeros_like(h_sc)

    lens = lens_ref[...]                  # (BB, 1) int32
    w_f = whh_ref[0]                      # (Hp, 3Hp)   resident weights
    w_b = whh_ref[1]
    b_f = bhh_ref[0]                      # (1, 3Hp)
    b_b = bhh_ref[1]

    base_f = t * TB                       # global time offset of the forward block
    base_b = (n_t - 1 - t) * TB           # global time offset of the backward block

    def cell(gi, h, w_hh, b_hh, m):
        # gi: (BB, 3Hp) precomputed x@W_ih + b_ih ; h: (BB, Hp) ; m: (BB, 1)
        gh = jnp.dot(h, w_hh, preferred_element_type=jnp.float32) + b_hh
        r = jax.nn.sigmoid(gi[:, 0 * Hp:1 * Hp] + gh[:, 0 * Hp:1 * Hp])
        z = jax.nn.sigmoid(gi[:, 1 * Hp:2 * Hp] + gh[:, 1 * Hp:2 * Hp])
        n = jnp.tanh(gi[:, 2 * Hp:3 * Hp] + r * gh[:, 2 * Hp:3 * Hp])
        h_new = (1.0 - z) * n + z * h
        # masked update: padded steps keep the previous hidden state
        return m * h_new + (1.0 - m) * h

    def body(i, carry):
        hf, hb = carry
        j = TB - 1 - i                              # backward walks its block in reverse
        mf = ((base_f + i) < lens).astype(jnp.float32)   # (BB, 1)
        mb = ((base_b + j) < lens).astype(jnp.float32)
        hf = cell(gif_ref[i], hf, w_f, b_f, mf)
        hb = cell(gib_ref[j], hb, w_b, b_b, mb)
        # packed semantics: outputs are zero at padded positions
        of_ref[i] = (mf * hf).astype(of_ref.dtype)
        ob_ref[j] = (mb * hb).astype(ob_ref.dtype)
        return hf, hb

    hf, hb = lax.fori_loop(0, TB, body, (h_sc[0], h_sc[1]), unroll=True)
    h_sc[0] = hf
    h_sc[1] = hb


def bigru_pallas(x_btI, lens, w_ih, w_hh, b_ih, b_hh, *,
                 time_block=8, batch_block=128):
    """Masked bidirectional GRU.

    x_btI : (B, T, I) float32, batch_first
    lens  : (B,) int32
    w_ih  : (2, I, 3H), w_hh: (2, H, 3H), b_ih/b_hh: (2, 1, 3H)  [dir 0 = fwd, dir 1 = bwd]
    returns outputs (B, T, 2H) (pad_packed-style, zeros beyond lens)
    """
    B, T, I = x_btI.shape
    H = w_hh.shape[1]

    # ---- TPU layout padding: sublane-aligned batch, lane-aligned per-gate hidden ----
    Hp = _round_up(H, 128)                      # each gate slice is a full-lane multiple
    BB = min(_round_up(B, 8), _round_up(batch_block, 8))
    Bp = _round_up(_round_up(B, 8), BB)
    TB = min(time_block, T)
    Tp = _round_up(T, TB)
    Bb, Tb = Bp // BB, Tp // TB

    x = x_btI.astype(jnp.float32)

    def pad_gates_last(a):                      # (..., 3H) -> (..., 3Hp), per-gate zero pad
        lead = a.shape[:-1]
        a3 = a.reshape(lead + (3, H))
        a3 = jnp.pad(a3, [(0, 0)] * len(lead) + [(0, 0), (0, Hp - H)])
        return a3.reshape(lead + (3 * Hp,))

    w_ih_p = pad_gates_last(w_ih.astype(jnp.float32))                     # (2, I, 3Hp)
    b_ih_p = pad_gates_last(b_ih.astype(jnp.float32))                     # (2, 1, 3Hp)
    w_hh_p = pad_gates_last(w_hh.astype(jnp.float32))                     # (2, H, 3Hp)
    w_hh_p = jnp.pad(w_hh_p, ((0, 0), (0, Hp - H), (0, 0)))               # (2, Hp, 3Hp)
    b_hh_p = pad_gates_last(b_hh.astype(jnp.float32))                     # (2, 1, 3Hp)

    # ---- hoisted input projection: one big matmul over all T*B rows, both directions ----
    gi = jnp.einsum('bti,dik->dtbk', x, w_ih_p,
                    preferred_element_type=jnp.float32) + b_ih_p[:, None]  # (2, T, B, 3Hp)
    gi = jnp.pad(gi, ((0, 0), (0, Tp - T), (0, Bp - B), (0, 0)))
    gi_f, gi_b = gi[0], gi[1]                                              # natural time order

    lens_p = jnp.pad(lens.astype(jnp.int32), (0, Bp - B))[:, None]         # (Bp, 1)

    out_f, out_b = pl.pallas_call(
        _bigru_block_kernel,
        out_shape=(
            jax.ShapeDtypeStruct((Tp, Bp, Hp), jnp.float32),
            jax.ShapeDtypeStruct((Tp, Bp, Hp), jnp.float32),
        ),
        grid=(Bb, Tb),
        in_specs=[
            pl.BlockSpec((BB, 1), lambda b, t: (b, 0)),                    # lens
            pl.BlockSpec((TB, BB, 3 * Hp), lambda b, t: (t, b, 0)),        # gi forward block
            pl.BlockSpec((TB, BB, 3 * Hp), lambda b, t: (Tb - 1 - t, b, 0)),  # gi bwd (reversed blocks)
            pl.BlockSpec((2, Hp, 3 * Hp), lambda b, t: (0, 0, 0)),         # W_hh (resident)
            pl.BlockSpec((2, 1, 3 * Hp), lambda b, t: (0, 0, 0)),          # b_hh (resident)
        ],
        out_specs=(
            pl.BlockSpec((TB, BB, Hp), lambda b, t: (t, b, 0)),            # forward outputs
            pl.BlockSpec((TB, BB, Hp), lambda b, t: (Tb - 1 - t, b, 0)),   # backward outputs
        ),
        scratch_shapes=[pltpu.VMEM((2, BB, Hp), jnp.float32)],             # carried hidden states
        compiler_params=pltpu.CompilerParams(
            dimension_semantics=("parallel", "arbitrary")),
    )(lens_p, gi_f, gi_b, w_hh_p, b_hh_p)

    out_f = out_f[:T, :B, :H]
    out_b = out_b[:T, :B, :H]                                  # already in natural time order
    outputs = jnp.concatenate([out_f, out_b], axis=-1)         # (T, B, 2H)
    return jnp.transpose(outputs, (1, 0, 2))                   # (B, T, 2H)


def masked_rnn_forward(x_btI, lens, params):
    """Equivalent of MaskedRNN.forward (bidirectional): final state of the RNN."""
    H = params["w_hh"].shape[1]
    outputs = bigru_pallas(x_btI, lens,
                           params["w_ih"], params["w_hh"],
                           params["b_ih"], params["b_hh"])     # (B, T, 2H)
    fwd_last = outputs[:, -1, :H]      # forward direction output at last (padded) time index
    bwd_first = outputs[:, 0, H:]      # backward direction output at t = 0 (its final state)
    return jnp.concatenate([fwd_last, bwd_first], axis=1)       # (B, 2H)


# ----------------------------------------------------------------------------
# Pure-JAX reference (lax.scan) for verification.
# ----------------------------------------------------------------------------
def _ref_gru_dir(x_tbi, mask_tb1, w_ih, w_hh, b_ih, b_hh):
    H = w_hh.shape[0]
    B = x_tbi.shape[1]

    def body(h, inp):
        x, m = inp
        gi = x @ w_ih + b_ih
        gh = h @ w_hh + b_hh
        r = jax.nn.sigmoid(gi[:, :H] + gh[:, :H])
        z = jax.nn.sigmoid(gi[:, H:2 * H] + gh[:, H:2 * H])
        n = jnp.tanh(gi[:, 2 * H:] + r * gh[:, 2 * H:])
        h_new = (1.0 - z) * n + z * h
        h_upd = m * h_new + (1.0 - m) * h
        return h_upd, m * h_upd

    h0 = jnp.zeros((B, H), jnp.float32)
    _, outs = lax.scan(body, h0, (x_tbi, mask_tb1))
    return outs


def masked_rnn_forward_ref(x_btI, lens, params):
    B, T, I = x_btI.shape
    H = params["w_hh"].shape[1]
    x_tbi = jnp.transpose(x_btI, (1, 0, 2)).astype(jnp.float32)
    mask = (jnp.arange(T)[:, None] < lens[None, :]).astype(jnp.float32)[:, :, None]
    out_f = _ref_gru_dir(x_tbi, mask,
                         params["w_ih"][0], params["w_hh"][0],
                         params["b_ih"][0], params["b_hh"][0])
    out_b = jnp.flip(
        _ref_gru_dir(jnp.flip(x_tbi, 0), jnp.flip(mask, 0),
                     params["w_ih"][1], params["w_hh"][1],
                     params["b_ih"][1], params["b_hh"][1]), axis=0)
    outputs = jnp.transpose(jnp.concatenate([out_f, out_b], -1), (1, 0, 2))
    return jnp.concatenate([outputs[:, -1, :H], outputs[:, 0, H:]], axis=1)


# ----------------------------------------------------------------------------
def init_params(key, input_size, hidden_size):
    """Deterministic GRU parameter init (PyTorch-style U(-1/sqrt(H), 1/sqrt(H)))."""
    H, I = hidden_size, input_size
    scale = 1.0 / math.sqrt(H)
    ks = jax.random.split(key, 4)
    u = lambda k, shp: jax.random.uniform(k, shp, jnp.float32, -scale, scale)
    return {
        "w_ih": u(ks[0], (2, I, 3 * H)),
        "w_hh": u(ks[1], (2, H, 3 * H)),
        "b_ih": u(ks[2], (2, 1, 3 * H)),
        "b_hh": u(ks[3], (2, 1, 3 * H)),
    }


if __name__ == "__main__":
    B, T, I, H = 2, 8, 16, 32

    key = jax.random.PRNGKey(0)
    k_x, k_p = jax.random.split(key)
    src = jax.random.normal(k_x, (B, T, I), jnp.float32)     # (B, T, I), batch_first
    src_lens = jnp.array([T, 5], dtype=jnp.int32)            # max(lens) == T
    params = init_params(k_p, I, H)

    out = jax.jit(masked_rnn_forward)(src, src_lens, params)
    out = jax.block_until_ready(out)

    ref = masked_rnn_forward_ref(src, src_lens, params)
    assert out.shape == (B, 2 * H), out.shape
    np.testing.assert_allclose(np.asarray(out), np.asarray(ref), rtol=1e-4, atol=1e-4)

    print("KERNEL_OK")
</pallas_src>

<mosaic_0001>
module attributes {stable_mosaic.version = 11 : i64} {
  func.func @_bigru_block_kernel(%arg0: i32, %arg1: i32, %arg2: memref<8x1xi32, #tpu.memory_space<vmem>>, %arg3: memref<8x8x384xf32, #tpu.memory_space<vmem>>, %arg4: memref<8x8x384xf32, #tpu.memory_space<vmem>>, %arg5: memref<2x128x384xf32, #tpu.memory_space<vmem>>, %arg6: memref<2x1x384xf32, #tpu.memory_space<vmem>>, %arg7: memref<8x8x128xf32, #tpu.memory_space<vmem>>, %arg8: memref<8x8x128xf32, #tpu.memory_space<vmem>>, %arg9: memref<2x8x128xf32, #tpu.memory_space<vmem>>) attributes {dimension_semantics = [#tpu.dimension_semantics<parallel>, #tpu.dimension_semantics<arbitrary>], iteration_bounds = array<i64: 1, 1>, scalar_prefetch = 0 : i64, scratch_operands = 1 : i64, tpu.core_type = #tpu.core_type<tc>, window_params = [{transform_indices = @transform_0, window_bounds = array<i64: 8, 1>}, {transform_indices = @transform_1, window_bounds = array<i64: 8, 8, 384>}, {transform_indices = @transform_2, window_bounds = array<i64: 8, 8, 384>}, {pipeline_mode = #tpu.pipeline_mode<synchronous>, transform_indices = @transform_3, window_bounds = array<i64: 2, 128, 384>}, {pipeline_mode = #tpu.pipeline_mode<synchronous>, transform_indices = @transform_4, window_bounds = array<i64: 2, 1, 384>}, {transform_indices = @transform_5, window_bounds = array<i64: 8, 8, 128>}, {transform_indices = @transform_6, window_bounds = array<i64: 8, 8, 128>}]} {
    %c0_i32 = arith.constant 0 : i32
    %0 = arith.cmpi eq, %arg1, %c0_i32 : i32
    %1 = arith.extui %0 : i1 to i32
    %c0_i32_0 = arith.constant 0 : i32
    %2 = arith.cmpi ne, %1, %c0_i32_0 : i32
    scf.if %2 {
      %cst_180 = arith.constant 0.000000e+00 : f32
      %833 = vector.broadcast %cst_180 : f32 to vector<2x8x128xf32>
      %c0_181 = arith.constant 0 : index
      %c0_182 = arith.constant 0 : index
      %c0_183 = arith.constant 0 : index
      %834 = vector.load %arg9[%c0_181, %c0_182, %c0_183] : memref<2x8x128xf32, #tpu.memory_space<vmem>>, vector<2x8x128xf32>
      tpu.vector_store %arg9[%c0_181, %c0_182, %c0_183], %833 {strides = array<i32>} : memref<2x8x128xf32, #tpu.memory_space<vmem>>, vector<2x8x128xf32>,
    } else {
    }
    %c0 = arith.constant 0 : index
    %c0_1 = arith.constant 0 : index
    %3 = vector.load %arg2[%c0, %c0_1] : memref<8x1xi32, #tpu.memory_space<vmem>>, vector<8x1xi32>
    %c0_2 = arith.constant 0 : index
    %c0_3 = arith.constant 0 : index
    %c0_4 = arith.constant 0 : index
    %4 = vector.load %arg5[%c0_2, %c0_3, %c0_4] : memref<2x128x384xf32, #tpu.memory_space<vmem>>, vector<1x128x384xf32>
    %5 = vector.shape_cast %4 : vector<1x128x384xf32> to vector<128x384xf32>
    %c1 = arith.constant 1 : index
    %c0_5 = arith.constant 0 : index
    %c0_6 = arith.constant 0 : index
    %6 = vector.load %arg5[%c1, %c0_5, %c0_6] : memref<2x128x384xf32, #tpu.memory_space<vmem>>, vector<1x128x384xf32>
    %7 = vector.shape_cast %6 : vector<1x128x384xf32> to vector<128x384xf32>
    %c0_7 = arith.constant 0 : index
    %c0_8 = arith.constant 0 : index
    %c0_9 = arith.constant 0 : index
    %8 = vector.load %arg6[%c0_7, %c0_8, %c0_9] : memref<2x1x384xf32, #tpu.memory_space<vmem>>, vector<1x1x384xf32>
    %9 = vector.shape_cast %8 : vector<1x1x384xf32> to vector<1x384xf32>
    %c1_10 = arith.constant 1 : index
    %c0_11 = arith.constant 0 : index
    %c0_12 = arith.constant 0 : index
    %10 = vector.load %arg6[%c1_10, %c0_11, %c0_12] : memref<2x1x384xf32, #tpu.memory_space<vmem>>, vector<1x1x384xf32>
    %11 = vector.shape_cast %10 : vector<1x1x384xf32> to vector<1x384xf32>
    %c8_i32 = arith.constant 8 : i32
    %12 = arith.muli %arg1, %c8_i32 : i32
    %c0_i32_13 = arith.constant 0 : i32
    %13 = arith.subi %c0_i32_13, %arg1 : i32
    %c8_i32_14 = arith.constant 8 : i32
    %14 = arith.muli %13, %c8_i32_14 : i32
    %c0_15 = arith.constant 0 : index
    %c0_16 = arith.constant 0 : index
    %c0_17 = arith.constant 0 : index
    %15 = vector.load %arg9[%c0_15, %c0_16, %c0_17] : memref<2x8x128xf32, #tpu.memory_space<vmem>>, vector<1x8x128xf32>
    %16 = vector.shape_cast %15 : vector<1x8x128xf32> to vector<8x128xf32>
    %c1_18 = arith.constant 1 : index
    %c0_19 = arith.constant 0 : index
    %c0_20 = arith.constant 0 : index
    %17 = vector.load %arg9[%c1_18, %c0_19, %c0_20] : memref<2x8x128xf32, #tpu.memory_space<vmem>>, vector<1x8x128xf32>
    %18 = vector.shape_cast %17 : vector<1x8x128xf32> to vector<8x128xf32>
    %c0_i32_21 = arith.constant 0 : i32
    %c7_i32 = arith.constant 7 : i32
    %19 = arith.subi %c7_i32, %c0_i32_21 : i32
    %20 = arith.addi %12, %c0_i32_21 : i32
    %21 = vector.broadcast %20 : i32 to vector<8x1xi32>
    %22 = arith.cmpi slt, %21, %3 : vector<8x1xi32>
    %23 = arith.extui %22 : vector<8x1xi1> to vector<8x1xi32>
    %24 = arith.sitofp %23 : vector<8x1xi32> to vector<8x1xf32>
    %25 = arith.addi %14, %19 : i32
    %26 = vector.broadcast %25 : i32 to vector<8x1xi32>
    %27 = arith.cmpi slt, %26, %3 : vector<8x1xi32>
    %28 = arith.extui %27 : vector<8x1xi1> to vector<8x1xi32>
    %29 = arith.sitofp %28 : vector<8x1xi32> to vector<8x1xf32>
    %30 = arith.index_cast %c0_i32_21 : i32 to index
    %c0_22 = arith.constant 0 : index
    %c0_23 = arith.constant 0 : index
    %31 = vector.load %arg3[%30, %c0_22, %c0_23] : memref<8x8x384xf32, #tpu.memory_space<vmem>>, vector<1x8x384xf32>
    %32 = vector.shape_cast %31 : vector<1x8x384xf32> to vector<8x384xf32>
    %cst = arith.constant dense<0.000000e+00> : vector<8x384xf32>
    %33 = tpu.matmul %16, %5, %cst {dimension_numbers = #tpu.dot_dimension_numbers<[1], [0], [0], [1], [0, 0, 1, 1], [], []>} : vector<8x128xf32>, vector<128x384xf32>, vector<8x384xf32> -> vector<8x384xf32>
    %34 = vector.broadcast %9 : vector<1x384xf32> to vector<8x384xf32>
    %35 = arith.addf %33, %34 : vector<8x384xf32>
    %36 = vector.extract_strided_slice %32 {offsets = [0, 0], sizes = [8, 128], strides = [1, 1]} : vector<8x384xf32> to vector<8x128xf32>
    %37 = vector.extract_strided_slice %35 {offsets = [0, 0], sizes = [8, 128], strides = [1, 1]} : vector<8x384xf32> to vector<8x128xf32>
    %38 = arith.addf %36, %37 : vector<8x128xf32>
    %39 = arith.negf %38 : vector<8x128xf32>
    %40 = math.exp %39 : vector<8x128xf32>
    %cst_24 = arith.constant 1.000000e+00 : f32
    %41 = vector.broadcast %cst_24 : f32 to vector<8x128xf32>
    %42 = arith.addf %41, %40 : vector<8x128xf32>
    %43 = arith.divf %41, %42 : vector<8x128xf32>
    %44 = vector.extract_strided_slice %32 {offsets = [0, 128], sizes = [8, 128], strides = [1, 1]} : vector<8x384xf32> to vector<8x128xf32>
    %45 = vector.extract_strided_slice %35 {offsets = [0, 128], sizes = [8, 128], strides = [1, 1]} : vector<8x384xf32> to vector<8x128xf32>
    %46 = arith.addf %44, %45 : vector<8x128xf32>
    %47 = arith.negf %46 : vector<8x128xf32>
    %48 = math.exp %47 : vector<8x128xf32>
    %cst_25 = arith.constant 1.000000e+00 : f32
    %49 = vector.broadcast %cst_25 : f32 to vector<8x128xf32>
    %50 = arith.addf %49, %48 : vector<8x128xf32>
    %51 = arith.divf %49, %50 : vector<8x128xf32>
    %52 = vector.extract_strided_slice %32 {offsets = [0, 256], sizes = [8, 128], strides = [1, 1]} : vector<8x384xf32> to vector<8x128xf32>
    %53 = vector.extract_strided_slice %35 {offsets = [0, 256], sizes = [8, 128], strides = [1, 1]} : vector<8x384xf32> to vector<8x128xf32>
    %54 = arith.mulf %43, %53 : vector<8x128xf32>
    %55 = arith.addf %52, %54 : vector<8x128xf32>
    %56 = math.tanh %55 : vector<8x128xf32>
    %cst_26 = arith.constant 1.000000e+00 : f32
    %57 = vector.broadcast %cst_26 : f32 to vector<8x128xf32>
    %58 = arith.subf %57, %51 : vector<8x128xf32>
    %59 = arith.mulf %58, %56 : vector<8x128xf32>
    %60 = arith.mulf %51, %16 : vector<8x128xf32>
    %61 = arith.addf %59, %60 : vector<8x128xf32>
    %62 = vector.broadcast %24 : vector<8x1xf32> to vector<8x128xf32>
    %63 = arith.mulf %62, %61 : vector<8x128xf32>
    %cst_27 = arith.constant 1.000000e+00 : f32
    %64 = vector.broadcast %cst_27 : f32 to vector<8x1xf32>
    %65 = arith.subf %64, %24 : vector<8x1xf32>
    %66 = vector.broadcast %65 : vector<8x1xf32> to vector<8x128xf32>
    %67 = arith.mulf %66, %16 : vector<8x128xf32>
    %68 = arith.addf %63, %67 : vector<8x128xf32>
    %69 = arith.index_cast %19 : i32 to index
    %c0_28 = arith.constant 0 : index
    %c0_29 = arith.constant 0 : index
    %70 = vector.load %arg4[%69, %c0_28, %c0_29] : memref<8x8x384xf32, #tpu.memory_space<vmem>>, vector<1x8x384xf32>
    %71 = vector.shape_cast %70 : vector<1x8x384xf32> to vector<8x384xf32>
    %cst_30 = arith.constant dense<0.000000e+00> : vector<8x384xf32>
    %72 = tpu.matmul %18, %7, %cst_30 {dimension_numbers = #tpu.dot_dimension_numbers<[1], [0], [0], [1], [0, 0, 1, 1], [], []>} : vector<8x128xf32>, vector<128x384xf32>, vector<8x384xf32> -> vector<8x384xf32>
    %73 = vector.broadcast %11 : vector<1x384xf32> to vector<8x384xf32>
    %74 = arith.addf %72, %73 : vector<8x384xf32>
    %75 = vector.extract_strided_slice %71 {offsets = [0, 0], sizes = [8, 128], strides = [1, 1]} : vector<8x384xf32> to vector<8x128xf32>
    %76 = vector.extract_strided_slice %74 {offsets = [0, 0], sizes = [8, 128], strides = [1, 1]} : vector<8x384xf32> to vector<8x128xf32>
    %77 = arith.addf %75, %76 : vector<8x128xf32>
    %78 = arith.negf %77 : vector<8x128xf32>
    %79 = math.exp %78 : vector<8x128xf32>
    %cst_31 = arith.constant 1.000000e+00 : f32
    %80 = vector.broadcast %cst_31 : f32 to vector<8x128xf32>
    %81 = arith.addf %80, %79 : vector<8x128xf32>
    %82 = arith.divf %80, %81 : vector<8x128xf32>
    %83 = vector.extract_strided_slice %71 {offsets = [0, 128], sizes = [8, 128], strides = [1, 1]} : vector<8x384xf32> to vector<8x128xf32>
    %84 = vector.extract_strided_slice %74 {offsets = [0, 128], sizes = [8, 128], strides = [1, 1]} : vector<8x384xf32> to vector<8x128xf32>
    %85 = arith.addf %83, %84 : vector<8x128xf32>
    %86 = arith.negf %85 : vector<8x128xf32>
    %87 = math.exp %86 : vector<8x128xf32>
    %cst_32 = arith.constant 1.000000e+00 : f32
    %88 = vector.broadcast %cst_32 : f32 to vector<8x128xf32>
    %89 = arith.addf %88, %87 : vector<8x128xf32>
    %90 = arith.divf %88, %89 : vector<8x128xf32>
    %91 = vector.extract_strided_slice %71 {offsets = [0, 256], sizes = [8, 128], strides = [1, 1]} : vector<8x384xf32> to vector<8x128xf32>
    %92 = vector.extract_strided_slice %74 {offsets = [0, 256], sizes = [8, 128], strides = [1, 1]} : vector<8x384xf32> to vector<8x128xf32>
    %93 = arith.mulf %82, %92 : vector<8x128xf32>
    %94 = arith.addf %91, %93 : vector<8x128xf32>
    %95 = math.tanh %94 : vector<8x128xf32>
    %cst_33 = arith.constant 1.000000e+00 : f32
    %96 = vector.broadcast %cst_33 : f32 to vector<8x128xf32>
    %97 = arith.subf %96, %90 : vector<8x128xf32>
    %98 = arith.mulf %97, %95 : vector<8x128xf32>
    %99 = arith.mulf %90, %18 : vector<8x128xf32>
    %100 = arith.addf %98, %99 : vector<8x128xf32>
    %101 = vector.broadcast %29 : vector<8x1xf32> to vector<8x128xf32>
    %102 = arith.mulf %101, %100 : vector<8x128xf32>
    %cst_34 = arith.constant 1.000000e+00 : f32
    %103 = vector.broadcast %cst_34 : f32 to vector<8x1xf32>
    %104 = arith.subf %103, %29 : vector<8x1xf32>
    %105 = vector.broadcast %104 : vector<8x1xf32> to vector<8x128xf32>
    %106 = arith.mulf %105, %18 : vector<8x128xf32>
    %107 = arith.addf %102, %106 : vector<8x128xf32>
    %108 = vector.broadcast %24 : vector<8x1xf32> to vector<8x128xf32>
    %109 = arith.mulf %108, %68 : vector<8x128xf32>
    %110 = arith.index_cast %c0_i32_21 : i32 to index
    %c0_35 = arith.constant 0 : index
    %c0_36 = arith.constant 0 : index
    %111 = vector.load %arg7[%110, %c0_35, %c0_36] : memref<8x8x128xf32, #tpu.memory_space<vmem>>, vector<1x8x128xf32>
    %112 = vector.shape_cast %111 : vector<1x8x128xf32> to vector<8x128xf32>
    %113 = vector.shape_cast %109 : vector<8x128xf32> to vector<1x8x128xf32>
    tpu.vector_store %arg7[%110, %c0_35, %c0_36], %113 {strides = array<i32>} : memref<8x8x128xf32, #tpu.memory_space<vmem>>, vector<1x8x128xf32>,
    %114 = vector.broadcast %29 : vector<8x1xf32> to vector<8x128xf32>
    %115 = arith.mulf %114, %107 : vector<8x128xf32>
    %116 = arith.index_cast %19 : i32 to index
    %c0_37 = arith.constant 0 : index
    %c0_38 = arith.constant 0 : index
    %117 = vector.load %arg8[%116, %c0_37, %c0_38] : memref<8x8x128xf32, #tpu.memory_space<vmem>>, vector<1x8x128xf32>
    %118 = vector.shape_cast %117 : vector<1x8x128xf32> to vector<8x128xf32>
    %119 = vector.shape_cast %115 : vector<8x128xf32> to vector<1x8x128xf32>
    tpu.vector_store %arg8[%116, %c0_37, %c0_38], %119 {strides = array<i32>} : memref<8x8x128xf32, #tpu.memory_space<vmem>>, vector<1x8x128xf32>,
    %c1_i32 = arith.constant 1 : i32
    %c7_i32_39 = arith.constant 7 : i32
    %120 = arith.subi %c7_i32_39, %c1_i32 : i32
    %121 = arith.addi %12, %c1_i32 : i32
    %122 = vector.broadcast %121 : i32 to vector<8x1xi32>
    %123 = arith.cmpi slt, %122, %3 : vector<8x1xi32>
    %124 = arith.extui %123 : vector<8x1xi1> to vector<8x1xi32>
    %125 = arith.sitofp %124 : vector<8x1xi32> to vector<8x1xf32>
    %126 = arith.addi %14, %120 : i32
    %127 = vector.broadcast %126 : i32 to vector<8x1xi32>
    %128 = arith.cmpi slt, %127, %3 : vector<8x1xi32>
    %129 = arith.extui %128 : vector<8x1xi1> to vector<8x1xi32>
    %130 = arith.sitofp %129 : vector<8x1xi32> to vector<8x1xf32>
    %131 = arith.index_cast %c1_i32 : i32 to index
    %c0_40 = arith.constant 0 : index
    %c0_41 = arith.constant 0 : index
    %132 = vector.load %arg3[%131, %c0_40, %c0_41] : memref<8x8x384xf32, #tpu.memory_space<vmem>>, vector<1x8x384xf32>
    %133 = vector.shape_cast %132 : vector<1x8x384xf32> to vector<8x384xf32>
    %cst_42 = arith.constant dense<0.000000e+00> : vector<8x384xf32>
    %134 = tpu.matmul %68, %5, %cst_42 {dimension_numbers = #tpu.dot_dimension_numbers<[1], [0], [0], [1], [0, 0, 1, 1], [], []>} : vector<8x128xf32>, vector<128x384xf32>, vector<8x384xf32> -> vector<8x384xf32>
    %135 = vector.broadcast %9 : vector<1x384xf32> to vector<8x384xf32>
    %136 = arith.addf %134, %135 : vector<8x384xf32>
    %137 = vector.extract_strided_slice %133 {offsets = [0, 0], sizes = [8, 128], strides = [1, 1]} : vector<8x384xf32> to vector<8x128xf32>
    %138 = vector.extract_strided_slice %136 {offsets = [0, 0], sizes = [8, 128], strides = [1, 1]} : vector<8x384xf32> to vector<8x128xf32>
    %139 = arith.addf %137, %138 : vector<8x128xf32>
    %140 = arith.negf %139 : vector<8x128xf32>
    %141 = math.exp %140 : vector<8x128xf32>
    %cst_43 = arith.constant 1.000000e+00 : f32
    %142 = vector.broadcast %cst_43 : f32 to vector<8x128xf32>
    %143 = arith.addf %142, %141 : vector<8x128xf32>
    %144 = arith.divf %142, %143 : vector<8x128xf32>
    %145 = vector.extract_strided_slice %133 {offsets = [0, 128], sizes = [8, 128], strides = [1, 1]} : vector<8x384xf32> to vector<8x128xf32>
    %146 = vector.extract_strided_slice %136 {offsets = [0, 128], sizes = [8, 128], strides = [1, 1]} : vector<8x384xf32> to vector<8x128xf32>
    %147 = arith.addf %145, %146 : vector<8x128xf32>
    %148 = arith.negf %147 : vector<8x128xf32>
    %149 = math.exp %148 : vector<8x128xf32>
    %cst_44 = arith.constant 1.000000e+00 : f32
    %150 = vector.broadcast %cst_44 : f32 to vector<8x128xf32>
    %151 = arith.addf %150, %149 : vector<8x128xf32>
    %152 = arith.divf %150, %151 : vector<8x128xf32>
    %153 = vector.extract_strided_slice %133 {offsets = [0, 256], sizes = [8, 128], strides = [1, 1]} : vector<8x384xf32> to vector<8x128xf32>
    %154 = vector.extract_strided_slice %136 {offsets = [0, 256], sizes = [8, 128], strides = [1, 1]} : vector<8x384xf32> to vector<8x128xf32>
    %155 = arith.mulf %144, %154 : vector<8x128xf32>
    %156 = arith.addf %153, %155 : vector<8x128xf32>
    %157 = math.tanh %156 : vector<8x128xf32>
    %cst_45 = arith.constant 1.000000e+00 : f32
    %158 = vector.broadcast %cst_45 : f32 to vector<8x128xf32>
    %159 = arith.subf %158, %152 : vector<8x128xf32>
    %160 = arith.mulf %159, %157 : vector<8x128xf32>
    %161 = arith.mulf %152, %68 : vector<8x128xf32>
    %162 = arith.addf %160, %161 : vector<8x128xf32>
    %163 = vector.broadcast %125 : vector<8x1xf32> to vector<8x128xf32>
    %164 = arith.mulf %163, %162 : vector<8x128xf32>
    %cst_46 = arith.constant 1.000000e+00 : f32
    %165 = vector.broadcast %cst_46 : f32 to vector<8x1xf32>
    %166 = arith.subf %165, %125 : vector<8x1xf32>
    %167 = vector.broadcast %166 : vector<8x1xf32> to vector<8x128xf32>
    %168 = arith.mulf %167, %68 : vector<8x128xf32>
    %169 = arith.addf %164, %168 : vector<8x128xf32>
    %170 = arith.index_cast %120 : i32 to index
    %c0_47 = arith.constant 0 : index
    %c0_48 = arith.constant 0 : index
    %171 = vector.load %arg4[%170, %c0_47, %c0_48] : memref<8x8x384xf32, #tpu.memory_space<vmem>>, vector<1x8x384xf32>
    %172 = vector.shape_cast %171 : vector<1x8x384xf32> to vector<8x384xf32>
    %cst_49 = arith.constant dense<0.000000e+00> : vector<8x384xf32>
    %173 = tpu.matmul %107, %7, %cst_49 {dimension_numbers = #tpu.dot_dimension_numbers<[1], [0], [0], [1], [0, 0, 1, 1], [], []>} : vector<8x128xf32>, vector<128x384xf32>, vector<8x384xf32> -> vector<8x384xf32>
    %174 = vector.broadcast %11 : vector<1x384xf32> to vector<8x384xf32>
    %175 = arith.addf %173, %174 : vector<8x384xf32>
    %176 = vector.extract_strided_slice %172 {offsets = [0, 0], sizes = [8, 128], strides = [1, 1]} : vector<8x384xf32> to vector<8x128xf32>
    %177 = vector.extract_strided_slice %175 {offsets = [0, 0], sizes = [8, 128], strides = [1, 1]} : vector<8x384xf32> to vector<8x128xf32>
    %178 = arith.addf %176, %177 : vector<8x128xf32>
    %179 = arith.negf %178 : vector<8x128xf32>
    %180 = math.exp %179 : vector<8x128xf32>
    %cst_50 = arith.constant 1.000000e+00 : f32
    %181 = vector.broadcast %cst_50 : f32 to vector<8x128xf32>
    %182 = arith.addf %181, %180 : vector<8x128xf32>
    %183 = arith.divf %181, %182 : vector<8x128xf32>
    %184 = vector.extract_strided_slice %172 {offsets = [0, 128], sizes = [8, 128], strides = [1, 1]} : vector<8x384xf32> to vector<8x128xf32>
    %185 = vector.extract_strided_slice %175 {offsets = [0, 128], sizes = [8, 128], strides = [1, 1]} : vector<8x384xf32> to vector<8x128xf32>
    %186 = arith.addf %184, %185 : vector<8x128xf32>
    %187 = arith.negf %186 : vector<8x128xf32>
    %188 = math.exp %187 : vector<8x128xf32>
    %cst_51 = arith.constant 1.000000e+00 : f32
    %189 = vector.broadcast %cst_51 : f32 to vector<8x128xf32>
    %190 = arith.addf %189, %188 : vector<8x128xf32>
    %191 = arith.divf %189, %190 : vector<8x128xf32>
    %192 = vector.extract_strided_slice %172 {offsets = [0, 256], sizes = [8, 128], strides = [1, 1]} : vector<8x384xf32> to vector<8x128xf32>
    %193 = vector.extract_strided_slice %175 {offsets = [0, 256], sizes = [8, 128], strides = [1, 1]} : vector<8x384xf32> to vector<8x128xf32>
    %194 = arith.mulf %183, %193 : vector<8x128xf32>
    %195 = arith.addf %192, %194 : vector<8x128xf32>
    %196 = math.tanh %195 : vector<8x128xf32>
    %cst_52 = arith.constant 1.000000e+00 : f32
    %197 = vector.broadcast %cst_52 : f32 to vector<8x128xf32>
    %198 = arith.subf %197, %191 : vector<8x128xf32>
    %199 = arith.mulf %198, %196 : vector<8x128xf32>
    %200 = arith.mulf %191, %107 : vector<8x128xf32>
    %201 = arith.addf %199, %200 : vector<8x128xf32>
    %202 = vector.broadcast %130 : vector<8x1xf32> to vector<8x128xf32>
    %203 = arith.mulf %202, %201 : vector<8x128xf32>
    %cst_53 = arith.constant 1.000000e+00 : f32
    %204 = vector.broadcast %cst_53 : f32 to vector<8x1xf32>
    %205 = arith.subf %204, %130 : vector<8x1xf32>
    %206 = vector.broadcast %205 : vector<8x1xf32> to vector<8x128xf32>
    %207 = arith.mulf %206, %107 : vector<8x128xf32>
    %208 = arith.addf %203, %207 : vector<8x128xf32>
    %209 = vector.broadcast %125 : vector<8x1xf32> to vector<8x128xf32>
    %210 = arith.mulf %209, %169 : vector<8x128xf32>
    %211 = arith.index_cast %c1_i32 : i32 to index
    %c0_54 = arith.constant 0 : index
    %c0_55 = arith.constant 0 : index
    %212 = vector.load %arg7[%211, %c0_54, %c0_55] : memref<8x8x128xf32, #tpu.memory_space<vmem>>, vector<1x8x128xf32>
    %213 = vector.shape_cast %212 : vector<1x8x128xf32> to vector<8x128xf32>
    %214 = vector.shape_cast %210 : vector<8x128xf32> to vector<1x8x128xf32>
    tpu.vector_store %arg7[%211, %c0_54, %c0_55], %214 {strides = array<i32>} : memref<8x8x128xf32, #tpu.memory_space<vmem>>, vector<1x8x128xf32>,
    %215 = vector.broadcast %130 : vector<8x1xf32> to vector<8x128xf32>
    %216 = arith.mulf %215, %208 : vector<8x128xf32>
    %217 = arith.index_cast %120 : i32 to index
    %c0_56 = arith.constant 0 : index
    %c0_57 = arith.constant 0 : index
    %218 = vector.load %arg8[%217, %c0_56, %c0_57] : memref<8x8x128xf32, #tpu.memory_space<vmem>>, vector<1x8x128xf32>
    %219 = vector.shape_cast %218 : vector<1x8x128xf32> to vector<8x128xf32>
    %220 = vector.shape_cast %216 : vector<8x128xf32> to vector<1x8x128xf32>
    tpu.vector_store %arg8[%217, %c0_56, %c0_57], %220 {strides = array<i32>} : memref<8x8x128xf32, #tpu.memory_space<vmem>>, vector<1x8x128xf32>,
    %c2_i32 = arith.constant 2 : i32
    %c7_i32_58 = arith.constant 7 : i32
    %221 = arith.subi %c7_i32_58, %c2_i32 : i32
    %222 = arith.addi %12, %c2_i32 : i32
    %223 = vector.broadcast %222 : i32 to vector<8x1xi32>
    %224 = arith.cmpi slt, %223, %3 : vector<8x1xi32>
    %225 = arith.extui %224 : vector<8x1xi1> to vector<8x1xi32>
    %226 = arith.sitofp %225 : vector<8x1xi32> to vector<8x1xf32>
    %227 = arith.addi %14, %221 : i32
    %228 = vector.broadcast %227 : i32 to vector<8x1xi32>
    %229 = arith.cmpi slt, %228, %3 : vector<8x1xi32>
    %230 = arith.extui %229 : vector<8x1xi1> to vector<8x1xi32>
    %231 = arith.sitofp %230 : vector<8x1xi32> to vector<8x1xf32>
    %232 = arith.index_cast %c2_i32 : i32 to index
    %c0_59 = arith.constant 0 : index
    %c0_60 = arith.constant 0 : index
    %233 = vector.load %arg3[%232, %c0_59, %c0_60] : memref<8x8x384xf32, #tpu.memory_space<vmem>>, vector<1x8x384xf32>
    %234 = vector.shape_cast %233 : vector<1x8x384xf32> to vector<8x384xf32>
    %cst_61 = arith.constant dense<0.000000e+00> : vector<8x384xf32>
    %235 = tpu.matmul %169, %5, %cst_61 {dimension_numbers = #tpu.dot_dimension_numbers<[1], [0], [0], [1], [0, 0, 1, 1], [], []>} : vector<8x128xf32>, vector<128x384xf32>, vector<8x384xf32> -> vector<8x384xf32>
    %236 = vector.broadcast %9 : vector<1x384xf32> to vector<8x384xf32>
    %237 = arith.addf %235, %236 : vector<8x384xf32>
    %238 = vector.extract_strided_slice %234 {offsets = [0, 0], sizes = [8, 128], strides = [1, 1]} : vector<8x384xf32> to vector<8x128xf32>
    %239 = vector.extract_strided_slice %237 {offsets = [0, 0], sizes = [8, 128], strides = [1, 1]} : vector<8x384xf32> to vector<8x128xf32>
    %240 = arith.addf %238, %239 : vector<8x128xf32>
    %241 = arith.negf %240 : vector<8x128xf32>
    %242 = math.exp %241 : vector<8x128xf32>
    %cst_62 = arith.constant 1.000000e+00 : f32
    %243 = vector.broadcast %cst_62 : f32 to vector<8x128xf32>
    %244 = arith.addf %243, %242 : vector<8x128xf32>
    %245 = arith.divf %243, %244 : vector<8x128xf32>
    %246 = vector.extract_strided_slice %234 {offsets = [0, 128], sizes = [8, 128], strides = [1, 1]} : vector<8x384xf32> to vector<8x128xf32>
    %247 = vector.extract_strided_slice %237 {offsets = [0, 128], sizes = [8, 128], strides = [1, 1]} : vector<8x384xf32> to vector<8x128xf32>
    %248 = arith.addf %246, %247 : vector<8x128xf32>
    %249 = arith.negf %248 : vector<8x128xf32>
    %250 = math.exp %249 : vector<8x128xf32>
    %cst_63 = arith.constant 1.000000e+00 : f32
    %251 = vector.broadcast %cst_63 : f32 to vector<8x128xf32>
    %252 = arith.addf %251, %250 : vector<8x128xf32>
    %253 = arith.divf %251, %252 : vector<8x128xf32>
    %254 = vector.extract_strided_slice %234 {offsets = [0, 256], sizes = [8, 128], strides = [1, 1]} : vector<8x384xf32> to vector<8x128xf32>
    %255 = vector.extract_strided_slice %237 {offsets = [0, 256], sizes = [8, 128], strides = [1, 1]} : vector<8x384xf32> to vector<8x128xf32>
    %256 = arith.mulf %245, %255 : vector<8x128xf32>
    %257 = arith.addf %254, %256 : vector<8x128xf32>
    %258 = math.tanh %257 : vector<8x128xf32>
    %cst_64 = arith.constant 1.000000e+00 : f32
    %259 = vector.broadcast %cst_64 : f32 to vector<8x128xf32>
    %260 = arith.subf %259, %253 : vector<8x128xf32>
    %261 = arith.mulf %260, %258 : vector<8x128xf32>
    %262 = arith.mulf %253, %169 : vector<8x128xf32>
    %263 = arith.addf %261, %262 : vector<8x128xf32>
    %264 = vector.broadcast %226 : vector<8x1xf32> to vector<8x128xf32>
    %265 = arith.mulf %264, %263 : vector<8x128xf32>
    %cst_65 = arith.constant 1.000000e+00 : f32
    %266 = vector.broadcast %cst_65 : f32 to vector<8x1xf32>
    %267 = arith.subf %266, %226 : vector<8x1xf32>
    %268 = vector.broadcast %267 : vector<8x1xf32> to vector<8x128xf32>
    %269 = arith.mulf %268, %169 : vector<8x128xf32>
    %270 = arith.addf %265, %269 : vector<8x128xf32>
    %271 = arith.index_cast %221 : i32 to index
    %c0_66 = arith.constant 0 : index
    %c0_67 = arith.constant 0 : index
    %272 = vector.load %arg4[%271, %c0_66, %c0_67] : memref<8x8x384xf32, #tpu.memory_space<vmem>>, vector<1x8x384xf32>
    %273 = vector.shape_cast %272 : vector<1x8x384xf32> to vector<8x384xf32>
    %cst_68 = arith.constant dense<0.000000e+00> : vector<8x384xf32>
    %274 = tpu.matmul %208, %7, %cst_68 {dimension_numbers = #tpu.dot_dimension_numbers<[1], [0], [0], [1], [0, 0, 1, 1], [], []>} : vector<8x128xf32>, vector<128x384xf32>, vector<8x384xf32> -> vector<8x384xf32>
    %275 = vector.broadcast %11 : vector<1x384xf32> to vector<8x384xf32>
    %276 = arith.addf %274, %275 : vector<8x384xf32>
    %277 = vector.extract_strided_slice %273 {offsets = [0, 0], sizes = [8, 128], strides = [1, 1]} : vector<8x384xf32> to vector<8x128xf32>
    %278 = vector.extract_strided_slice %276 {offsets = [0, 0], sizes = [8, 128], strides = [1, 1]} : vector<8x384xf32> to vector<8x128xf32>
    %279 = arith.addf %277, %278 : vector<8x128xf32>
    %280 = arith.negf %279 : vector<8x128xf32>
    %281 = math.exp %280 : vector<8x128xf32>
    %cst_69 = arith.constant 1.000000e+00 : f32
    %282 = vector.broadcast %cst_69 : f32 to vector<8x128xf32>
    %283 = arith.addf %282, %281 : vector<8x128xf32>
    %284 = arith.divf %282, %283 : vector<8x128xf32>
    %285 = vector.extract_strided_slice %273 {offsets = [0, 128], sizes = [8, 128], strides = [1, 1]} : vector<8x384xf32> to vector<8x128xf32>
    %286 = vector.extract_strided_slice %276 {offsets = [0, 128], sizes = [8, 128], strides = [1, 1]} : vector<8x384xf32> to vector<8x128xf32>
    %287 = arith.addf %285, %286 : vector<8x128xf32>
    %288 = arith.negf %287 : vector<8x128xf32>
    %289 = math.exp %288 : vector<8x128xf32>
    %cst_70 = arith.constant 1.000000e+00 : f32
    %290 = vector.broadcast %cst_70 : f32 to vector<8x128xf32>
    %291 = arith.addf %290, %289 : vector<8x128xf32>
    %292 = arith.divf %290, %291 : vector<8x128xf32>
    %293 = vector.extract_strided_slice %273 {offsets = [0, 256], sizes = [8, 128], strides = [1, 1]} : vector<8x384xf32> to vector<8x128xf32>
    %294 = vector.extract_strided_slice %276 {offsets = [0, 256], sizes = [8, 128], strides = [1, 1]} : vector<8x384xf32> to vector<8x128xf32>
    %295 = arith.mulf %284, %294 : vector<8x128xf32>
    %296 = arith.addf %293, %295 : vector<8x128xf32>
    %297 = math.tanh %296 : vector<8x128xf32>
    %cst_71 = arith.constant 1.000000e+00 : f32
    %298 = vector.broadcast %cst_71 : f32 to vector<8x128xf32>
    %299 = arith.subf %298, %292 : vector<8x128xf32>
    %300 = arith.mulf %299, %297 : vector<8x128xf32>
    %301 = arith.mulf %292, %208 : vector<8x128xf32>
    %302 = arith.addf %300, %301 : vector<8x128xf32>
    %303 = vector.broadcast %231 : vector<8x1xf32> to vector<8x128xf32>
    %304 = arith.mulf %303, %302 : vector<8x128xf32>
    %cst_72 = arith.constant 1.000000e+00 : f32
    %305 = vector.broadcast %cst_72 : f32 to vector<8x1xf32>
    %306 = arith.subf %305, %231 : vector<8x1xf32>
    %307 = vector.broadcast %306 : vector<8x1xf32> to vector<8x128xf32>
    %308 = arith.mulf %307, %208 : vector<8x128xf32>
    %309 = arith.addf %304, %308 : vector<8x128xf32>
    %310 = vector.broadcast %226 : vector<8x1xf32> to vector<8x128xf32>
    %311 = arith.mulf %310, %270 : vector<8x128xf32>
    %312 = arith.index_cast %c2_i32 : i32 to index
    %c0_73 = arith.constant 0 : index
    %c0_74 = arith.constant 0 : index
    %313 = vector.load %arg7[%312, %c0_73, %c0_74] : memref<8x8x128xf32, #tpu.memory_space<vmem>>, vector<1x8x128xf32>
    %314 = vector.shape_cast %313 : vector<1x8x128xf32> to vector<8x128xf32>
    %315 = vector.shape_cast %311 : vector<8x128xf32> to vector<1x8x128xf32>
    tpu.vector_store %arg7[%312, %c0_73, %c0_74], %315 {strides = array<i32>} : memref<8x8x128xf32, #tpu.memory_space<vmem>>, vector<1x8x128xf32>,
    %316 = vector.broadcast %231 : vector<8x1xf32> to vector<8x128xf32>
    %317 = arith.mulf %316, %309 : vector<8x128xf32>
    %318 = arith.index_cast %221 : i32 to index
    %c0_75 = arith.constant 0 : index
    %c0_76 = arith.constant 0 : index
    %319 = vector.load %arg8[%318, %c0_75, %c0_76] : memref<8x8x128xf32, #tpu.memory_space<vmem>>, vector<1x8x128xf32>
    %320 = vector.shape_cast %319 : vector<1x8x128xf32> to vector<8x128xf32>
    %321 = vector.shape_cast %317 : vector<8x128xf32> to vector<1x8x128xf32>
    tpu.vector_store %arg8[%318, %c0_75, %c0_76], %321 {strides = array<i32>} : memref<8x8x128xf32, #tpu.memory_space<vmem>>, vector<1x8x128xf32>,
    %c3_i32 = arith.constant 3 : i32
    %c7_i32_77 = arith.constant 7 : i32
    %322 = arith.subi %c7_i32_77, %c3_i32 : i32
    %323 = arith.addi %12, %c3_i32 : i32
    %324 = vector.broadcast %323 : i32 to vector<8x1xi32>
    %325 = arith.cmpi slt, %324, %3 : vector<8x1xi32>
    %326 = arith.extui %325 : vector<8x1xi1> to vector<8x1xi32>
    %327 = arith.sitofp %326 : vector<8x1xi32> to vector<8x1xf32>
    %328 = arith.addi %14, %322 : i32
    %329 = vector.broadcast %328 : i32 to vector<8x1xi32>
    %330 = arith.cmpi slt, %329, %3 : vector<8x1xi32>
    %331 = arith.extui %330 : vector<8x1xi1> to vector<8x1xi32>
    %332 = arith.sitofp %331 : vector<8x1xi32> to vector<8x1xf32>
    %333 = arith.index_cast %c3_i32 : i32 to index
    %c0_78 = arith.constant 0 : index
    %c0_79 = arith.constant 0 : index
    %334 = vector.load %arg3[%333, %c0_78, %c0_79] : memref<8x8x384xf32, #tpu.memory_space<vmem>>, vector<1x8x384xf32>
    %335 = vector.shape_cast %334 : vector<1x8x384xf32> to vector<8x384xf32>
    %cst_80 = arith.constant dense<0.000000e+00> : vector<8x384xf32>
    %336 = tpu.matmul %270, %5, %cst_80 {dimension_numbers = #tpu.dot_dimension_numbers<[1], [0], [0], [1], [0, 0, 1, 1], [], []>} : vector<8x128xf32>, vector<128x384xf32>, vector<8x384xf32> -> vector<8x384xf32>
    %337 = vector.broadcast %9 : vector<1x384xf32> to vector<8x384xf32>
    %338 = arith.addf %336, %337 : vector<8x384xf32>
    %339 = vector.extract_strided_slice %335 {offsets = [0, 0], sizes = [8, 128], strides = [1, 1]} : vector<8x384xf32> to vector<8x128xf32>
    %340 = vector.extract_strided_slice %338 {offsets = [0, 0], sizes = [8, 128], strides = [1, 1]} : vector<8x384xf32> to vector<8x128xf32>
    %341 = arith.addf %339, %340 : vector<8x128xf32>
    %342 = arith.negf %341 : vector<8x128xf32>
    %343 = math.exp %342 : vector<8x128xf32>
    %cst_81 = arith.constant 1.000000e+00 : f32
    %344 = vector.broadcast %cst_81 : f32 to vector<8x128xf32>
    %345 = arith.addf %344, %343 : vector<8x128xf32>
    %346 = arith.divf %344, %345 : vector<8x128xf32>
    %347 = vector.extract_strided_slice %335 {offsets = [0, 128], sizes = [8, 128], strides = [1, 1]} : vector<8x384xf32> to vector<8x128xf32>
    %348 = vector.extract_strided_slice %338 {offsets = [0, 128], sizes = [8, 128], strides = [1, 1]} : vector<8x384xf32> to vector<8x128xf32>
    %349 = arith.addf %347, %348 : vector<8x128xf32>
    %350 = arith.negf %349 : vector<8x128xf32>
    %351 = math.exp %350 : vector<8x128xf32>
    %cst_82 = arith.constant 1.000000e+00 : f32
    %352 = vector.broadcast %cst_82 : f32 to vector<8x128xf32>
    %353 = arith.addf %352, %351 : vector<8x128xf32>
    %354 = arith.divf %352, %353 : vector<8x128xf32>
    %355 = vector.extract_strided_slice %335 {offsets = [0, 256], sizes = [8, 128], strides = [1, 1]} : vector<8x384xf32> to vector<8x128xf32>
    %356 = vector.extract_strided_slice %338 {offsets = [0, 256], sizes = [8, 128], strides = [1, 1]} : vector<8x384xf32> to vector<8x128xf32>
    %357 = arith.mulf %346, %356 : vector<8x128xf32>
    %358 = arith.addf %355, %357 : vector<8x128xf32>
    %359 = math.tanh %358 : vector<8x128xf32>
    %cst_83 = arith.constant 1.000000e+00 : f32
    %360 = vector.broadcast %cst_83 : f32 to vector<8x128xf32>
    %361 = arith.subf %360, %354 : vector<8x128xf32>
    %362 = arith.mulf %361, %359 : vector<8x128xf32>
    %363 = arith.mulf %354, %270 : vector<8x128xf32>
    %364 = arith.addf %362, %363 : vector<8x128xf32>
    %365 = vector.broadcast %327 : vector<8x1xf32> to vector<8x128xf32>
    %366 = arith.mulf %365, %364 : vector<8x128xf32>
    %cst_84 = arith.constant 1.000000e+00 : f32
    %367 = vector.broadcast %cst_84 : f32 to vector<8x1xf32>
    %368 = arith.subf %367, %327 : vector<8x1xf32>
    %369 = vector.broadcast %368 : vector<8x1xf32> to vector<8x128xf32>
    %370 = arith.mulf %369, %270 : vector<8x128xf32>
    %371 = arith.addf %366, %370 : vector<8x128xf32>
    %372 = arith.index_cast %322 : i32 to index
    %c0_85 = arith.constant 0 : index
    %c0_86 = arith.constant 0 : index
    %373 = vector.load %arg4[%372, %c0_85, %c0_86] : memref<8x8x384xf32, #tpu.memory_space<vmem>>, vector<1x8x384xf32>
    %374 = vector.shape_cast %373 : vector<1x8x384xf32> to vector<8x384xf32>
    %cst_87 = arith.constant dense<0.000000e+00> : vector<8x384xf32>
    %375 = tpu.matmul %309, %7, %cst_87 {dimension_numbers = #tpu.dot_dimension_numbers<[1], [0], [0], [1], [0, 0, 1, 1], [], []>} : vector<8x128xf32>, vector<128x384xf32>, vector<8x384xf32> -> vector<8x384xf32>
    %376 = vector.broadcast %11 : vector<1x384xf32> to vector<8x384xf32>
    %377 = arith.addf %375, %376 : vector<8x384xf32>
    %378 = vector.extract_strided_slice %374 {offsets = [0, 0], sizes = [8, 128], strides = [1, 1]} : vector<8x384xf32> to vector<8x128xf32>
    %379 = vector.extract_strided_slice %377 {offsets = [0, 0], sizes = [8, 128], strides = [1, 1]} : vector<8x384xf32> to vector<8x128xf32>
    %380 = arith.addf %378, %379 : vector<8x128xf32>
    %381 = arith.negf %380 : vector<8x128xf32>
    %382 = math.exp %381 : vector<8x128xf32>
    %cst_88 = arith.constant 1.000000e+00 : f32
    %383 = vector.broadcast %cst_88 : f32 to vector<8x128xf32>
    %384 = arith.addf %383, %382 : vector<8x128xf32>
    %385 = arith.divf %383, %384 : vector<8x128xf32>
    %386 = vector.extract_strided_slice %374 {offsets = [0, 128], sizes = [8, 128], strides = [1, 1]} : vector<8x384xf32> to vector<8x128xf32>
    %387 = vector.extract_strided_slice %377 {offsets = [0, 128], sizes = [8, 128], strides = [1, 1]} : vector<8x384xf32> to vector<8x128xf32>
    %388 = arith.addf %386, %387 : vector<8x128xf32>
    %389 = arith.negf %388 : vector<8x128xf32>
    %390 = math.exp %389 : vector<8x128xf32>
    %cst_89 = arith.constant 1.000000e+00 : f32
    %391 = vector.broadcast %cst_89 : f32 to vector<8x128xf32>
    %392 = arith.addf %391, %390 : vector<8x128xf32>
    %393 = arith.divf %391, %392 : vector<8x128xf32>
    %394 = vector.extract_strided_slice %374 {offsets = [0, 256], sizes = [8, 128], strides = [1, 1]} : vector<8x384xf32> to vector<8x128xf32>
    %395 = vector.extract_strided_slice %377 {offsets = [0, 256], sizes = [8, 128], strides = [1, 1]} : vector<8x384xf32> to vector<8x128xf32>
    %396 = arith.mulf %385, %395 : vector<8x128xf32>
    %397 = arith.addf %394, %396 : vector<8x128xf32>
    %398 = math.tanh %397 : vector<8x128xf32>
    %cst_90 = arith.constant 1.000000e+00 : f32
    %399 = vector.broadcast %cst_90 : f32 to vector<8x128xf32>
    %400 = arith.subf %399, %393 : vector<8x128xf32>
    %401 = arith.mulf %400, %398 : vector<8x128xf32>
    %402 = arith.mulf %393, %309 : vector<8x128xf32>
    %403 = arith.addf %401, %402 : vector<8x128xf32>
    %404 = vector.broadcast %332 : vector<8x1xf32> to vector<8x128xf32>
    %405 = arith.mulf %404, %403 : vector<8x128xf32>
    %cst_91 = arith.constant 1.000000e+00 : f32
    %406 = vector.broadcast %cst_91 : f32 to vector<8x1xf32>
    %407 = arith.subf %406, %332 : vector<8x1xf32>
    %408 = vector.broadcast %407 : vector<8x1xf32> to vector<8x128xf32>
    %409 = arith.mulf %408, %309 : vector<8x128xf32>
    %410 = arith.addf %405, %409 : vector<8x128xf32>
    %411 = vector.broadcast %327 : vector<8x1xf32> to vector<8x128xf32>
    %412 = arith.mulf %411, %371 : vector<8x128xf32>
    %413 = arith.index_cast %c3_i32 : i32 to index
    %c0_92 = arith.constant 0 : index
    %c0_93 = arith.constant 0 : index
    %414 = vector.load %arg7[%413, %c0_92, %c0_93] : memref<8x8x128xf32, #tpu.memory_space<vmem>>, vector<1x8x128xf32>
    %415 = vector.shape_cast %414 : vector<1x8x128xf32> to vector<8x128xf32>
    %416 = vector.shape_cast %412 : vector<8x128xf32> to vector<1x8x128xf32>
    tpu.vector_store %arg7[%413, %c0_92, %c0_93], %416 {strides = array<i32>} : memref<8x8x128xf32, #tpu.memory_space<vmem>>, vector<1x8x128xf32>,
    %417 = vector.broadcast %332 : vector<8x1xf32> to vector<8x128xf32>
    %418 = arith.mulf %417, %410 : vector<8x128xf32>
    %419 = arith.index_cast %322 : i32 to index
    %c0_94 = arith.constant 0 : index
    %c0_95 = arith.constant 0 : index
    %420 = vector.load %arg8[%419, %c0_94, %c0_95] : memref<8x8x128xf32, #tpu.memory_space<vmem>>, vector<1x8x128xf32>
    %421 = vector.shape_cast %420 : vector<1x8x128xf32> to vector<8x128xf32>
    %422 = vector.shape_cast %418 : vector<8x128xf32> to vector<1x8x128xf32>
    tpu.vector_store %arg8[%419, %c0_94, %c0_95], %422 {strides = array<i32>} : memref<8x8x128xf32, #tpu.memory_space<vmem>>, vector<1x8x128xf32>,
    %c4_i32 = arith.constant 4 : i32
    %c7_i32_96 = arith.constant 7 : i32
    %423 = arith.subi %c7_i32_96, %c4_i32 : i32
    %424 = arith.addi %12, %c4_i32 : i32
    %425 = vector.broadcast %424 : i32 to vector<8x1xi32>
    %426 = arith.cmpi slt, %425, %3 : vector<8x1xi32>
    %427 = arith.extui %426 : vector<8x1xi1> to vector<8x1xi32>
    %428 = arith.sitofp %427 : vector<8x1xi32> to vector<8x1xf32>
    %429 = arith.addi %14, %423 : i32
    %430 = vector.broadcast %429 : i32 to vector<8x1xi32>
    %431 = arith.cmpi slt, %430, %3 : vector<8x1xi32>
    %432 = arith.extui %431 : vector<8x1xi1> to vector<8x1xi32>
    %433 = arith.sitofp %432 : vector<8x1xi32> to vector<8x1xf32>
    %434 = arith.index_cast %c4_i32 : i32 to index
    %c0_97 = arith.constant 0 : index
    %c0_98 = arith.constant 0 : index
    %435 = vector.load %arg3[%434, %c0_97, %c0_98] : memref<8x8x384xf32, #tpu.memory_space<vmem>>, vector<1x8x384xf32>
    %436 = vector.shape_cast %435 : vector<1x8x384xf32> to vector<8x384xf32>
    %cst_99 = arith.constant dense<0.000000e+00> : vector<8x384xf32>
    %437 = tpu.matmul %371, %5, %cst_99 {dimension_numbers = #tpu.dot_dimension_numbers<[1], [0], [0], [1], [0, 0, 1, 1], [], []>} : vector<8x128xf32>, vector<128x384xf32>, vector<8x384xf32> -> vector<8x384xf32>
    %438 = vector.broadcast %9 : vector<1x384xf32> to vector<8x384xf32>
    %439 = arith.addf %437, %438 : vector<8x384xf32>
    %440 = vector.extract_strided_slice %436 {offsets = [0, 0], sizes = [8, 128], strides = [1, 1]} : vector<8x384xf32> to vector<8x128xf32>
    %441 = vector.extract_strided_slice %439 {offsets = [0, 0], sizes = [8, 128], strides = [1, 1]} : vector<8x384xf32> to vector<8x128xf32>
    %442 = arith.addf %440, %441 : vector<8x128xf32>
    %443 = arith.negf %442 : vector<8x128xf32>
    %444 = math.exp %443 : vector<8x128xf32>
    %cst_100 = arith.constant 1.000000e+00 : f32
    %445 = vector.broadcast %cst_100 : f32 to vector<8x128xf32>
    %446 = arith.addf %445, %444 : vector<8x128xf32>
    %447 = arith.divf %445, %446 : vector<8x128xf32>
    %448 = vector.extract_strided_slice %436 {offsets = [0, 128], sizes = [8, 128], strides = [1, 1]} : vector<8x384xf32> to vector<8x128xf32>
    %449 = vector.extract_strided_slice %439 {offsets = [0, 128], sizes = [8, 128], strides = [1, 1]} : vector<8x384xf32> to vector<8x128xf32>
    %450 = arith.addf %448, %449 : vector<8x128xf32>
    %451 = arith.negf %450 : vector<8x128xf32>
    %452 = math.exp %451 : vector<8x128xf32>
    %cst_101 = arith.constant 1.000000e+00 : f32
    %453 = vector.broadcast %cst_101 : f32 to vector<8x128xf32>
    %454 = arith.addf %453, %452 : vector<8x128xf32>
    %455 = arith.divf %453, %454 : vector<8x128xf32>
    %456 = vector.extract_strided_slice %436 {offsets = [0, 256], sizes = [8, 128], strides = [1, 1]} : vector<8x384xf32> to vector<8x128xf32>
    %457 = vector.extract_strided_slice %439 {offsets = [0, 256], sizes = [8, 128], strides = [1, 1]} : vector<8x384xf32> to vector<8x128xf32>
    %458 = arith.mulf %447, %457 : vector<8x128xf32>
    %459 = arith.addf %456, %458 : vector<8x128xf32>
    %460 = math.tanh %459 : vector<8x128xf32>
    %cst_102 = arith.constant 1.000000e+00 : f32
    %461 = vector.broadcast %cst_102 : f32 to vector<8x128xf32>
    %462 = arith.subf %461, %455 : vector<8x128xf32>
    %463 = arith.mulf %462, %460 : vector<8x128xf32>
    %464 = arith.mulf %455, %371 : vector<8x128xf32>
    %465 = arith.addf %463, %464 : vector<8x128xf32>
    %466 = vector.broadcast %428 : vector<8x1xf32> to vector<8x128xf32>
    %467 = arith.mulf %466, %465 : vector<8x128xf32>
    %cst_103 = arith.constant 1.000000e+00 : f32
    %468 = vector.broadcast %cst_103 : f32 to vector<8x1xf32>
    %469 = arith.subf %468, %428 : vector<8x1xf32>
    %470 = vector.broadcast %469 : vector<8x1xf32> to vector<8x128xf32>
    %471 = arith.mulf %470, %371 : vector<8x128xf32>
    %472 = arith.addf %467, %471 : vector<8x128xf32>
    %473 = arith.index_cast %423 : i32 to index
    %c0_104 = arith.constant 0 : index
    %c0_105 = arith.constant 0 : index
    %474 = vector.load %arg4[%473, %c0_104, %c0_105] : memref<8x8x384xf32, #tpu.memory_space<vmem>>, vector<1x8x384xf32>
    %475 = vector.shape_cast %474 : vector<1x8x384xf32> to vector<8x384xf32>
    %cst_106 = arith.constant dense<0.000000e+00> : vector<8x384xf32>
    %476 = tpu.matmul %410, %7, %cst_106 {dimension_numbers = #tpu.dot_dimension_numbers<[1], [0], [0], [1], [0, 0, 1, 1], [], []>} : vector<8x128xf32>, vector<128x384xf32>, vector<8x384xf32> -> vector<8x384xf32>
    %477 = vector.broadcast %11 : vector<1x384xf32> to vector<8x384xf32>
    %478 = arith.addf %476, %477 : vector<8x384xf32>
    %479 = vector.extract_strided_slice %475 {offsets = [0, 0], sizes = [8, 128], strides = [1, 1]} : vector<8x384xf32> to vector<8x128xf32>
    %480 = vector.extract_strided_slice %478 {offsets = [0, 0], sizes = [8, 128], strides = [1, 1]} : vector<8x384xf32> to vector<8x128xf32>
    %481 = arith.addf %479, %480 : vector<8x128xf32>
    %482 = arith.negf %481 : vector<8x128xf32>
    %483 = math.exp %482 : vector<8x128xf32>
    %cst_107 = arith.constant 1.000000e+00 : f32
    %484 = vector.broadcast %cst_107 : f32 to vector<8x128xf32>
    %485 = arith.addf %484, %483 : vector<8x128xf32>
    %486 = arith.divf %484, %485 : vector<8x128xf32>
    %487 = vector.extract_strided_slice %475 {offsets = [0, 128], sizes = [8, 128], strides = [1, 1]} : vector<8x384xf32> to vector<8x128xf32>
    %488 = vector.extract_strided_slice %478 {offsets = [0, 128], sizes = [8, 128], strides = [1, 1]} : vector<8x384xf32> to vector<8x128xf32>
    %489 = arith.addf %487, %488 : vector<8x128xf32>
    %490 = arith.negf %489 : vector<8x128xf32>
    %491 = math.exp %490 : vector<8x128xf32>
    %cst_108 = arith.constant 1.000000e+00 : f32
    %492 = vector.broadcast %cst_108 : f32 to vector<8x128xf32>
    %493 = arith.addf %492, %491 : vector<8x128xf32>
    %494 = arith.divf %492, %493 : vector<8x128xf32>
    %495 = vector.extract_strided_slice %475 {offsets = [0, 256], sizes = [8, 128], strides = [1, 1]} : vector<8x384xf32> to vector<8x128xf32>
    %496 = vector.extract_strided_slice %478 {offsets = [0, 256], sizes = [8, 128], strides = [1, 1]} : vector<8x384xf32> to vector<8x128xf32>
    %497 = arith.mulf %486, %496 : vector<8x128xf32>
    %498 = arith.addf %495, %497 : vector<8x128xf32>
    %499 = math.tanh %498 : vector<8x128xf32>
    %cst_109 = arith.constant 1.000000e+00 : f32
    %500 = vector.broadcast %cst_109 : f32 to vector<8x128xf32>
    %501 = arith.subf %500, %494 : vector<8x128xf32>
    %502 = arith.mulf %501, %499 : vector<8x128xf32>
    %503 = arith.mulf %494, %410 : vector<8x128xf32>
    %504 = arith.addf %502, %503 : vector<8x128xf32>
    %505 = vector.broadcast %433 : vector<8x1xf32> to vector<8x128xf32>
    %506 = arith.mulf %505, %504 : vector<8x128xf32>
    %cst_110 = arith.constant 1.000000e+00 : f32
    %507 = vector.broadcast %cst_110 : f32 to vector<8x1xf32>
    %508 = arith.subf %507, %433 : vector<8x1xf32>
    %509 = vector.broadcast %508 : vector<8x1xf32> to vector<8x128xf32>
    %510 = arith.mulf %509, %410 : vector<8x128xf32>
    %511 = arith.addf %506, %510 : vector<8x128xf32>
    %512 = vector.broadcast %428 : vector<8x1xf32> to vector<8x128xf32>
    %513 = arith.mulf %512, %472 : vector<8x128xf32>
    %514 = arith.index_cast %c4_i32 : i32 to index
    %c0_111 = arith.constant 0 : index
    %c0_112 = arith.constant 0 : index
    %515 = vector.load %arg7[%514, %c0_111, %c0_112] : memref<8x8x128xf32, #tpu.memory_space<vmem>>, vector<1x8x128xf32>
    %516 = vector.shape_cast %515 : vector<1x8x128xf32> to vector<8x128xf32>
    %517 = vector.shape_cast %513 : vector<8x128xf32> to vector<1x8x128xf32>
    tpu.vector_store %arg7[%514, %c0_111, %c0_112], %517 {strides = array<i32>} : memref<8x8x128xf32, #tpu.memory_space<vmem>>, vector<1x8x128xf32>,
    %518 = vector.broadcast %433 : vector<8x1xf32> to vector<8x128xf32>
    %519 = arith.mulf %518, %511 : vector<8x128xf32>
    %520 = arith.index_cast %423 : i32 to index
    %c0_113 = arith.constant 0 : index
    %c0_114 = arith.constant 0 : index
    %521 = vector.load %arg8[%520, %c0_113, %c0_114] : memref<8x8x128xf32, #tpu.memory_space<vmem>>, vector<1x8x128xf32>
    %522 = vector.shape_cast %521 : vector<1x8x128xf32> to vector<8x128xf32>
    %523 = vector.shape_cast %519 : vector<8x128xf32> to vector<1x8x128xf32>
    tpu.vector_store %arg8[%520, %c0_113, %c0_114], %523 {strides = array<i32>} : memref<8x8x128xf32, #tpu.memory_space<vmem>>, vector<1x8x128xf32>,
    %c5_i32 = arith.constant 5 : i32
    %c7_i32_115 = arith.constant 7 : i32
    %524 = arith.subi %c7_i32_115, %c5_i32 : i32
    %525 = arith.addi %12, %c5_i32 : i32
    %526 = vector.broadcast %525 : i32 to vector<8x1xi32>
    %527 = arith.cmpi slt, %526, %3 : vector<8x1xi32>
    %528 = arith.extui %527 : vector<8x1xi1> to vector<8x1xi32>
    %529 = arith.sitofp %528 : vector<8x1xi32> to vector<8x1xf32>
    %530 = arith.addi %14, %524 : i32
    %531 = vector.broadcast %530 : i32 to vector<8x1xi32>
    %532 = arith.cmpi slt, %531, %3 : vector<8x1xi32>
    %533 = arith.extui %532 : vector<8x1xi1> to vector<8x1xi32>
    %534 = arith.sitofp %533 : vector<8x1xi32> to vector<8x1xf32>
    %535 = arith.index_cast %c5_i32 : i32 to index
    %c0_116 = arith.constant 0 : index
    %c0_117 = arith.constant 0 : index
    %536 = vector.load %arg3[%535, %c0_116, %c0_117] : memref<8x8x384xf32, #tpu.memory_space<vmem>>, vector<1x8x384xf32>
    %537 = vector.shape_cast %536 : vector<1x8x384xf32> to vector<8x384xf32>
    %cst_118 = arith.constant dense<0.000000e+00> : vector<8x384xf32>
    %538 = tpu.matmul %472, %5, %cst_118 {dimension_numbers = #tpu.dot_dimension_numbers<[1], [0], [0], [1], [0, 0, 1, 1], [], []>} : vector<8x128xf32>, vector<128x384xf32>, vector<8x384xf32> -> vector<8x384xf32>
    %539 = vector.broadcast %9 : vector<1x384xf32> to vector<8x384xf32>
    %540 = arith.addf %538, %539 : vector<8x384xf32>
    %541 = vector.extract_strided_slice %537 {offsets = [0, 0], sizes = [8, 128], strides = [1, 1]} : vector<8x384xf32> to vector<8x128xf32>
    %542 = vector.extract_strided_slice %540 {offsets = [0, 0], sizes = [8, 128], strides = [1, 1]} : vector<8x384xf32> to vector<8x128xf32>
    %543 = arith.addf %541, %542 : vector<8x128xf32>
    %544 = arith.negf %543 : vector<8x128xf32>
    %545 = math.exp %544 : vector<8x128xf32>
    %cst_119 = arith.constant 1.000000e+00 : f32
    %546 = vector.broadcast %cst_119 : f32 to vector<8x128xf32>
    %547 = arith.addf %546, %545 : vector<8x128xf32>
    %548 = arith.divf %546, %547 : vector<8x128xf32>
    %549 = vector.extract_strided_slice %537 {offsets = [0, 128], sizes = [8, 128], strides = [1, 1]} : vector<8x384xf32> to vector<8x128xf32>
    %550 = vector.extract_strided_slice %540 {offsets = [0, 128], sizes = [8, 128], strides = [1, 1]} : vector<8x384xf32> to vector<8x128xf32>
    %551 = arith.addf %549, %550 : vector<8x128xf32>
    %552 = arith.negf %551 : vector<8x128xf32>
    %553 = math.exp %552 : vector<8x128xf32>
    %cst_120 = arith.constant 1.000000e+00 : f32
    %554 = vector.broadcast %cst_120 : f32 to vector<8x128xf32>
    %555 = arith.addf %554, %553 : vector<8x128xf32>
    %556 = arith.divf %554, %555 : vector<8x128xf32>
    %557 = vector.extract_strided_slice %537 {offsets = [0, 256], sizes = [8, 128], strides = [1, 1]} : vector<8x384xf32> to vector<8x128xf32>
    %558 = vector.extract_strided_slice %540 {offsets = [0, 256], sizes = [8, 128], strides = [1, 1]} : vector<8x384xf32> to vector<8x128xf32>
    %559 = arith.mulf %548, %558 : vector<8x128xf32>
    %560 = arith.addf %557, %559 : vector<8x128xf32>
    %561 = math.tanh %560 : vector<8x128xf32>
    %cst_121 = arith.constant 1.000000e+00 : f32
    %562 = vector.broadcast %cst_121 : f32 to vector<8x128xf32>
    %563 = arith.subf %562, %556 : vector<8x128xf32>
    %564 = arith.mulf %563, %561 : vector<8x128xf32>
    %565 = arith.mulf %556, %472 : vector<8x128xf32>
    %566 = arith.addf %564, %565 : vector<8x128xf32>
    %567 = vector.broadcast %529 : vector<8x1xf32> to vector<8x128xf32>
    %568 = arith.mulf %567, %566 : vector<8x128xf32>
    %cst_122 = arith.constant 1.000000e+00 : f32
    %569 = vector.broadcast %cst_122 : f32 to vector<8x1xf32>
    %570 = arith.subf %569, %529 : vector<8x1xf32>
    %571 = vector.broadcast %570 : vector<8x1xf32> to vector<8x128xf32>
    %572 = arith.mulf %571, %472 : vector<8x128xf32>
    %573 = arith.addf %568, %572 : vector<8x128xf32>
    %574 = arith.index_cast %524 : i32 to index
    %c0_123 = arith.constant 0 : index
    %c0_124 = arith.constant 0 : index
    %575 = vector.load %arg4[%574, %c0_123, %c0_124] : memref<8x8x384xf32, #tpu.memory_space<vmem>>, vector<1x8x384xf32>
    %576 = vector.shape_cast %575 : vector<1x8x384xf32> to vector<8x384xf32>
    %cst_125 = arith.constant dense<0.000000e+00> : vector<8x384xf32>
    %577 = tpu.matmul %511, %7, %cst_125 {dimension_numbers = #tpu.dot_dimension_numbers<[1], [0], [0], [1], [0, 0, 1, 1], [], []>} : vector<8x128xf32>, vector<128x384xf32>, vector<8x384xf32> -> vector<8x384xf32>
    %578 = vector.broadcast %11 : vector<1x384xf32> to vector<8x384xf32>
    %579 = arith.addf %577, %578 : vector<8x384xf32>
    %580 = vector.extract_strided_slice %576 {offsets = [0, 0], sizes = [8, 128], strides = [1, 1]} : vector<8x384xf32> to vector<8x128xf32>
    %581 = vector.extract_strided_slice %579 {offsets = [0, 0], sizes = [8, 128], strides = [1, 1]} : vector<8x384xf32> to vector<8x128xf32>
    %582 = arith.addf %580, %581 : vector<8x128xf32>
    %583 = arith.negf %582 : vector<8x128xf32>
    %584 = math.exp %583 : vector<8x128xf32>
    %cst_126 = arith.constant 1.000000e+00 : f32
    %585 = vector.broadcast %cst_126 : f32 to vector<8x128xf32>
    %586 = arith.addf %585, %584 : vector<8x128xf32>
    %587 = arith.divf %585, %586 : vector<8x128xf32>
    %588 = vector.extract_strided_slice %576 {offsets = [0, 128], sizes = [8, 128], strides = [1, 1]} : vector<8x384xf32> to vector<8x128xf32>
    %589 = vector.extract_strided_slice %579 {offsets = [0, 128], sizes = [8, 128], strides = [1, 1]} : vector<8x384xf32> to vector<8x128xf32>
    %590 = arith.addf %588, %589 : vector<8x128xf32>
    %591 = arith.negf %590 : vector<8x128xf32>
    %592 = math.exp %591 : vector<8x128xf32>
    %cst_127 = arith.constant 1.000000e+00 : f32
    %593 = vector.broadcast %cst_127 : f32 to vector<8x128xf32>
    %594 = arith.addf %593, %592 : vector<8x128xf32>
    %595 = arith.divf %593, %594 : vector<8x128xf32>
    %596 = vector.extract_strided_slice %576 {offsets = [0, 256], sizes = [8, 128], strides = [1, 1]} : vector<8x384xf32> to vector<8x128xf32>
    %597 = vector.extract_strided_slice %579 {offsets = [0, 256], sizes = [8, 128], strides = [1, 1]} : vector<8x384xf32> to vector<8x128xf32>
    %598 = arith.mulf %587, %597 : vector<8x128xf32>
    %599 = arith.addf %596, %598 : vector<8x128xf32>
    %600 = math.tanh %599 : vector<8x128xf32>
    %cst_128 = arith.constant 1.000000e+00 : f32
    %601 = vector.broadcast %cst_128 : f32 to vector<8x128xf32>
    %602 = arith.subf %601, %595 : vector<8x128xf32>
    %603 = arith.mulf %602, %600 : vector<8x128xf32>
    %604 = arith.mulf %595, %511 : vector<8x128xf32>
    %605 = arith.addf %603, %604 : vector<8x128xf32>
    %606 = vector.broadcast %534 : vector<8x1xf32> to vector<8x128xf32>
    %607 = arith.mulf %606, %605 : vector<8x128xf32>
    %cst_129 = arith.constant 1.000000e+00 : f32
    %608 = vector.broadcast %cst_129 : f32 to vector<8x1xf32>
    %609 = arith.subf %608, %534 : vector<8x1xf32>
    %610 = vector.broadcast %609 : vector<8x1xf32> to vector<8x128xf32>
    %611 = arith.mulf %610, %511 : vector<8x128xf32>
    %612 = arith.addf %607, %611 : vector<8x128xf32>
    %613 = vector.broadcast %529 : vector<8x1xf32> to vector<8x128xf32>
    %614 = arith.mulf %613, %573 : vector<8x128xf32>
    %615 = arith.index_cast %c5_i32 : i32 to index
    %c0_130 = arith.constant 0 : index
    %c0_131 = arith.constant 0 : index
    %616 = vector.load %arg7[%615, %c0_130, %c0_131] : memref<8x8x128xf32, #tpu.memory_space<vmem>>, vector<1x8x128xf32>
    %617 = vector.shape_cast %616 : vector<1x8x128xf32> to vector<8x128xf32>
    %618 = vector.shape_cast %614 : vector<8x128xf32> to vector<1x8x128xf32>
    tpu.vector_store %arg7[%615, %c0_130, %c0_131], %618 {strides = array<i32>} : memref<8x8x128xf32, #tpu.memory_space<vmem>>, vector<1x8x128xf32>,
    %619 = vector.broadcast %534 : vector<8x1xf32> to vector<8x128xf32>
    %620 = arith.mulf %619, %612 : vector<8x128xf32>
    %621 = arith.index_cast %524 : i32 to index
    %c0_132 = arith.constant 0 : index
    %c0_133 = arith.constant 0 : index
    %622 = vector.load %arg8[%621, %c0_132, %c0_133] : memref<8x8x128xf32, #tpu.memory_space<vmem>>, vector<1x8x128xf32>
    %623 = vector.shape_cast %622 : vector<1x8x128xf32> to vector<8x128xf32>
    %624 = vector.shape_cast %620 : vector<8x128xf32> to vector<1x8x128xf32>
    tpu.vector_store %arg8[%621, %c0_132, %c0_133], %624 {strides = array<i32>} : memref<8x8x128xf32, #tpu.memory_space<vmem>>, vector<1x8x128xf32>,
    %c6_i32 = arith.constant 6 : i32
    %c7_i32_134 = arith.constant 7 : i32
    %625 = arith.subi %c7_i32_134, %c6_i32 : i32
    %626 = arith.addi %12, %c6_i32 : i32
    %627 = vector.broadcast %626 : i32 to vector<8x1xi32>
    %628 = arith.cmpi slt, %627, %3 : vector<8x1xi32>
    %629 = arith.extui %628 : vector<8x1xi1> to vector<8x1xi32>
    %630 = arith.sitofp %629 : vector<8x1xi32> to vector<8x1xf32>
    %631 = arith.addi %14, %625 : i32
    %632 = vector.broadcast %631 : i32 to vector<8x1xi32>
    %633 = arith.cmpi slt, %632, %3 : vector<8x1xi32>
    %634 = arith.extui %633 : vector<8x1xi1> to vector<8x1xi32>
    %635 = arith.sitofp %634 : vector<8x1xi32> to vector<8x1xf32>
    %636 = arith.index_cast %c6_i32 : i32 to index
    %c0_135 = arith.constant 0 : index
    %c0_136 = arith.constant 0 : index
    %637 = vector.load %arg3[%636, %c0_135, %c0_136] : memref<8x8x384xf32, #tpu.memory_space<vmem>>, vector<1x8x384xf32>
    %638 = vector.shape_cast %637 : vector<1x8x384xf32> to vector<8x384xf32>
    %cst_137 = arith.constant dense<0.000000e+00> : vector<8x384xf32>
    %639 = tpu.matmul %573, %5, %cst_137 {dimension_numbers = #tpu.dot_dimension_numbers<[1], [0], [0], [1], [0, 0, 1, 1], [], []>} : vector<8x128xf32>, vector<128x384xf32>, vector<8x384xf32> -> vector<8x384xf32>
    %640 = vector.broadcast %9 : vector<1x384xf32> to vector<8x384xf32>
    %641 = arith.addf %639, %640 : vector<8x384xf32>
    %642 = vector.extract_strided_slice %638 {offsets = [0, 0], sizes = [8, 128], strides = [1, 1]} : vector<8x384xf32> to vector<8x128xf32>
    %643 = vector.extract_strided_slice %641 {offsets = [0, 0], sizes = [8, 128], strides = [1, 1]} : vector<8x384xf32> to vector<8x128xf32>
    %644 = arith.addf %642, %643 : vector<8x128xf32>
    %645 = arith.negf %644 : vector<8x128xf32>
    %646 = math.exp %645 : vector<8x128xf32>
    %cst_138 = arith.constant 1.000000e+00 : f32
    %647 = vector.broadcast %cst_138 : f32 to vector<8x128xf32>
    %648 = arith.addf %647, %646 : vector<8x128xf32>
    %649 = arith.divf %647, %648 : vector<8x128xf32>
    %650 = vector.extract_strided_slice %638 {offsets = [0, 128], sizes = [8, 128], strides = [1, 1]} : vector<8x384xf32> to vector<8x128xf32>
    %651 = vector.extract_strided_slice %641 {offsets = [0, 128], sizes = [8, 128], strides = [1, 1]} : vector<8x384xf32> to vector<8x128xf32>
    %652 = arith.addf %650, %651 : vector<8x128xf32>
    %653 = arith.negf %652 : vector<8x128xf32>
    %654 = math.exp %653 : vector<8x128xf32>
    %cst_139 = arith.constant 1.000000e+00 : f32
    %655 = vector.broadcast %cst_139 : f32 to vector<8x128xf32>
    %656 = arith.addf %655, %654 : vector<8x128xf32>
    %657 = arith.divf %655, %656 : vector<8x128xf32>
    %658 = vector.extract_strided_slice %638 {offsets = [0, 256], sizes = [8, 128], strides = [1, 1]} : vector<8x384xf32> to vector<8x128xf32>
    %659 = vector.extract_strided_slice %641 {offsets = [0, 256], sizes = [8, 128], strides = [1, 1]} : vector<8x384xf32> to vector<8x128xf32>
    %660 = arith.mulf %649, %659 : vector<8x128xf32>
    %661 = arith.addf %658, %660 : vector<8x128xf32>
    %662 = math.tanh %661 : vector<8x128xf32>
    %cst_140 = arith.constant 1.000000e+00 : f32
    %663 = vector.broadcast %cst_140 : f32 to vector<8x128xf32>
    %664 = arith.subf %663, %657 : vector<8x128xf32>
    %665 = arith.mulf %664, %662 : vector<8x128xf32>
    %666 = arith.mulf %657, %573 : vector<8x128xf32>
    %667 = arith.addf %665, %666 : vector<8x128xf32>
    %668 = vector.broadcast %630 : vector<8x1xf32> to vector<8x128xf32>
    %669 = arith.mulf %668, %667 : vector<8x128xf32>
    %cst_141 = arith.constant 1.000000e+00 : f32
    %670 = vector.broadcast %cst_141 : f32 to vector<8x1xf32>
    %671 = arith.subf %670, %630 : vector<8x1xf32>
    %672 = vector.broadcast %671 : vector<8x1xf32> to vector<8x128xf32>
    %673 = arith.mulf %672, %573 : vector<8x128xf32>
    %674 = arith.addf %669, %673 : vector<8x128xf32>
    %675 = arith.index_cast %625 : i32 to index
    %c0_142 = arith.constant 0 : index
    %c0_143 = arith.constant 0 : index
    %676 = vector.load %arg4[%675, %c0_142, %c0_143] : memref<8x8x384xf32, #tpu.memory_space<vmem>>, vector<1x8x384xf32>
    %677 = vector.shape_cast %676 : vector<1x8x384xf32> to vector<8x384xf32>
    %cst_144 = arith.constant dense<0.000000e+00> : vector<8x384xf32>
    %678 = tpu.matmul %612, %7, %cst_144 {dimension_numbers = #tpu.dot_dimension_numbers<[1], [0], [0], [1], [0, 0, 1, 1], [], []>} : vector<8x128xf32>, vector<128x384xf32>, vector<8x384xf32> -> vector<8x384xf32>
    %679 = vector.broadcast %11 : vector<1x384xf32> to vector<8x384xf32>
    %680 = arith.addf %678, %679 : vector<8x384xf32>
    %681 = vector.extract_strided_slice %677 {offsets = [0, 0], sizes = [8, 128], strides = [1, 1]} : vector<8x384xf32> to vector<8x128xf32>
    %682 = vector.extract_strided_slice %680 {offsets = [0, 0], sizes = [8, 128], strides = [1, 1]} : vector<8x384xf32> to vector<8x128xf32>
    %683 = arith.addf %681, %682 : vector<8x128xf32>
    %684 = arith.negf %683 : vector<8x128xf32>
    %685 = math.exp %684 : vector<8x128xf32>
    %cst_145 = arith.constant 1.000000e+00 : f32
    %686 = vector.broadcast %cst_145 : f32 to vector<8x128xf32>
    %687 = arith.addf %686, %685 : vector<8x128xf32>
    %688 = arith.divf %686, %687 : vector<8x128xf32>
    %689 = vector.extract_strided_slice %677 {offsets = [0, 128], sizes = [8, 128], strides = [1, 1]} : vector<8x384xf32> to vector<8x128xf32>
    %690 = vector.extract_strided_slice %680 {offsets = [0, 128], sizes = [8, 128], strides = [1, 1]} : vector<8x384xf32> to vector<8x128xf32>
    %691 = arith.addf %689, %690 : vector<8x128xf32>
    %692 = arith.negf %691 : vector<8x128xf32>
    %693 = math.exp %692 : vector<8x128xf32>
    %cst_146 = arith.constant 1.000000e+00 : f32
    %694 = vector.broadcast %cst_146 : f32 to vector<8x128xf32>
    %695 = arith.addf %694, %693 : vector<8x128xf32>
    %696 = arith.divf %694, %695 : vector<8x128xf32>
    %697 = vector.extract_strided_slice %677 {offsets = [0, 256], sizes = [8, 128], strides = [1, 1]} : vector<8x384xf32> to vector<8x128xf32>
    %698 = vector.extract_strided_slice %680 {offsets = [0, 256], sizes = [8, 128], strides = [1, 1]} : vector<8x384xf32> to vector<8x128xf32>
    %699 = arith.mulf %688, %698 : vector<8x128xf32>
    %700 = arith.addf %697, %699 : vector<8x128xf32>
    %701 = math.tanh %700 : vector<8x128xf32>
    %cst_147 = arith.constant 1.000000e+00 : f32
    %702 = vector.broadcast %cst_147 : f32 to vector<8x128xf32>
    %703 = arith.subf %702, %696 : vector<8x128xf32>
    %704 = arith.mulf %703, %701 : vector<8x128xf32>
    %705 = arith.mulf %696, %612 : vector<8x128xf32>
    %706 = arith.addf %704, %705 : vector<8x128xf32>
    %707 = vector.broadcast %635 : vector<8x1xf32> to vector<8x128xf32>
    %708 = arith.mulf %707, %706 : vector<8x128xf32>
    %cst_148 = arith.constant 1.000000e+00 : f32
    %709 = vector.broadcast %cst_148 : f32 to vector<8x1xf32>
    %710 = arith.subf %709, %635 : vector<8x1xf32>
    %711 = vector.broadcast %710 : vector<8x1xf32> to vector<8x128xf32>
    %712 = arith.mulf %711, %612 : vector<8x128xf32>
    %713 = arith.addf %708, %712 : vector<8x128xf32>
    %714 = vector.broadcast %630 : vector<8x1xf32> to vector<8x128xf32>
    %715 = arith.mulf %714, %674 : vector<8x128xf32>
    %716 = arith.index_cast %c6_i32 : i32 to index
    %c0_149 = arith.constant 0 : index
    %c0_150 = arith.constant 0 : index
    %717 = vector.load %arg7[%716, %c0_149, %c0_150] : memref<8x8x128xf32, #tpu.memory_space<vmem>>, vector<1x8x128xf32>
    %718 = vector.shape_cast %717 : vector<1x8x128xf32> to vector<8x128xf32>
    %719 = vector.shape_cast %715 : vector<8x128xf32> to vector<1x8x128xf32>
    tpu.vector_store %arg7[%716, %c0_149, %c0_150], %719 {strides = array<i32>} : memref<8x8x128xf32, #tpu.memory_space<vmem>>, vector<1x8x128xf32>,
    %720 = vector.broadcast %635 : vector<8x1xf32> to vector<8x128xf32>
    %721 = arith.mulf %720, %713 : vector<8x128xf32>
    %722 = arith.index_cast %625 : i32 to index
    %c0_151 = arith.constant 0 : index
    %c0_152 = arith.constant 0 : index
    %723 = vector.load %arg8[%722, %c0_151, %c0_152] : memref<8x8x128xf32, #tpu.memory_space<vmem>>, vector<1x8x128xf32>
    %724 = vector.shape_cast %723 : vector<1x8x128xf32> to vector<8x128xf32>
    %725 = vector.shape_cast %721 : vector<8x128xf32> to vector<1x8x128xf32>
    tpu.vector_store %arg8[%722, %c0_151, %c0_152], %725 {strides = array<i32>} : memref<8x8x128xf32, #tpu.memory_space<vmem>>, vector<1x8x128xf32>,
    %c7_i32_153 = arith.constant 7 : i32
    %c7_i32_154 = arith.constant 7 : i32
    %726 = arith.subi %c7_i32_154, %c7_i32_153 : i32
    %727 = arith.addi %12, %c7_i32_153 : i32
    %728 = vector.broadcast %727 : i32 to vector<8x1xi32>
    %729 = arith.cmpi slt, %728, %3 : vector<8x1xi32>
    %730 = arith.extui %729 : vector<8x1xi1> to vector<8x1xi32>
    %731 = arith.sitofp %730 : vector<8x1xi32> to vector<8x1xf32>
    %732 = arith.addi %14, %726 : i32
    %733 = vector.broadcast %732 : i32 to vector<8x1xi32>
    %734 = arith.cmpi slt, %733, %3 : vector<8x1xi32>
    %735 = arith.extui %734 : vector<8x1xi1> to vector<8x1xi32>
    %736 = arith.sitofp %735 : vector<8x1xi32> to vector<8x1xf32>
    %737 = arith.index_cast %c7_i32_153 : i32 to index
    %c0_155 = arith.constant 0 : index
    %c0_156 = arith.constant 0 : index
    %738 = vector.load %arg3[%737, %c0_155, %c0_156] : memref<8x8x384xf32, #tpu.memory_space<vmem>>, vector<1x8x384xf32>
    %739 = vector.shape_cast %738 : vector<1x8x384xf32> to vector<8x384xf32>
    %cst_157 = arith.constant dense<0.000000e+00> : vector<8x384xf32>
    %740 = tpu.matmul %674, %5, %cst_157 {dimension_numbers = #tpu.dot_dimension_numbers<[1], [0], [0], [1], [0, 0, 1, 1], [], []>} : vector<8x128xf32>, vector<128x384xf32>, vector<8x384xf32> -> vector<8x384xf32>
    %741 = vector.broadcast %9 : vector<1x384xf32> to vector<8x384xf32>
    %742 = arith.addf %740, %741 : vector<8x384xf32>
    %743 = vector.extract_strided_slice %739 {offsets = [0, 0], sizes = [8, 128], strides = [1, 1]} : vector<8x384xf32> to vector<8x128xf32>
    %744 = vector.extract_strided_slice %742 {offsets = [0, 0], sizes = [8, 128], strides = [1, 1]} : vector<8x384xf32> to vector<8x128xf32>
    %745 = arith.addf %743, %744 : vector<8x128xf32>
    %746 = arith.negf %745 : vector<8x128xf32>
    %747 = math.exp %746 : vector<8x128xf32>
    %cst_158 = arith.constant 1.000000e+00 : f32
    %748 = vector.broadcast %cst_158 : f32 to vector<8x128xf32>
    %749 = arith.addf %748, %747 : vector<8x128xf32>
    %750 = arith.divf %748, %749 : vector<8x128xf32>
    %751 = vector.extract_strided_slice %739 {offsets = [0, 128], sizes = [8, 128], strides = [1, 1]} : vector<8x384xf32> to vector<8x128xf32>
    %752 = vector.extract_strided_slice %742 {offsets = [0, 128], sizes = [8, 128], strides = [1, 1]} : vector<8x384xf32> to vector<8x128xf32>
    %753 = arith.addf %751, %752 : vector<8x128xf32>
    %754 = arith.negf %753 : vector<8x128xf32>
    %755 = math.exp %754 : vector<8x128xf32>
    %cst_159 = arith.constant 1.000000e+00 : f32
    %756 = vector.broadcast %cst_159 : f32 to vector<8x128xf32>
    %757 = arith.addf %756, %755 : vector<8x128xf32>
    %758 = arith.divf %756, %757 : vector<8x128xf32>
    %759 = vector.extract_strided_slice %739 {offsets = [0, 256], sizes = [8, 128], strides = [1, 1]} : vector<8x384xf32> to vector<8x128xf32>
    %760 = vector.extract_strided_slice %742 {offsets = [0, 256], sizes = [8, 128], strides = [1, 1]} : vector<8x384xf32> to vector<8x128xf32>
    %761 = arith.mulf %750, %760 : vector<8x128xf32>
    %762 = arith.addf %759, %761 : vector<8x128xf32>
    %763 = math.tanh %762 : vector<8x128xf32>
    %cst_160 = arith.constant 1.000000e+00 : f32
    %764 = vector.broadcast %cst_160 : f32 to vector<8x128xf32>
    %765 = arith.subf %764, %758 : vector<8x128xf32>
    %766 = arith.mulf %765, %763 : vector<8x128xf32>
    %767 = arith.mulf %758, %674 : vector<8x128xf32>
    %768 = arith.addf %766, %767 : vector<8x128xf32>
    %769 = vector.broadcast %731 : vector<8x1xf32> to vector<8x128xf32>
    %770 = arith.mulf %769, %768 : vector<8x128xf32>
    %cst_161 = arith.constant 1.000000e+00 : f32
    %771 = vector.broadcast %cst_161 : f32 to vector<8x1xf32>
    %772 = arith.subf %771, %731 : vector<8x1xf32>
    %773 = vector.broadcast %772 : vector<8x1xf32> to vector<8x128xf32>
    %774 = arith.mulf %773, %674 : vector<8x128xf32>
    %775 = arith.addf %770, %774 : vector<8x128xf32>
    %776 = arith.index_cast %726 : i32 to index
    %c0_162 = arith.constant 0 : index
    %c0_163 = arith.constant 0 : index
    %777 = vector.load %arg4[%776, %c0_162, %c0_163] : memref<8x8x384xf32, #tpu.memory_space<vmem>>, vector<1x8x384xf32>
    %778 = vector.shape_cast %777 : vector<1x8x384xf32> to vector<8x384xf32>
    %cst_164 = arith.constant dense<0.000000e+00> : vector<8x384xf32>
    %779 = tpu.matmul %713, %7, %cst_164 {dimension_numbers = #tpu.dot_dimension_numbers<[1], [0], [0], [1], [0, 0, 1, 1], [], []>} : vector<8x128xf32>, vector<128x384xf32>, vector<8x384xf32> -> vector<8x384xf32>
    %780 = vector.broadcast %11 : vector<1x384xf32> to vector<8x384xf32>
    %781 = arith.addf %779, %780 : vector<8x384xf32>
    %782 = vector.extract_strided_slice %778 {offsets = [0, 0], sizes = [8, 128], strides = [1, 1]} : vector<8x384xf32> to vector<8x128xf32>
    %783 = vector.extract_strided_slice %781 {offsets = [0, 0], sizes = [8, 128], strides = [1, 1]} : vector<8x384xf32> to vector<8x128xf32>
    %784 = arith.addf %782, %783 : vector<8x128xf32>
    %785 = arith.negf %784 : vector<8x128xf32>
    %786 = math.exp %785 : vector<8x128xf32>
    %cst_165 = arith.constant 1.000000e+00 : f32
    %787 = vector.broadcast %cst_165 : f32 to vector<8x128xf32>
    %788 = arith.addf %787, %786 : vector<8x128xf32>
    %789 = arith.divf %787, %788 : vector<8x128xf32>
    %790 = vector.extract_strided_slice %778 {offsets = [0, 128], sizes = [8, 128], strides = [1, 1]} : vector<8x384xf32> to vector<8x128xf32>
    %791 = vector.extract_strided_slice %781 {offsets = [0, 128], sizes = [8, 128], strides = [1, 1]} : vector<8x384xf32> to vector<8x128xf32>
    %792 = arith.addf %790, %791 : vector<8x128xf32>
    %793 = arith.negf %792 : vector<8x128xf32>
    %794 = math.exp %793 : vector<8x128xf32>
    %cst_166 = arith.constant 1.000000e+00 : f32
    %795 = vector.broadcast %cst_166 : f32 to vector<8x128xf32>
    %796 = arith.addf %795, %794 : vector<8x128xf32>
    %797 = arith.divf %795, %796 : vector<8x128xf32>
    %798 = vector.extract_strided_slice %778 {offsets = [0, 256], sizes = [8, 128], strides = [1, 1]} : vector<8x384xf32> to vector<8x128xf32>
    %799 = vector.extract_strided_slice %781 {offsets = [0, 256], sizes = [8, 128], strides = [1, 1]} : vector<8x384xf32> to vector<8x128xf32>
    %800 = arith.mulf %789, %799 : vector<8x128xf32>
    %801 = arith.addf %798, %800 : vector<8x128xf32>
    %802 = math.tanh %801 : vector<8x128xf32>
    %cst_167 = arith.constant 1.000000e+00 : f32
    %803 = vector.broadcast %cst_167 : f32 to vector<8x128xf32>
    %804 = arith.subf %803, %797 : vector<8x128xf32>
    %805 = arith.mulf %804, %802 : vector<8x128xf32>
    %806 = arith.mulf %797, %713 : vector<8x128xf32>
    %807 = arith.addf %805, %806 : vector<8x128xf32>
    %808 = vector.broadcast %736 : vector<8x1xf32> to vector<8x128xf32>
    %809 = arith.mulf %808, %807 : vector<8x128xf32>
    %cst_168 = arith.constant 1.000000e+00 : f32
    %810 = vector.broadcast %cst_168 : f32 to vector<8x1xf32>
    %811 = arith.subf %810, %736 : vector<8x1xf32>
    %812 = vector.broadcast %811 : vector<8x1xf32> to vector<8x128xf32>
    %813 = arith.mulf %812, %713 : vector<8x128xf32>
    %814 = arith.addf %809, %813 : vector<8x128xf32>
    %815 = vector.broadcast %731 : vector<8x1xf32> to vector<8x128xf32>
    %816 = arith.mulf %815, %775 : vector<8x128xf32>
    %817 = arith.index_cast %c7_i32_153 : i32 to index
    %c0_169 = arith.constant 0 : index
    %c0_170 = arith.constant 0 : index
    %818 = vector.load %arg7[%817, %c0_169, %c0_170] : memref<8x8x128xf32, #tpu.memory_space<vmem>>, vector<1x8x128xf32>
    %819 = vector.shape_cast %818 : vector<1x8x128xf32> to vector<8x128xf32>
    %820 = vector.shape_cast %816 : vector<8x128xf32> to vector<1x8x128xf32>
    tpu.vector_store %arg7[%817, %c0_169, %c0_170], %820 {strides = array<i32>} : memref<8x8x128xf32, #tpu.memory_space<vmem>>, vector<1x8x128xf32>,
    %821 = vector.broadcast %736 : vector<8x1xf32> to vector<8x128xf32>
    %822 = arith.mulf %821, %814 : vector<8x128xf32>
    %823 = arith.index_cast %726 : i32 to index
    %c0_171 = arith.constant 0 : index
    %c0_172 = arith.constant 0 : index
    %824 = vector.load %arg8[%823, %c0_171, %c0_172] : memref<8x8x128xf32, #tpu.memory_space<vmem>>, vector<1x8x128xf32>
    %825 = vector.shape_cast %824 : vector<1x8x128xf32> to vector<8x128xf32>
    %826 = vector.shape_cast %822 : vector<8x128xf32> to vector<1x8x128xf32>
    tpu.vector_store %arg8[%823, %c0_171, %c0_172], %826 {strides = array<i32>} : memref<8x8x128xf32, #tpu.memory_space<vmem>>, vector<1x8x128xf32>,
    %c8_i32_173 = arith.constant 8 : i32
    %c0_174 = arith.constant 0 : index
    %c0_175 = arith.constant 0 : index
    %c0_176 = arith.constant 0 : index
    %827 = vector.load %arg9[%c0_174, %c0_175, %c0_176] : memref<2x8x128xf32, #tpu.memory_space<vmem>>, vector<1x8x128xf32>
    %828 = vector.shape_cast %827 : vector<1x8x128xf32> to vector<8x128xf32>
    %829 = vector.shape_cast %775 : vector<8x128xf32> to vector<1x8x128xf32>
    tpu.vector_store %arg9[%c0_174, %c0_175, %c0_176], %829 {strides = array<i32>} : memref<2x8x128xf32, #tpu.memory_space<vmem>>, vector<1x8x128xf32>,
    %c1_177 = arith.constant 1 : index
    %c0_178 = arith.constant 0 : index
    %c0_179 = arith.constant 0 : index
    %830 = vector.load %arg9[%c1_177, %c0_178, %c0_179] : memref<2x8x128xf32, #tpu.memory_space<vmem>>, vector<1x8x128xf32>
    %831 = vector.shape_cast %830 : vector<1x8x128xf32> to vector<8x128xf32>
    %832 = vector.shape_cast %814 : vector<8x128xf32> to vector<1x8x128xf32>
    tpu.vector_store %arg9[%c1_177, %c0_178, %c0_179], %832 {strides = array<i32>} : memref<2x8x128xf32, #tpu.memory_space<vmem>>, vector<1x8x128xf32>,
    return
  }
  func.func @transform_0(%arg0: i32, %arg1: i32) -> (i32, i32) {
    %c0_i32 = arith.constant 0 : i32
    %c0_i32_0 = arith.constant 0 : i32
    return %arg0, %c0_i32 : i32, i32
  }
  func.func @transform_1(%arg0: i32, %arg1: i32) -> (i32, i32, i32) {
    %c0_i32 = arith.constant 0 : i32
    %c0_i32_0 = arith.constant 0 : i32
    return %arg1, %arg0, %c0_i32 : i32, i32, i32
  }
  func.func @transform_2(%arg0: i32, %arg1: i32) -> (i32, i32, i32) {
    %c0_i32 = arith.constant 0 : i32
    %0 = arith.subi %c0_i32, %arg1 : i32
    %c0_i32_0 = arith.constant 0 : i32
    %c0_i32_1 = arith.constant 0 : i32
    return %0, %arg0, %c0_i32_0 : i32, i32, i32
  }
  func.func @transform_3(%arg0: i32, %arg1: i32) -> (i32, i32, i32) {
    %c0_i32 = arith.constant 0 : i32
    %c0_i32_0 = arith.constant 0 : i32
    %c0_i32_1 = arith.constant 0 : i32
    %c0_i32_2 = arith.constant 0 : i32
    return %c0_i32, %c0_i32_0, %c0_i32_1 : i32, i32, i32
  }
  func.func @transform_4(%arg0: i32, %arg1: i32) -> (i32, i32, i32) {
    %c0_i32 = arith.constant 0 : i32
    %c0_i32_0 = arith.constant 0 : i32
    %c0_i32_1 = arith.constant 0 : i32
    %c0_i32_2 = arith.constant 0 : i32
    return %c0_i32, %c0_i32_0, %c0_i32_1 : i32, i32, i32
  }
  func.func @transform_5(%arg0: i32, %arg1: i32) -> (i32, i32, i32) {
    %c0_i32 = arith.constant 0 : i32
    %c0_i32_0 = arith.constant 0 : i32
    return %arg1, %arg0, %c0_i32 : i32, i32, i32
  }
  func.func @transform_6(%arg0: i32, %arg1: i32) -> (i32, i32, i32) {
    %c0_i32 = arith.constant 0 : i32
    %0 = arith.subi %c0_i32, %arg1 : i32
    %c0_i32_0 = arith.constant 0 : i32
    %c0_i32_1 = arith.constant 0 : i32
    return %0, %arg0, %c0_i32_0 : i32, i32, i32
  }
}

</mosaic_0001>

<bundles_post_ra>
// kernel: masked_rnn_forward.1
= control target key start
LH: loop header
LB: loop body
LE: loop exit
PB: predicated region body
PF: predicated region fallthrough
CT: control target
= control target key end

     0   :  { %v6747_v3 = vmov 0.0|0.0   ;;  %v6745_v4 = vmov 0.0   ;;  %vm5316_vm0 = vmmov 0   ;;  %v5317_v9 = vmov 0   ;;  %s6733_s3 = inlined_call_operand.vmem [shape: f32[2,128,384], index: 3, kind: input, shape index: {}]   ;;  %s6734_s0 = inlined_call_operand.vmem [shape: s32[8,1], index: 0, kind: input, shape index: {}]   ;;  %s6735_s4 = inlined_call_operand.vmem [shape: f32[2,1,384], index: 4, kind: input, shape index: {}]   ;;  %s6736_s1 = inlined_call_operand.vmem [shape: f32[8,8,384], index: 1, kind: input, shape index: {}]   ;;  %s6737_s2 = inlined_call_operand.vmem [shape: f32[8,8,384], index: 2, kind: input, shape index: {}]   ;;  %s6738_s5 = inlined_call_operand.vmem [shape: f32[8,8,128], index: 5, kind: output, shape index: {0}]   ;;  %s6739_s6 = inlined_call_operand.vmem [shape: f32[8,8,128], index: 6, kind: output, shape index: {1}]  }
   0x1   :  { %v69_v0 = vld [vmem:[%s6733_s3 + $0x8] sm:$0xff]  ;;  %v72_v1 = vld [vmem:[%s6733_s3 + $0x20] sm:$0xff]  ;;  %4279 = vmatprep.subr.bf16.mxu1 %v6747_v3  ;;  %266 = vmatprep.mubr.f32.mxu0 %v6745_v4  ;;  %v71_v6 = vld [vmem:[%s6733_s3 + $0x18] sm:$0xff] }
   0x2   :  { %v68_v2 = vld [vmem:[%s6733_s3] sm:$0xff]  ;;  %v5364_v5 = vpack.c.bf16 %v72_v1, %v69_v0  ;;  %v75_v7 = vld [vmem:[%s6733_s3 + $0x38] sm:$0xff]  ;;  %v78_v8 = vld [vmem:[%s6733_s3 + $0x50] sm:$0xff]  ;;  %3719 = vmatprep.mubr.msk.f32.mxu1 %vm5316_vm0, %v6745_v4  ;;  %5147 = vset.pattern.permute.xlu0 %v5317_v9 }
   0x3   :  { %v5377_v10 = vpack.c.bf16 %v71_v6, %v68_v2  ;;  %v5379_v11 = vpack.c.bf16 %v78_v8, %v75_v7  ;;  %v74_v12 = vld [vmem:[%s6733_s3 + $0x30] sm:$0xff]  ;;  %v77_v13 = vld [vmem:[%s6733_s3 + $0x48] sm:$0xff]  ;;  %5148 = vset.pattern.permute.xlu1 %v5317_v9  ;;  %v84_v15 = vld [vmem:[%s6733_s3 + $0x80] sm:$0xff] }
   0x4   :  { %v81_v14 = vld [vmem:[%s6733_s3 + $0x68] sm:$0xff]  ;;  %4248 = vmatprep.subr.bf16.mxu0 %v5364_v5  ;;  %v5395_v16 = vpack.c.bf16 %v77_v13, %v74_v12  ;;  %v80_v18 = vld [vmem:[%s6733_s3 + $0x60] sm:$0xff]  ;;  %v83_v19 = vld [vmem:[%s6733_s3 + $0x78] sm:$0xff] }
   0x5   :  { %4250 = vmatpush1.bf16.msra.mxu0 %v5377_v10  ;;  %v5398_v17 = vpack.c.bf16 %v84_v15, %v81_v14  ;;  %v87_v20 = vld [vmem:[%s6733_s3 + $0x98] sm:$0xff]  ;;  %v90_v21 = vld [vmem:[%s6733_s3 + $0xb0] sm:$0xff]  ;;  %v5413_v22 = vpack.c.bf16 %v83_v19, %v80_v18  ;;  %v89_v25 = vld [vmem:[%s6733_s3 + $0xa8] sm:$0xff] }
   0x6   :  { %4252 = vmatprep.subr.bf16.mxu0 %v5379_v11  ;;  %v5416_v23 = vpack.c.bf16 %v90_v21, %v87_v20  ;;  %v86_v24 = vld [vmem:[%s6733_s3 + $0x90] sm:$0xff]  ;;  %v93_v26 = vld [vmem:[%s6733_s3 + $0xc8] sm:$0xff]  ;;  %v96_v27 = vld [vmem:[%s6733_s3 + $0xe0] sm:$0xff] }
   0x7   :  { %v70_v28 = vld [vmem:[%s6733_s3 + $0x10] sm:$0xff]  ;;  %v73_v29 = vld [vmem:[%s6733_s3 + $0x28] sm:$0xff]  ;;  %v76_v31 = vld [vmem:[%s6733_s3 + $0x40] sm:$0xff]  ;;  %v5445_v33 = vpack.c.bf16 %v89_v25, %v86_v24  ;;  %v5448_v34 = vpack.c.bf16 %v96_v27, %v93_v26 }
   0x8   :  { %v5436_v30 = vpack.c.bf16 %v73_v29, %v70_v28  ;;  %v79_v32 = vld [vmem:[%s6733_s3 + $0x58] sm:$0xff]  ;;  %v92_v35 = vld [vmem:[%s6733_s3 + $0xc0] sm:$0xff]  ;;  %v102_v39 = vld [vmem:[%s6733_s3 + $0x110] sm:$0xff] }
   0x9   :  { %4254 = vmatpush1.bf16.msra.mxu0 %v5395_v16  ;;  %v95_v36 = vld [vmem:[%s6733_s3 + $0xd8] sm:$0xff]  ;;  %v5460_v38 = vpack.c.bf16 %v79_v32, %v76_v31  ;;  %v82_v40 = vld [vmem:[%s6733_s3 + $0x70] sm:$0xff]  ;;  %v85_v41 = vld [vmem:[%s6733_s3 + $0x88] sm:$0xff] }
   0xa   :  { %4256 = vmatprep.subr.bf16.mxu0 %v5398_v17  ;;  %v99_v37 = vld [vmem:[%s6733_s3 + $0xf8] sm:$0xff]  ;;  %4281 = vmatpush3.bf16.msra.mxu1 %v5436_v30  ;;  %v5473_v42 = vpack.c.bf16 %v95_v36, %v92_v35  ;;  %v98_v44 = vld [vmem:[%s6733_s3 + $0xf0] sm:$0xff]  ;;  %v101_v45 = vld [vmem:[%s6733_s3 + $0x108] sm:$0xff]  ;;  %v5488_v47 = vpack.c.bf16 %v85_v41, %v82_v40 }
   0xb   :  { %4282 = vmatprep.subr.bf16.mxu1 %v6747_v3  ;;  %v5476_v43 = vpack.c.bf16 %v102_v39, %v99_v37  ;;  %v105_v46 = vld [vmem:[%s6733_s3 + $0x128] sm:$0xff]  ;;  %v108_v48 = vld [vmem:[%s6733_s3 + $0x140] sm:$0xff]  ;;  %v91_v50 = vld [vmem:[%s6733_s3 + $0xb8] sm:$0xff]  ;;  %v5501_v51 = vpack.c.bf16 %v101_v45, %v98_v44 }
   0xc   :  { %v88_v49 = vld [vmem:[%s6733_s3 + $0xa0] sm:$0xff]  ;;  %v5504_v52 = vpack.c.bf16 %v108_v48, %v105_v46  ;;  %v107_v54 = vld [vmem:[%s6733_s3 + $0x138] sm:$0xff]  ;;  %v114_v57 = vld [vmem:[%s6733_s3 + $0x170] sm:$0xff] }
   0xd   :  { %4258 = vmatpush1.bf16.msra.mxu0 %v5413_v22  ;;  %6777 = vst [vmem:[#allocation3_spill] sm:$0xff] %v5501_v51  ;;  %v104_v53 = vld [vmem:[%s6733_s3 + $0x120] sm:$0xff]  ;;  %v111_v55 = vld [vmem:[%s6733_s3 + $0x158] sm:$0xff]  ;;  %v5516_v56 = vpack.c.bf16 %v91_v50, %v88_v49  ;;  %v94_v58 = vld [vmem:[%s6733_s3 + $0xd0] sm:$0xff] }
   0xe   :  { %4260 = vmatprep.subr.bf16.mxu0 %v5416_v23  ;;  %4284 = vmatpush3.bf16.msra.mxu1 %v5460_v38  ;;  %6778 = vst [vmem:[#allocation4_spill] sm:$0xff] %v5504_v52  ;;  %v97_v59 = vld [vmem:[%s6733_s3 + $0xe8] sm:$0xff]  ;;  %v5529_v60 = vpack.c.bf16 %v107_v54, %v104_v53  ;;  %v5532_v61 = vpack.c.bf16 %v114_v57, %v111_v55  ;;  %v110_v62 = vld [vmem:[%s6733_s3 + $0x150] sm:$0xff]  ;;  %v3250_v2 = vld [vmem:[%s6733_s3 + $0x1a0] sm:$0xff] }
   0xf   :  { %4285 = vmatprep.subr.bf16.mxu1 %v6747_v3  ;;  %v113_v63 = vld [vmem:[%s6733_s3 + $0x168] sm:$0xff]  ;;  %v5544_v1 = vpack.c.bf16 %v97_v59, %v94_v58  ;;  %v100_v6 = vld [vmem:[%s6733_s3 + $0x100] sm:$0xff]  ;;  %v103_v7 = vld [vmem:[%s6733_s3 + $0x118] sm:$0xff] }
  0x10   :  { %6779 = vst [vmem:[#allocation5_spill] sm:$0xff] %v5529_v60  ;;  %6780 = vst [vmem:[#allocation6_spill] sm:$0xff] %v5532_v61  ;;  %v3247_v0 = vld [vmem:[%s6733_s3 + $0x188] sm:$0xff]  ;;  %v5557_v8 = vpack.c.bf16 %v113_v63, %v110_v62  ;;  %v3246_v12 = vld [vmem:[%s6733_s3 + $0x180] sm:$0xff]  ;;  %v5572_v15 = vpack.c.bf16 %v103_v7, %v100_v6 }
  0x11   :  { %4262 = vmatpush1.bf16.msra.mxu0 %v5445_v33  ;;  %v5560_v9 = vpack.c.bf16 %v3250_v2, %v3247_v0  ;;  %v3249_v13 = vld [vmem:[%s6733_s3 + $0x198] sm:$0xff]  ;;  %v3256_v18 = vld [vmem:[%s6733_s3 + $0x1d0] sm:$0xff]  ;;  %v109_v20 = vld [vmem:[%s6733_s3 + $0x148] sm:$0xff] }
  0x12   :  { %4264 = vmatprep.subr.bf16.mxu0 %v5448_v34  ;;  %4287 = vmatpush3.bf16.msra.mxu1 %v5488_v47  ;;  %6781 = vst [vmem:[#allocation7_spill] sm:$0xff] %v5557_v8  ;;  %v3253_v14 = vld [vmem:[%s6733_s3 + $0x1b8] sm:$0xff]  ;;  %6783 = vst [vmem:[#allocation9_spill] sm:$0xff] %v5572_v15  ;;  %v106_v19 = vld [vmem:[%s6733_s3 + $0x130] sm:$0xff]  ;;  %v5585_v21 = vpack.c.bf16 %v3249_v13, %v3246_v12 }
  0x13   :  { %4288 = vmatprep.subr.bf16.mxu1 %v6747_v3  ;;  %6782 = vst [vmem:[#allocation8_spill] sm:$0xff] %v5560_v9  ;;  %v5590_v24 = vld [vmem:[%s6734_s0] sm:$0xff]  ;;  %v5593_v25 = vpack.c.bf16 %v3256_v18, %v3253_v14  ;;  %v3252_v26 = vld [vmem:[%s6733_s3 + $0x1b0] sm:$0xff]  ;;  %v3255_v27 = vld [vmem:[%s6733_s3 + $0x1c8] sm:$0xff]  ;;  %v5605_v29 = vpack.c.bf16 %v109_v20, %v106_v19 }
  0x14   :  { %v3259_v28 = vld [vmem:[%s6733_s3 + $0x1e8] sm:$0xff]  ;;  %vm3295_vm1 = vcmp.gt.s32.totalorder %v5590_v24, 0  ;;  %v3262_v31 = vld [vmem:[%s6733_s3 + $0x200] sm:$0xff]  ;;  %v115_v35 = vld [vmem:[%s6733_s3 + $0x178] sm:$0xff]  ;;  %v5625_v39 = vpack.c.bf16 %v3255_v27, %v3252_v26  ;;  %vm3297_vm2 = vcmp.gt.s32.totalorder %v5590_v24, 7  ;;  %vm3307_vm3 = vcmp.gt.s32.totalorder %v5590_v24, 1 }
  0x15   :  { %4266 = vmatpush1.bf16.msra.mxu0 %v5473_v42  ;;  %6784 = vst [vmem:[#allocation10_spill] sm:$0xff] %v5605_v29  ;;  %v112_v32 = vld [vmem:[%s6733_s3 + $0x160] sm:$0xff]  ;;  %v5619_v36 = vsel %vm3295_vm1, 1.0, %v6745_v4  ;;  %v5630_v40 = vpack.c.bf16 %v3262_v31, %v3259_v28  ;;  %v3261_v44 = vld [vmem:[%s6733_s3 + $0x1f8] sm:$0xff]  ;;  %v5646_v48 = vsel %vm3297_vm2, 1.0, %v6745_v4  ;;  %v3268_v49 = vld [vmem:[%s6733_s3 + $0x230] sm:$0xff] }
  0x16   :  { %4268 = vmatprep.subr.bf16.mxu0 %v5476_v43  ;;  %4290 = vmatpush3.bf16.msra.mxu1 %v5516_v56  ;;  %v6741_v37 = vsub.f32 1.0, %v5619_v36  ;;  %v3258_v41 = vld [vmem:[%s6733_s3 + $0x1e0] sm:$0xff]  ;;  %v3265_v45 = vld [vmem:[%s6733_s3 + $0x218] sm:$0xff]  ;;  %v5642_v46 = vpack.c.bf16 %v115_v35, %v112_v32  ;;  %v3248_v50 = vld [vmem:[%s6733_s3 + $0x190] sm:$0xff]  ;;  %v6740_v54 = vsub.f32 1.0, %v5646_v48  ;;  %v5666_v57 = vsel %vm3307_vm3, 1.0, %v6745_v4 }
  0x17   :  { %4291 = vmatprep.subr.bf16.mxu1 %v6747_v3  ;;  %366 = vperm.xlu0 %5147, %v5619_v36   ;;  %v3251_v53 = vld [vmem:[%s6733_s3 + $0x1a8] sm:$0xff]  ;;  %v5663_v55 = vpack.c.bf16 %v3261_v44, %v3258_v41  ;;  %v5669_v58 = vpack.c.bf16 %v3268_v49, %v3265_v45  ;;  %v3264_v59 = vld [vmem:[%s6733_s3 + $0x210] sm:$0xff]  ;;  %vm3309_vm4 = vcmp.gt.s32.totalorder %v5590_v24, 6  ;;  %v3274_v2 = vld [vmem:[%s6733_s3 + $0x260] sm:$0xff]  ;;  %v6742_v12 = vsub.f32 1.0, %v5666_v57 }
  0x18   :  { %6785 = vst [vmem:[#allocation11_spill] sm:$0xff] %v5642_v46  ;;  %562 = vperm.xlu1 %5148, %v5646_v48   ;;  %v3267_v62 = vld [vmem:[%s6733_s3 + $0x228] sm:$0xff]  ;;  %v5681_v0 = vpack.c.bf16 %v3251_v53, %v3248_v50  ;;  %v3254_v6 = vld [vmem:[%s6733_s3 + $0x1c0] sm:$0xff]  ;;  %v3257_v7 = vld [vmem:[%s6733_s3 + $0x1d8] sm:$0xff]  ;;  %v5703_v14 = vsel %vm3309_vm4, 1.0, %v6745_v4  ;;  %vm3323_vm5 = vcmp.gt.s32.totalorder %v5590_v24, 2 }
  0x19   :  { %4270 = vmatpush1.bf16.msra.mxu0 %v5501_v51  ;;  %v3271_v63 = vld [vmem:[%s6733_s3 + $0x248] sm:$0xff]  ;;  %v5699_v13 = vpack.c.bf16 %v3267_v62, %v3264_v59  ;;  %v3270_v19 = vld [vmem:[%s6733_s3 + $0x240] sm:$0xff]  ;;  %v3273_v20 = vld [vmem:[%s6733_s3 + $0x258] sm:$0xff]  ;;  %v5718_v27 = vpack.c.bf16 %v3257_v7, %v3254_v6  ;;  %v6743_v35 = vsub.f32 1.0, %v5703_v14  ;;  %v5741_v44 = vsel %vm3323_vm5, 1.0, %v6745_v4 }
  0x1a   :  { %4272 = vmatprep.subr.bf16.mxu0 %v5504_v52  ;;  %4293 = vmatpush3.bf16.msra.mxu1 %v5544_v1  ;;  %v5706_v18 = vpack.c.bf16 %v3274_v2, %v3271_v63  ;;  %v3277_v26 = vld [vmem:[%s6733_s3 + $0x278] sm:$0xff]  ;;  %v3280_v28 = vld [vmem:[%s6733_s3 + $0x290] sm:$0xff]  ;;  %v3263_v32 = vld [vmem:[%s6733_s3 + $0x208] sm:$0xff]  ;;  %v5738_v41 = vpack.c.bf16 %v3273_v20, %v3270_v19  ;;  %vm3325_vm6 = vcmp.gt.s32.totalorder %v5590_v24, 5  ;;  %v6744_v6 = vsub.f32 1.0, %v5741_v44 }
  0x1b   :  { %4294 = vmatprep.subr.bf16.mxu1 %v6747_v3  ;;  %373 = vperm.xlu0 %5147, %v6741_v37   ;;  %v3260_v31 = vld [vmem:[%s6733_s3 + $0x1f0] sm:$0xff]  ;;  %v5744_v45 = vpack.c.bf16 %v3280_v28, %v3277_v26  ;;  %v3279_v50 = vld [vmem:[%s6733_s3 + $0x288] sm:$0xff]  ;;  %v3286_v62 = vld [vmem:[%s6733_s3 + $0x2c0] sm:$0xff]  ;;  %v5777_v19 = vsel %vm3325_vm6, 1.0, %v6745_v4  ;;  %vm3339_vm7 = vcmp.gt.s32.totalorder %v5590_v24, 3  ;;  %vm3341_vm8 = vcmp.gt.s32.totalorder %v5590_v24, 4 }
  0x1c   :  { %569 = vperm.xlu1 %5148, %v6740_v54   ;;  %v3276_v49 = vld [vmem:[%s6733_s3 + $0x270] sm:$0xff]  ;;  %v3283_v53 = vld [vmem:[%s6733_s3 + $0x2a8] sm:$0xff]  ;;  %v5756_v59 = vpack.c.bf16 %v3263_v32, %v3260_v31  ;;  %v3266_v63 = vld [vmem:[%s6733_s3 + $0x220] sm:$0xff] }
  0x1d   :  { %4274 = vmatpush1.bf16.msra.mxu0 %v5529_v60  ;;  %v3269_v2 = vld [vmem:[%s6733_s3 + $0x238] sm:$0xff]  ;;  %v5774_v7 = vpack.c.bf16 %v3279_v50, %v3276_v49  ;;  %v5780_v20 = vpack.c.bf16 %v3286_v62, %v3283_v53  ;;  %v3282_v26 = vld [vmem:[%s6733_s3 + $0x2a0] sm:$0xff]  ;;  %v3292_v49 = vld [vmem:[%s6733_s3 + $0x2f0] sm:$0xff]  ;;  %v1317_v62 = vsub.f32 1.0, %v5777_v19 }
  0x1e   :  { %4276 = vmatprep.subr.bf16.mxu0 %v5532_v61  ;;  %4296 = vmatpush3.bf16.msra.mxu1 %v5572_v15  ;;  %v3285_v28 = vld [vmem:[%s6733_s3 + $0x2b8] sm:$0xff]  ;;  %v5792_v32 = vpack.c.bf16 %v3269_v2, %v3266_v63  ;;  %v3272_v50 = vld [vmem:[%s6733_s3 + $0x250] sm:$0xff]  ;;  %v3275_v53 = vld [vmem:[%s6733_s3 + $0x268] sm:$0xff]  ;;  %v3340_v2 = vsel %vm3339_vm7, 1.0, %v6745_v4 }
  0x1f   :  { %4297 = vmatprep.subr.bf16.mxu1 %v6747_v3  ;;  %757 = vperm.xlu0 %5147, %v5666_v57   ;;  %v3289_v31 = vld [vmem:[%s6733_s3 + $0x2d8] sm:$0xff]  ;;  %v5810_v63 = vpack.c.bf16 %v3285_v28, %v3282_v26  ;;  %v3288_v37 = vld [vmem:[%s6733_s3 + $0x2d0] sm:$0xff]  ;;  %v3278_v26 = vld [vmem:[%s6733_s3 + $0x280] sm:$0xff] }
  0x20   :  { %764 = vperm.xlu1 %5148, %v6742_v12   ;;  %v5814_v54 = vpack.c.bf16 %v3292_v49, %v3289_v31  ;;  %v3291_v12 = vld [vmem:[%s6733_s3 + $0x2e8] sm:$0xff]  ;;  %v3281_v28 = vld [vmem:[%s6733_s3 + $0x298] sm:$0xff]  ;;  %v1513_v31 = vsub.f32 1.0, %v3340_v2 }
  0x21   :  { %4278 = vmatpush1.bf16.msra.mxu0 %v5557_v8  ;;  %v5834_v49 = vpack.c.bf16 %v3291_v12, %v3288_v37  ;;  %v5839_v24 = vpack.c.bf16 %v3281_v28, %v3278_v26  ;;  %v3290_v26 = vld [vmem:[%s6733_s3 + $0x2e0] sm:$0xff]  ;;  %v3293_v28 = vld [vmem:[%s6733_s3 + $0x2f8] sm:$0xff] }
  0x22   :  { %4304 = vmatprep.subr.bf16.mxu0 %v5560_v9  ;;  %4299 = vmatpush3.bf16.msra.mxu1 %v5605_v29 }
  0x23   :  { %4300 = vmatprep.subr.bf16.mxu1 %v6747_v3  ;;  %937 = vperm.xlu0 %5147, %v5703_v14  }
  0x24   :  { %267 = vmatmul.mubr.f32.vlgmr.msra.gmra.mrb[0].mxu0 %v6745_v4  ;;  %944 = vperm.xlu1 %5148, %v6743_v35   ;;  %v5823_v35 = vpack.c.bf16 %v3275_v53, %v3272_v50  ;;  %v3342_v50 = vsel %vm3341_vm8, 1.0, %v6745_v4  ;;  %v3284_v53 = vld [vmem:[%s6733_s3 + $0x2b0] sm:$0xff] }
  0x25   :  { %4306 = vmatpush1.bf16.msra.mxu0 %v5585_v21  ;;  %462 = vmatprep.mubr.f32.mxu0 %v6745_v4  ;;  %v1693_v37 = vsub.f32 1.0, %v3342_v50 }
  0x26   :  { %4308 = vmatprep.subr.bf16.mxu0 %v5593_v25  ;;  %4302 = vmatpush3.bf16.msra.mxu1 %v5642_v46 }
  0x27   :  { %4335 = vmatprep.subr.bf16.mxu1 %v6747_v3  ;;  %1133 = vperm.xlu0 %5147, %v5741_v44  }
  0x28   :  { %1140 = vperm.xlu1 %5148, %v6744_v6   ;;  %v3287_v6 = vld [vmem:[%s6733_s3 + $0x2c8] sm:$0xff] }
  0x29   :  { %4310 = vmatpush1.bf16.msra.mxu0 %v5625_v39  ;;  %3720 = vmatmul.mubr.f32.vlgmr.msra.gmra.mrb[0].mxu1 %v6745_v4  ;;  %v5850_v12 = vpack.c.bf16 %v3287_v6, %v3284_v53  ;;  %v5863_v6 = vpack.c.bf16 %v3293_v28, %v3290_v26  ;;  %v183_v28 = vld [vmem:[%s6736_s1] sm:$0xff] }
  0x2a   :  { %4312 = vmatprep.subr.bf16.mxu0 %v5630_v40  ;;  %4337 = vmatpush3.bf16.msra.mxu1 %v5681_v0 }
  0x2b   :  { %4338 = vmatprep.subr.bf16.mxu1 %v6747_v3  ;;  %3754 = vmatprep.mubr.msk.f32.mxu1 %vm5316_vm0, %v6745_v4 }
  0x2c   :  { %1313 = vperm.xlu0 %5147, %v5777_v19   ;;  %1320 = vperm.xlu1 %5148, %v1317_v62  }
  0x2d   :  { %4314 = vmatpush1.bf16.msra.mxu0 %v5663_v55 }
  0x2e   :  { %4316 = vmatprep.subr.bf16.mxu0 %v5669_v58  ;;  %4340 = vmatpush3.bf16.msra.mxu1 %v5718_v27 }
  0x2f   :  { %4341 = vmatprep.subr.bf16.mxu1 %v6747_v3 }
  0x30   :  { %1509 = vperm.xlu0 %5147, %v3340_v2   ;;  %1516 = vperm.xlu1 %5148, %v1513_v31  }
  0x31   :  { %4318 = vmatpush1.bf16.msra.mxu0 %v5699_v13 }
  0x32   :  { %4320 = vmatprep.subr.bf16.mxu0 %v5706_v18  ;;  %4343 = vmatpush3.bf16.msra.mxu1 %v5756_v59 }
  0x33   :  { %4344 = vmatprep.subr.bf16.mxu1 %v6747_v3 }
  0x34   :  { %1689 = vperm.xlu0 %5147, %v3342_v50   ;;  %1696 = vperm.xlu1 %5148, %v1693_v37  }
  0x35   :  { %4322 = vmatpush1.bf16.msra.mxu0 %v5738_v41 }
  0x36   :  { %4324 = vmatprep.subr.bf16.mxu0 %v5744_v45  ;;  %4346 = vmatpush3.bf16.msra.mxu1 %v5792_v32 }
  0x37   :  { %4347 = vmatprep.subr.bf16.mxu1 %v6747_v3 }
  0x38   :  { %1885 = vperm.xlu0 %5147, %v3342_v50   ;;  %1892 = vperm.xlu1 %5148, %v1693_v37   ;;  %v165_v50 = vld [vmem:[%s6735_s4] sm:$0x7] }
  0x39   :  { %4326 = vmatpush1.bf16.msra.mxu0 %v5774_v7 }
  0x3a   :  { %4328 = vmatprep.subr.bf16.mxu0 %v5780_v20  ;;  %4349 = vmatpush3.bf16.msra.mxu1 %v5823_v35 }
  0x3b   :  { %4350 = vmatprep.subr.bf16.mxu1 %v6747_v3 }
  0x3c   :  { %2065 = vperm.xlu0 %5147, %v3340_v2   ;;  %2072 = vperm.xlu1 %5148, %v1513_v31   ;;  %v6787_v2 = vsub.f32 1.0, %v5703_v14  ;;  %v6790_v31 = vsub.f32 1.0, %v5646_v48 }
  0x3d   :  { %4330 = vmatpush1.bf16.msra.mxu0 %v5810_v63 }
  0x3e   :  { %4332 = vmatprep.subr.bf16.mxu0 %v5814_v54  ;;  %4352 = vmatpush3.bf16.msra.mxu1 %v5839_v24 }
  0x3f   :  { %4353 = vmatprep.subr.bf16.mxu1 %v6747_v3 }
  0x40   :  { %2261 = vperm.xlu0 %5147, %v5777_v19   ;;  %2268 = vperm.xlu1 %5148, %v1317_v62   ;;  %v6786_v19 = vsub.f32 1.0, %v5741_v44  ;;  %v5149_v62 = vpack.i.bf16 %v5619_v36, %v5646_v48 }
  0x41   :  { %4334 = vmatpush1.bf16.msra.mxu0 %v5834_v49 }
  0x42   :  { %4360 = vmatprep.subr.bf16.mxu0 %v5364_v5  ;;  %4355 = vmatpush3.bf16.msra.mxu1 %v5850_v12 }
  0x43   :  { %4356 = vmatprep.subr.bf16.mxu1 %v6747_v3 }
  0x44   :  { %463 = vmatmul.mubr.f32.vlgmr.msra.gmra.mrb[2].mxu0 %v6745_v4  ;;  %2441 = vperm.xlu0 %5147, %v5741_v44   ;;  %v6788_v44 = vsub.f32 1.0, %v5666_v57 }
  0x45   :  { %4362 = vmatpush1.bf16.msra.mxu0 %v5377_v10  ;;  %657 = vmatprep.mubr.f32.mxu0 %v6745_v4 }
  0x46   :  { %4364 = vmatprep.subr.bf16.mxu0 %v5379_v11  ;;  %4358 = vmatpush3.bf16.msra.mxu1 %v5863_v6 }
  0x47   :  { %4391 = vmatprep.subr.bf16.mxu1 %v6747_v3  ;;  %2448 = vperm.xlu1 %5148, %v6786_v19  }
  0x48   :  { %2637 = vperm.xlu0 %5147, %v5703_v14   ;;  %v6789_v14 = vsub.f32 1.0, %v5619_v36  ;;  %v187_v36 = vlaneseq }
  0x49   :  { %4366 = vmatpush1.bf16.msra.mxu0 %v5395_v16  ;;  %3755 = vmatmul.mubr.f32.vlgmr.msra.gmra.mrb[2].mxu1 %v6745_v4 }
  0x4a   :  { %4368 = vmatprep.subr.bf16.mxu0 %v5398_v17  ;;  %4393 = vmatpush3.bf16.msra.mxu1 %v5436_v30 }
  0x4b   :  { %4394 = vmatprep.subr.bf16.mxu1 %v6747_v3  ;;  %3789 = vmatprep.mubr.msk.f32.mxu1 %vm5316_vm0, %v6745_v4 }
  0x4c   :  { %2817 = vperm.xlu0 %5147, %v5666_v57   ;;  %2644 = vperm.xlu1 %5148, %v6787_v2   ;;  %v5919_v57 = vshrl.u32 %v187_v36, 7 }
  0x4d   :  { %4370 = vmatpush1.bf16.msra.mxu0 %v5413_v22 }
  0x4e   :  { %4372 = vmatprep.subr.bf16.mxu0 %v5416_v23  ;;  %4396 = vmatpush3.bf16.msra.mxu1 %v5460_v38  ;;  %v189_v48 = vsub.s32 0, %v5919_v57  ;;  %v193_v53 = vsub.s32 1, %v5919_v57 }
  0x4f   :  { %4397 = vmatprep.subr.bf16.mxu1 %v6747_v3 }
  0x50   :  { %5150 = vperm.xlu0 %5147, %v5149_v62   ;;  %2824 = vperm.xlu1 %5148, %v6788_v44   ;;  %v5926_v37 = vrot.slane %v165_v50, %v189_v48  ;;  %v5928_v26 = vrot.slane %v165_v50, %v193_v53 }
  0x51   :  { %4374 = vmatpush1.bf16.msra.mxu0 %v5445_v33 }
  0x52   :  { %4376 = vmatprep.subr.bf16.mxu0 %v5448_v34  ;;  %4399 = vmatpush3.bf16.msra.mxu1 %v5488_v47  ;;  %6791 = vst [vmem:[#allocation12_spill] sm:$0xff] %v5926_v37  ;;  %6792 = vst [vmem:[#allocation13_spill] sm:$0xff] %v5928_v26 }
  0x53   :  { %4400 = vmatprep.subr.bf16.mxu1 %v6747_v3 }
  0x54   :  { %3198 = vperm.xlu0 %5147, %v6789_v14   ;;  %3019 = vperm.xlu1 %5148, %v6790_v31   ;;  %v184_v31 = vld [vmem:[%s6736_s1 + $0x8] sm:$0xff] }
  0x55   :  { %4378 = vmatpush1.bf16.msra.mxu0 %v5473_v42 }
  0x56   :  { %4380 = vmatprep.subr.bf16.mxu0 %v5476_v43  ;;  %4402 = vmatpush3.bf16.msra.mxu1 %v5516_v56 }
  0x57   :  { %4403 = vmatprep.subr.bf16.mxu1 %v6747_v3 }
  0x59   :  { %4382 = vmatpush1.bf16.msra.mxu0 %v5501_v51 }
  0x5a   :  { %4384 = vmatprep.subr.bf16.mxu0 %v5504_v52  ;;  %4405 = vmatpush3.bf16.msra.mxu1 %v5544_v1 }
  0x5b   :  { %4406 = vmatprep.subr.bf16.mxu1 %v6747_v3 }
  0x5d   :  { %4386 = vmatpush1.bf16.msra.mxu0 %v5529_v60 }
  0x5e   :  { %4388 = vmatprep.subr.bf16.mxu0 %v5532_v61  ;;  %4408 = vmatpush3.bf16.msra.mxu1 %v5572_v15 }
  0x5f   :  { %4409 = vmatprep.subr.bf16.mxu1 %v6747_v3 }
  0x61   :  { %4390 = vmatpush1.bf16.msra.mxu0 %v5557_v8 }
  0x62   :  { %4416 = vmatprep.subr.bf16.mxu0 %v5560_v9  ;;  %4411 = vmatpush3.bf16.msra.mxu1 %v5605_v29  ;;  %v197_v29 = vsub.s32 2, %v5919_v57 }
  0x63   :  { %4412 = vmatprep.subr.bf16.mxu1 %v6747_v3 }
  0x66   :  { %4414 = vmatpush3.bf16.msra.mxu1 %v5642_v46 }
  0x67   :  { %4447 = vmatprep.subr.bf16.mxu1 %v6747_v3 }
  0xf7   :  { %v268_v19 = vpop.f32.mrb[0].mxu0 }
  0xf8   :  { %v269_v62 = vadd.f32 %v268_v19, %v5926_v37  ;;  %v270_v2 = vpop.f32.mrb[1].mxu0  ;;  %v5939_v19 = vrot.slane %v165_v50, %v197_v29  ;;  %v367_v37 = vpop.permute.xlu0 %366 }
  0xf9   :  { %v271_v44 = vadd.f32 %v270_v2, %v5928_v26 }
  0xfa   :  { %v343_v14 = vadd.f32 %v269_v62, %v183_v28  ;;  %6793 = vst [vmem:[#allocation14_spill] sm:$0xff] %v5939_v19  ;;  %v3294_v28 = vld [vmem:[%s6735_s4 + $0x3] sm:$0x7] }
  0xfb   :  { %v350_v4 = vadd.f32 %v271_v44, %v184_v31 }
  0xfc   :  { %v3299_v36 = vmul.f32 -1.442695, %v343_v14  ;;  %v339_v3 = vpop.f32.mrb[0].mxu1  ;;  %v5945_v14 = vrot.slane %v3294_v28, %v189_v48 }
  0xfd   :  { %v3300_v9 = vmul.f32 -1.442695, %v350_v4  ;;  %v3721_v46 = vpop.f32.mrb[1].mxu1  ;;  %v340_v44 = vadd.f32 %v339_v3, %v5939_v19 }
  0xfe   :  { %5154 = vpow2.f32 %v3299_v36  ;;  %6794 = vst [vmem:[#allocation15_spill] sm:$0xff] %v5945_v14  ;;  %v3301_v46 = vld [vmem:[%s6737_s2 + $0xa8] sm:$0xff] }
  0xff   :  { %5156 = vpow2.f32 %v3300_v9  ;;  %v5950_v9 = vrot.slane %v3294_v28, %v193_v53  ;;  %v3302_v53 = vld [vmem:[%s6737_s2 + $0xb0] sm:$0xff] }
 0x101   :  { %6795 = vst [vmem:[#allocation16_spill] sm:$0xff] %v5950_v9 }
 0x108   :  { %v5155_v8 = vpop.eup %5154 }
 0x109   :  { %v347_v61 = vadd.f32 1.0, %v5155_v8  ;;  %v5157_v2 = vpop.eup %5156  ;;  %v185_v8 = vld [vmem:[%s6736_s1 + $0x10] sm:$0xff] }
 0x10a   :  { %v354_v62 = vadd.f32 1.0, %v5157_v2 }
 0x10b   :  { %5158 = vrcp.f32 %v347_v61 }
 0x10c   :  { %5160 = vrcp.f32 %v354_v62 }
 0x115   :  { %v5159_v4 = vpop.eup %5158 }
 0x116   :  { %v357_v61 = vmul.f32 %v5159_v4, %v340_v44  ;;  %v5161_v44 = vpop.eup %5160 }
 0x117   :  { %v464_v57 = vpop.f32.mrb[2].mxu0 }
 0x118   :  { %v358_v50 = vadd.f32 %v357_v61, %v185_v8  ;;  %v465_v31 = vadd.f32 %v464_v57, %v5945_v14  ;;  %v466_v3 = vpop.f32.mrb[3].mxu0  ;;  %v360_v8 = vsub.f32 1.0, %v5161_v44  ;;  %v362_v57 = vmul.f32 0.0, %v5161_v44 }
 0x119   :  { %v467_v48 = vadd.f32 %v466_v3, %v5950_v9 }
 0x11a   :  { %5162 = vtanh.f32 %v358_v50  ;;  %v539_v36 = vadd.f32 %v3301_v46, %v465_v31  ;;  %v374_v46 = vpop.permute.xlu0 %373 }
 0x11b   :  { %v546_v62 = vadd.f32 %v3302_v53, %v467_v48  ;;  %v376_v31 = vmul.f32 0.0, %v374_v46 }
 0x11c   :  { %v3304_v2 = vmul.f32 -1.442695, %v539_v36  ;;  %v535_v4 = vpop.f32.mrb[2].mxu1 }
 0x11d   :  { %v3305_v19 = vmul.f32 -1.442695, %v546_v62  ;;  %v3756_v26 = vpop.f32.mrb[3].mxu1  ;;  %v563_v62 = vpop.permute.xlu1 %562 }
 0x11e   :  { %5164 = vpow2.f32 %v3304_v2  ;;  %v5967_v26 = vrot.slane %v3294_v28, %v197_v29  ;;  %v3303_v28 = vld [vmem:[%s6737_s2 + $0xb8] sm:$0xff] }
 0x11f   :  { %5166 = vpow2.f32 %v3305_v19 }
 0x124   :  { %v5163_v61 = vpop.eup %5162 }
 0x125   :  { %v361_v14 = vmul.f32 %v5163_v61, %v360_v8 }
 0x127   :  { %v363_v3 = vadd.f32 %v362_v57, %v361_v14 }
 0x128   :  { %v5165_v50 = vpop.eup %5164 }
 0x129   :  { %v369_v9 = vmul.f32 %v367_v37, %v363_v3  ;;  %v543_v60 = vadd.f32 1.0, %v5165_v50  ;;  %v5167_v19 = vpop.eup %5166  ;;  %v570_v3 = vpop.permute.xlu1 %569 }
 0x12a   :  { %v550_v14 = vadd.f32 1.0, %v5167_v19  ;;  %v572_v50 = vmul.f32 0.0, %v570_v3  ;;  %v6798_v19 = vld [vmem:[#allocation4_spill] sm:$0xff]  ;;  %v6806_v3 = vld [vmem:[#allocation13_spill] sm:$0xff] }
 0x12b   :  { %v5960_v52 = vadd.f32 %v376_v31, %v369_v9  ;;  %5168 = vrcp.f32 %v543_v60  ;;  %v6796_v60 = vmov 0.0|0.0   ;;  %v536_v9 = vadd.f32 %v535_v4, %v5967_v26 }
 0x12c   :  { %5170 = vrcp.f32 %v550_v14  ;;  %v6799_v14 = vld [vmem:[#allocation5_spill] sm:$0xff] }
 0x12d   :  { %v574_v48 = vmul.f32 %v5960_v52, %v367_v37  ;;  %658 = vmatmul.mubr.f32.vlgmr.msra.gmra.mrb[4].mxu0 %v5960_v52  ;;  %3790 = vmatmul.mubr.f32.vlgmr.msra.gmra.mrb[4].mxu1 %v5960_v52  ;;  %v6797_v37 = vmov 0.0  }
 0x12e   :  { %4418 = vmatpush1.bf16.msra.mxu0 %v5585_v21  ;;  %4449 = vmatpush3.bf16.msra.mxu1 %v5681_v0 }
 0x12f   :  { %575 = vst [vmem:[%s6738_s5] sm:$0xff] %v574_v48  ;;  %4420 = vmatprep.subr.bf16.mxu0 %v5593_v25  ;;  %4450 = vmatprep.subr.bf16.mxu1 %v6796_v60 }
 0x130   :  { %837 = vmatprep.mubr.f32.mxu0 %v6797_v37  ;;  %3824 = vmatprep.mubr.msk.f32.mxu1 %vm5316_vm0, %v6797_v37 }
 0x132   :  { %4422 = vmatpush1.bf16.msra.mxu0 %v5625_v39  ;;  %4452 = vmatpush3.bf16.msra.mxu1 %v5718_v27 }
 0x133   :  { %4424 = vmatprep.subr.bf16.mxu0 %v5630_v40  ;;  %4453 = vmatprep.subr.bf16.mxu1 %v6796_v60 }
 0x135   :  { %v5169_v29 = vpop.eup %5168 }
 0x136   :  { %v553_v36 = vmul.f32 %v5169_v29, %v536_v9  ;;  %4426 = vmatpush1.bf16.msra.mxu0 %v5663_v55  ;;  %4455 = vmatpush3.bf16.msra.mxu1 %v5756_v59  ;;  %v5171_v2 = vpop.eup %5170  ;;  %v6800_v9 = vld [vmem:[#allocation10_spill] sm:$0xff] }
 0x137   :  { %4428 = vmatprep.subr.bf16.mxu0 %v5669_v58  ;;  %4456 = vmatprep.subr.bf16.mxu1 %v6796_v60  ;;  %v556_v44 = vsub.f32 1.0, %v5171_v2  ;;  %v558_v8 = vmul.f32 0.0, %v5171_v2  ;;  %v6801_v29 = vld [vmem:[#allocation6_spill] sm:$0xff] }
 0x138   :  { %v554_v53 = vadd.f32 %v3303_v28, %v553_v36  ;;  %v6802_v28 = vld [vmem:[#allocation7_spill] sm:$0xff]  ;;  %v3311_v2 = vld [vmem:[%s6736_s1 + $0x18] sm:$0xff] }
 0x139   :  { %v6803_v36 = vld [vmem:[#allocation11_spill] sm:$0xff] }
 0x13a   :  { %5172 = vtanh.f32 %v554_v53  ;;  %4430 = vmatpush1.bf16.msra.mxu0 %v5699_v13  ;;  %4458 = vmatpush3.bf16.msra.mxu1 %v5792_v32  ;;  %v6804_v53 = vld [vmem:[#allocation8_spill] sm:$0xff] }
 0x13b   :  { %4432 = vmatprep.subr.bf16.mxu0 %v5706_v18  ;;  %4459 = vmatprep.subr.bf16.mxu1 %v6796_v60 }
 0x13e   :  { %4434 = vmatpush1.bf16.msra.mxu0 %v5738_v41  ;;  %4461 = vmatpush3.bf16.msra.mxu1 %v5823_v35 }
 0x13f   :  { %4436 = vmatprep.subr.bf16.mxu0 %v5744_v45  ;;  %4462 = vmatprep.subr.bf16.mxu1 %v6796_v60 }
 0x142   :  { %4438 = vmatpush1.bf16.msra.mxu0 %v5774_v7  ;;  %4464 = vmatpush3.bf16.msra.mxu1 %v5839_v24 }
 0x143   :  { %4440 = vmatprep.subr.bf16.mxu0 %v5780_v20  ;;  %4465 = vmatprep.subr.bf16.mxu1 %v6796_v60 }
 0x144   :  { %v5173_v4 = vpop.eup %5172 }
 0x145   :  { %v557_v61 = vmul.f32 %v5173_v4, %v556_v44  ;;  %v6805_v4 = vld [vmem:[#allocation12_spill] sm:$0xff] }
 0x146   :  { %4442 = vmatpush1.bf16.msra.mxu0 %v5810_v63  ;;  %4467 = vmatpush3.bf16.msra.mxu1 %v5850_v12 }
 0x147   :  { %4444 = vmatprep.subr.bf16.mxu0 %v5814_v54  ;;  %4468 = vmatprep.subr.bf16.mxu1 %v6796_v60  ;;  %v559_v57 = vadd.f32 %v558_v8, %v557_v61 }
 0x149   :  { %v565_v46 = vmul.f32 %v563_v62, %v559_v57 }
 0x14a   :  { %4446 = vmatpush1.bf16.msra.mxu0 %v5834_v49  ;;  %4470 = vmatpush3.bf16.msra.mxu1 %v5863_v6 }
 0x14b   :  { %v6007_v31 = vadd.f32 %v572_v50, %v565_v46  ;;  %4472 = vmatprep.subr.bf16.mxu0 %v5364_v5  ;;  %4503 = vmatprep.subr.bf16.mxu1 %v6796_v60 }
 0x14d   :  { %v576_v48 = vmul.f32 %v6007_v31, %v563_v62  ;;  %838 = vmatmul.mubr.f32.vlgmr.msra.gmra.mrb[6].mxu0 %v6007_v31  ;;  %3825 = vmatmul.mubr.f32.vlgmr.msra.gmra.mrb[6].mxu1 %v6007_v31 }
 0x14e   :  { %4474 = vmatpush1.bf16.msra.mxu0 %v5377_v10  ;;  %4505 = vmatpush3.bf16.msra.mxu1 %v5436_v30 }
 0x14f   :  { %3306 = vst [vmem:[%s6739_s6 + $0x38] sm:$0xff] %v576_v48  ;;  %4476 = vmatprep.subr.bf16.mxu0 %v5379_v11  ;;  %4506 = vmatprep.subr.bf16.mxu1 %v6796_v60  ;;  %v3312_v48 = vld [vmem:[%s6736_s1 + $0x20] sm:$0xff] }
 0x150   :  { %1033 = vmatprep.mubr.f32.mxu0 %v6797_v37  ;;  %3859 = vmatprep.mubr.msk.f32.mxu1 %vm5316_vm0, %v6797_v37 }
 0x152   :  { %4478 = vmatpush1.bf16.msra.mxu0 %v5395_v16  ;;  %4508 = vmatpush3.bf16.msra.mxu1 %v5460_v38 }
 0x153   :  { %4480 = vmatprep.subr.bf16.mxu0 %v5398_v17  ;;  %4509 = vmatprep.subr.bf16.mxu1 %v6796_v60 }
 0x156   :  { %4482 = vmatpush1.bf16.msra.mxu0 %v5413_v22  ;;  %4511 = vmatpush3.bf16.msra.mxu1 %v5488_v47 }
 0x157   :  { %4484 = vmatprep.subr.bf16.mxu0 %v5416_v23  ;;  %4512 = vmatprep.subr.bf16.mxu1 %v6796_v60 }
 0x15a   :  { %4486 = vmatpush1.bf16.msra.mxu0 %v5445_v33  ;;  %4514 = vmatpush3.bf16.msra.mxu1 %v5516_v56 }
 0x15b   :  { %4488 = vmatprep.subr.bf16.mxu0 %v5448_v34  ;;  %4515 = vmatprep.subr.bf16.mxu1 %v6796_v60 }
 0x15e   :  { %4490 = vmatpush1.bf16.msra.mxu0 %v5473_v42  ;;  %4517 = vmatpush3.bf16.msra.mxu1 %v5544_v1 }
 0x15f   :  { %4492 = vmatprep.subr.bf16.mxu0 %v5476_v43  ;;  %4518 = vmatprep.subr.bf16.mxu1 %v6796_v60 }
 0x162   :  { %4494 = vmatpush1.bf16.msra.mxu0 %v5501_v51  ;;  %4520 = vmatpush3.bf16.msra.mxu1 %v5572_v15 }
 0x163   :  { %4496 = vmatprep.subr.bf16.mxu0 %v6798_v19  ;;  %4521 = vmatprep.subr.bf16.mxu1 %v6796_v60 }
 0x166   :  { %4498 = vmatpush1.bf16.msra.mxu0 %v6799_v14  ;;  %4523 = vmatpush3.bf16.msra.mxu1 %v6800_v9 }
 0x167   :  { %4500 = vmatprep.subr.bf16.mxu0 %v6801_v29  ;;  %4524 = vmatprep.subr.bf16.mxu1 %v6796_v60 }
 0x16a   :  { %4502 = vmatpush1.bf16.msra.mxu0 %v6802_v28  ;;  %4526 = vmatpush3.bf16.msra.mxu1 %v6803_v36 }
 0x16b   :  { %4528 = vmatprep.subr.bf16.mxu0 %v6804_v53  ;;  %4559 = vmatprep.subr.bf16.mxu1 %v6796_v60 }
 0x200   :  { %v659_v62 = vpop.f32.mrb[4].mxu0  ;;  %v730_v44 = vpop.f32.mrb[4].mxu1 }
 0x201   :  { %v660_v8 = vadd.f32 %v659_v62, %v6805_v4  ;;  %v661_v61 = vpop.f32.mrb[5].mxu0  ;;  %v3791_v57 = vpop.f32.mrb[5].mxu1  ;;  %v6807_v62 = vld [vmem:[#allocation14_spill] sm:$0xff] }
 0x202   :  { %v662_v50 = vadd.f32 %v661_v61, %v6806_v3  ;;  %v731_v4 = vadd.f32 %v730_v44, %v6807_v62 }
 0x203   :  { %v734_v46 = vadd.f32 %v3311_v2, %v660_v8  ;;  %v3313_v2 = vld [vmem:[%s6736_s1 + $0x28] sm:$0xff] }
 0x204   :  { %v741_v36 = vadd.f32 %v3312_v48, %v662_v50 }
 0x205   :  { %v3314_v53 = vmul.f32 -1.442695, %v734_v46  ;;  %v6809_v46 = vld [vmem:[#allocation16_spill] sm:$0xff] }
 0x206   :  { %v3315_v28 = vmul.f32 -1.442695, %v741_v36 }
 0x207   :  { %5174 = vpow2.f32 %v3314_v53  ;;  %v3316_v53 = vld [vmem:[%s6737_s2 + $0x90] sm:$0xff] }
 0x208   :  { %5176 = vpow2.f32 %v3315_v28 }
 0x211   :  { %v5175_v29 = vpop.eup %5174 }
 0x212   :  { %v738_v9 = vadd.f32 1.0, %v5175_v29  ;;  %v5177_v14 = vpop.eup %5176  ;;  %v6808_v29 = vld [vmem:[#allocation15_spill] sm:$0xff] }
 0x213   :  { %v745_v19 = vadd.f32 1.0, %v5177_v14 }
 0x214   :  { %5178 = vrcp.f32 %v738_v9 }
 0x215   :  { %5180 = vrcp.f32 %v745_v19 }
 0x21e   :  { %v5179_v57 = vpop.eup %5178 }
 0x21f   :  { %v748_v8 = vmul.f32 %v5179_v57, %v731_v4  ;;  %v3317_v4 = vld [vmem:[%s6737_s2 + $0x98] sm:$0xff]  ;;  %v5181_v62 = vpop.eup %5180 }
 0x220   :  { %v839_v36 = vpop.f32.mrb[6].mxu0  ;;  %v910_v28 = vpop.f32.mrb[6].mxu1  ;;  %v751_v15 = vsub.f32 1.0, %v5181_v62 }
 0x221   :  { %v749_v61 = vadd.f32 %v3313_v2, %v748_v8  ;;  %v840_v9 = vadd.f32 %v839_v36, %v6808_v29  ;;  %v841_v50 = vpop.f32.mrb[7].mxu0  ;;  %v3826_v14 = vpop.f32.mrb[7].mxu1  ;;  %v753_v2 = vmul.f32 %v5181_v62, %v5960_v52  ;;  %v3318_v62 = vld [vmem:[%s6737_s2 + $0xa0] sm:$0xff] }
 0x222   :  { %v842_v44 = vadd.f32 %v841_v50, %v6809_v46  ;;  %v758_v50 = vpop.permute.xlu0 %757 }
 0x223   :  { %5182 = vtanh.f32 %v749_v61  ;;  %v914_v48 = vadd.f32 %v3316_v53, %v840_v9  ;;  %v765_v61 = vpop.permute.xlu1 %764 }
 0x224   :  { %v921_v57 = vadd.f32 %v3317_v4, %v842_v44  ;;  %v767_v53 = vmul.f32 %v765_v61, %v5960_v52 }
 0x225   :  { %v3319_v19 = vmul.f32 -1.442695, %v914_v48 }
 0x226   :  { %v3320_v3 = vmul.f32 -1.442695, %v921_v57 }
 0x227   :  { %5184 = vpow2.f32 %v3319_v19 }
 0x228   :  { %5186 = vpow2.f32 %v3320_v3 }
 0x22d   :  { %v5183_v51 = vpop.eup %5182 }
 0x22e   :  { %v752_v8 = vmul.f32 %v5183_v51, %v751_v15  ;;  %v911_v15 = vadd.f32 %v910_v28, %v5967_v26 }
 0x230   :  { %v754_v36 = vadd.f32 %v753_v2, %v752_v8 }
 0x231   :  { %v5185_v14 = vpop.eup %5184 }
 0x232   :  { %v918_v9 = vadd.f32 1.0, %v5185_v14  ;;  %v760_v46 = vmul.f32 %v758_v50, %v754_v36  ;;  %v5187_v51 = vpop.eup %5186  ;;  %v938_v14 = vpop.permute.xlu0 %937 }
 0x233   :  { %v925_v52 = vadd.f32 1.0, %v5187_v51  ;;  %v6811_v51 = vld [vmem:[#allocation9_spill] sm:$0xff] }
 0x234   :  { %5188 = vrcp.f32 %v918_v9  ;;  %v6074_v48 = vadd.f32 %v767_v53, %v760_v46 }
 0x235   :  { %5190 = vrcp.f32 %v925_v52  ;;  %v6812_v52 = vld [vmem:[#allocation4_spill] sm:$0xff] }
 0x236   :  { %v949_v44 = vmul.f32 %v6074_v48, %v758_v50  ;;  %1034 = vmatmul.mubr.f32.vlgmr.msra.gmra.mrb[8].mxu0 %v6074_v48  ;;  %3860 = vmatmul.mubr.f32.vlgmr.msra.gmra.mrb[8].mxu1 %v6074_v48  ;;  %v945_v50 = vpop.permute.xlu1 %944 }
 0x237   :  { %4530 = vmatpush1.bf16.msra.mxu0 %v5585_v21  ;;  %4561 = vmatpush3.bf16.msra.mxu1 %v5681_v0  ;;  %v947_v53 = vmul.f32 %v945_v50, %v6007_v31 }
 0x238   :  { %3321 = vst [vmem:[%s6738_s5 + $0x8] sm:$0xff] %v949_v44  ;;  %4532 = vmatprep.subr.bf16.mxu0 %v5593_v25  ;;  %4562 = vmatprep.subr.bf16.mxu1 %v6796_v60 }
 0x239   :  { %1213 = vmatprep.mubr.f32.mxu0 %v6797_v37  ;;  %3894 = vmatprep.mubr.msk.f32.mxu1 %vm5316_vm0, %v6797_v37 }
 0x23b   :  { %4534 = vmatpush1.bf16.msra.mxu0 %v5625_v39  ;;  %4564 = vmatpush3.bf16.msra.mxu1 %v5718_v27 }
 0x23c   :  { %4536 = vmatprep.subr.bf16.mxu0 %v5630_v40  ;;  %4565 = vmatprep.subr.bf16.mxu1 %v6796_v60 }
 0x23e   :  { %v5189_v3 = vpop.eup %5188 }
 0x23f   :  { %v928_v46 = vmul.f32 %v5189_v3, %v911_v15  ;;  %4538 = vmatpush1.bf16.msra.mxu0 %v5663_v55  ;;  %4567 = vmatpush3.bf16.msra.mxu1 %v5756_v59  ;;  %v5191_v28 = vpop.eup %5190  ;;  %v6813_v15 = vld [vmem:[#allocation5_spill] sm:$0xff]  ;;  %v6814_v3 = vld [vmem:[#allocation10_spill] sm:$0xff] }
 0x240   :  { %4540 = vmatprep.subr.bf16.mxu0 %v5669_v58  ;;  %4568 = vmatprep.subr.bf16.mxu1 %v6796_v60  ;;  %v931_v19 = vsub.f32 1.0, %v5191_v28  ;;  %v933_v2 = vmul.f32 %v5191_v28, %v6007_v31  ;;  %v6810_v31 = vld [vmem:[#allocation3_spill] sm:$0xff]  ;;  %v6818_v28 = vld [vmem:[#allocation8_spill] sm:$0xff] }
 0x241   :  { %v929_v4 = vadd.f32 %v3318_v62, %v928_v46  ;;  %v6815_v62 = vld [vmem:[#allocation6_spill] sm:$0xff]  ;;  %v6816_v46 = vld [vmem:[#allocation7_spill] sm:$0xff] }
 0x243   :  { %5192 = vtanh.f32 %v929_v4  ;;  %4542 = vmatpush1.bf16.msra.mxu0 %v5699_v13  ;;  %4570 = vmatpush3.bf16.msra.mxu1 %v5792_v32  ;;  %v6817_v4 = vld [vmem:[#allocation11_spill] sm:$0xff] }
 0x244   :  { %4544 = vmatprep.subr.bf16.mxu0 %v5706_v18  ;;  %4571 = vmatprep.subr.bf16.mxu1 %v6796_v60 }
 0x247   :  { %4546 = vmatpush1.bf16.msra.mxu0 %v5738_v41  ;;  %4573 = vmatpush3.bf16.msra.mxu1 %v5823_v35 }
 0x248   :  { %4548 = vmatprep.subr.bf16.mxu0 %v5744_v45  ;;  %4574 = vmatprep.subr.bf16.mxu1 %v6796_v60 }
 0x24b   :  { %4550 = vmatpush1.bf16.msra.mxu0 %v5774_v7  ;;  %4576 = vmatpush3.bf16.msra.mxu1 %v5839_v24 }
 0x24c   :  { %4552 = vmatprep.subr.bf16.mxu0 %v5780_v20  ;;  %4577 = vmatprep.subr.bf16.mxu1 %v6796_v60 }
 0x24d   :  { %v5193_v57 = vpop.eup %5192 }
 0x24e   :  { %v932_v8 = vmul.f32 %v5193_v57, %v931_v19  ;;  %v3327_v19 = vld [vmem:[%s6736_s1 + $0x30] sm:$0xff] }
 0x24f   :  { %4554 = vmatpush1.bf16.msra.mxu0 %v5810_v63  ;;  %4579 = vmatpush3.bf16.msra.mxu1 %v5850_v12 }
 0x250   :  { %4556 = vmatprep.subr.bf16.mxu0 %v5814_v54  ;;  %4580 = vmatprep.subr.bf16.mxu1 %v6796_v60  ;;  %v934_v36 = vadd.f32 %v933_v2, %v932_v8  ;;  %v6819_v8 = vld [vmem:[#allocation12_spill] sm:$0xff] }
 0x252   :  { %v940_v61 = vmul.f32 %v938_v14, %v934_v36 }
 0x253   :  { %4558 = vmatpush1.bf16.msra.mxu0 %v5834_v49  ;;  %4582 = vmatpush3.bf16.msra.mxu1 %v5863_v6 }
 0x254   :  { %v6121_v9 = vadd.f32 %v947_v53, %v940_v61  ;;  %4584 = vmatprep.subr.bf16.mxu0 %v5364_v5  ;;  %4615 = vmatprep.subr.bf16.mxu1 %v6796_v60  ;;  %v6820_v61 = vld [vmem:[#allocation13_spill] sm:$0xff] }
 0x256   :  { %v952_v44 = vmul.f32 %v6121_v9, %v938_v14  ;;  %1214 = vmatmul.mubr.f32.vlgmr.msra.gmra.mrb[10].mxu0 %v6121_v9  ;;  %3895 = vmatmul.mubr.f32.vlgmr.msra.gmra.mrb[10].mxu1 %v6121_v9 }
 0x257   :  { %4586 = vmatpush1.bf16.msra.mxu0 %v5377_v10  ;;  %4617 = vmatpush3.bf16.msra.mxu1 %v5436_v30 }
 0x258   :  { %3322 = vst [vmem:[%s6739_s6 + $0x30] sm:$0xff] %v952_v44  ;;  %4588 = vmatprep.subr.bf16.mxu0 %v5379_v11  ;;  %4618 = vmatprep.subr.bf16.mxu1 %v6796_v60 }
 0x259   :  { %1409 = vmatprep.mubr.f32.mxu0 %v6797_v37  ;;  %3929 = vmatprep.mubr.msk.f32.mxu1 %vm5316_vm0, %v6797_v37 }
 0x25b   :  { %4590 = vmatpush1.bf16.msra.mxu0 %v5395_v16  ;;  %4620 = vmatpush3.bf16.msra.mxu1 %v5460_v38 }
 0x25c   :  { %4592 = vmatprep.subr.bf16.mxu0 %v5398_v17  ;;  %4621 = vmatprep.subr.bf16.mxu1 %v6796_v60 }
 0x25f   :  { %4594 = vmatpush1.bf16.msra.mxu0 %v5413_v22  ;;  %4623 = vmatpush3.bf16.msra.mxu1 %v5488_v47 }
 0x260   :  { %4596 = vmatprep.subr.bf16.mxu0 %v5416_v23  ;;  %4624 = vmatprep.subr.bf16.mxu1 %v6796_v60 }
 0x263   :  { %4598 = vmatpush1.bf16.msra.mxu0 %v5445_v33  ;;  %4626 = vmatpush3.bf16.msra.mxu1 %v5516_v56 }
 0x264   :  { %4600 = vmatprep.subr.bf16.mxu0 %v5448_v34  ;;  %4627 = vmatprep.subr.bf16.mxu1 %v6796_v60 }
 0x267   :  { %4602 = vmatpush1.bf16.msra.mxu0 %v5473_v42  ;;  %4629 = vmatpush3.bf16.msra.mxu1 %v5544_v1 }
 0x268   :  { %4604 = vmatprep.subr.bf16.mxu0 %v5476_v43  ;;  %4630 = vmatprep.subr.bf16.mxu1 %v6796_v60 }
 0x26b   :  { %4606 = vmatpush1.bf16.msra.mxu0 %v6810_v31  ;;  %4632 = vmatpush3.bf16.msra.mxu1 %v6811_v51 }
 0x26c   :  { %4608 = vmatprep.subr.bf16.mxu0 %v6812_v52  ;;  %4633 = vmatprep.subr.bf16.mxu1 %v6796_v60 }
 0x26f   :  { %4610 = vmatpush1.bf16.msra.mxu0 %v6813_v15  ;;  %4635 = vmatpush3.bf16.msra.mxu1 %v6814_v3 }
 0x270   :  { %4612 = vmatprep.subr.bf16.mxu0 %v6815_v62  ;;  %4636 = vmatprep.subr.bf16.mxu1 %v6796_v60 }
 0x273   :  { %4614 = vmatpush1.bf16.msra.mxu0 %v6816_v46  ;;  %4638 = vmatpush3.bf16.msra.mxu1 %v6817_v4  ;;  %v3328_v4 = vld [vmem:[%s6736_s1 + $0x38] sm:$0xff] }
 0x274   :  { %4640 = vmatprep.subr.bf16.mxu0 %v6818_v28  ;;  %4671 = vmatprep.subr.bf16.mxu1 %v6796_v60 }
 0x309   :  { %v1035_v57 = vpop.f32.mrb[8].mxu0  ;;  %v1106_v2 = vpop.f32.mrb[8].mxu1 }
 0x30a   :  { %v1036_v36 = vadd.f32 %v1035_v57, %v6819_v8  ;;  %v1037_v14 = vpop.f32.mrb[9].mxu0  ;;  %v3861_v50 = vpop.f32.mrb[9].mxu1  ;;  %v6821_v57 = vld [vmem:[#allocation14_spill] sm:$0xff] }
 0x30b   :  { %v1038_v53 = vadd.f32 %v1037_v14, %v6820_v61  ;;  %v1107_v8 = vadd.f32 %v1106_v2, %v6821_v57  ;;  %v6822_v14 = vld [vmem:[#allocation16_spill] sm:$0xff] }
 0x30c   :  { %v1110_v44 = vadd.f32 %v3327_v19, %v1036_v36  ;;  %v3329_v19 = vld [vmem:[%s6736_s1 + $0x40] sm:$0xff] }
 0x30d   :  { %v1117_v46 = vadd.f32 %v3328_v4, %v1038_v53  ;;  %v3332_v4 = vld [vmem:[%s6737_s2 + $0x78] sm:$0xff] }
 0x30e   :  { %v3330_v28 = vmul.f32 -1.442695, %v1110_v44 }
 0x30f   :  { %v3331_v62 = vmul.f32 -1.442695, %v1117_v46 }
 0x310   :  { %5194 = vpow2.f32 %v3330_v28 }
 0x311   :  { %5196 = vpow2.f32 %v3331_v62 }
 0x31a   :  { %v5195_v3 = vpop.eup %5194 }
 0x31b   :  { %v1114_v15 = vadd.f32 1.0, %v5195_v3  ;;  %v5197_v52 = vpop.eup %5196 }
 0x31c   :  { %v1121_v51 = vadd.f32 1.0, %v5197_v52 }
 0x31d   :  { %5198 = vrcp.f32 %v1114_v15 }
 0x31e   :  { %5200 = vrcp.f32 %v1121_v51 }
 0x327   :  { %v5199_v50 = vpop.eup %5198 }
 0x328   :  { %v1124_v36 = vmul.f32 %v5199_v50, %v1107_v8  ;;  %v3333_v8 = vld [vmem:[%s6737_s2 + $0x80] sm:$0xff]  ;;  %v5201_v50 = vpop.eup %5200 }
 0x329   :  { %v1215_v46 = vpop.f32.mrb[10].mxu0  ;;  %v1286_v62 = vpop.f32.mrb[10].mxu1  ;;  %v1127_v61 = vsub.f32 1.0, %v5201_v50 }
 0x32a   :  { %v1125_v28 = vadd.f32 %v3329_v19, %v1124_v36  ;;  %v1216_v15 = vadd.f32 %v1215_v46, %v6808_v29  ;;  %v1217_v3 = vpop.f32.mrb[11].mxu0  ;;  %v3896_v52 = vpop.f32.mrb[11].mxu1  ;;  %v1129_v19 = vmul.f32 %v5201_v50, %v6074_v48 }
 0x32b   :  { %v1218_v2 = vadd.f32 %v1217_v3, %v6822_v14  ;;  %v1134_v3 = vpop.permute.xlu0 %1133 }
 0x32c   :  { %5202 = vtanh.f32 %v1125_v28  ;;  %v1290_v53 = vadd.f32 %v3332_v4, %v1216_v15  ;;  %v1141_v28 = vpop.permute.xlu1 %1140 }
 0x32d   :  { %v1297_v44 = vadd.f32 %v3333_v8, %v1218_v2  ;;  %v1143_v14 = vmul.f32 %v1141_v28, %v6074_v48 }
 0x32e   :  { %v3335_v51 = vmul.f32 -1.442695, %v1290_v53 }
 0x32f   :  { %v3336_v57 = vmul.f32 -1.442695, %v1297_v44 }
 0x330   :  { %5204 = vpow2.f32 %v3335_v51 }
 0x331   :  { %5206 = vpow2.f32 %v3336_v57 }
 0x336   :  { %v5203_v31 = vpop.eup %5202 }
 0x337   :  { %v1128_v36 = vmul.f32 %v5203_v31, %v1127_v61  ;;  %v1287_v61 = vadd.f32 %v1286_v62, %v5967_v26 }
 0x339   :  { %v1130_v46 = vadd.f32 %v1129_v19, %v1128_v36 }
 0x33a   :  { %v5205_v52 = vpop.eup %5204 }
 0x33b   :  { %v1294_v4 = vadd.f32 1.0, %v5205_v52  ;;  %v1136_v15 = vmul.f32 %v1134_v3, %v1130_v46  ;;  %v5207_v31 = vpop.eup %5206  ;;  %v1314_v52 = vpop.permute.xlu0 %1313 }
 0x33c   :  { %v1301_v48 = vadd.f32 1.0, %v5207_v31  ;;  %v6824_v31 = vld [vmem:[#allocation9_spill] sm:$0xff] }
 0x33d   :  { %5208 = vrcp.f32 %v1294_v4  ;;  %v6188_v53 = vadd.f32 %v1143_v14, %v1136_v15  ;;  %v3334_v14 = vld [vmem:[%s6737_s2 + $0x88] sm:$0xff] }
 0x33e   :  { %5210 = vrcp.f32 %v1301_v48  ;;  %v6825_v48 = vld [vmem:[#allocation4_spill] sm:$0xff] }
 0x33f   :  { %v1325_v2 = vmul.f32 %v6188_v53, %v1134_v3  ;;  %1410 = vmatmul.mubr.f32.vlgmr.msra.gmra.mrb[12].mxu0 %v6188_v53  ;;  %3930 = vmatmul.mubr.f32.vlgmr.msra.gmra.mrb[12].mxu1 %v6188_v53  ;;  %v1321_v3 = vpop.permute.xlu1 %1320 }
 0x340   :  { %4642 = vmatpush1.bf16.msra.mxu0 %v5585_v21  ;;  %4673 = vmatpush3.bf16.msra.mxu1 %v5681_v0  ;;  %v1323_v4 = vmul.f32 %v1321_v3, %v6121_v9 }
 0x341   :  { %3337 = vst [vmem:[%s6738_s5 + $0x10] sm:$0xff] %v1325_v2  ;;  %4644 = vmatprep.subr.bf16.mxu0 %v5593_v25  ;;  %4674 = vmatprep.subr.bf16.mxu1 %v6796_v60 }
 0x342   :  { %1589 = vmatprep.mubr.f32.mxu0 %v6797_v37  ;;  %3964 = vmatprep.mubr.msk.f32.mxu1 %vm5316_vm0, %v6797_v37 }
 0x344   :  { %4646 = vmatpush1.bf16.msra.mxu0 %v5625_v39  ;;  %4676 = vmatpush3.bf16.msra.mxu1 %v5718_v27 }
 0x345   :  { %4648 = vmatprep.subr.bf16.mxu0 %v5630_v40  ;;  %4677 = vmatprep.subr.bf16.mxu1 %v6796_v60 }
 0x347   :  { %v5209_v57 = vpop.eup %5208 }
 0x348   :  { %v1304_v8 = vmul.f32 %v5209_v57, %v1287_v61  ;;  %4650 = vmatpush1.bf16.msra.mxu0 %v5663_v55  ;;  %4679 = vmatpush3.bf16.msra.mxu1 %v5756_v59  ;;  %v5211_v62 = vpop.eup %5210  ;;  %v6826_v61 = vld [vmem:[#allocation5_spill] sm:$0xff]  ;;  %v6827_v57 = vld [vmem:[#allocation10_spill] sm:$0xff] }
 0x349   :  { %4652 = vmatprep.subr.bf16.mxu0 %v5669_v58  ;;  %4680 = vmatprep.subr.bf16.mxu1 %v6796_v60  ;;  %v1307_v44 = vsub.f32 1.0, %v5211_v62  ;;  %v1309_v19 = vmul.f32 %v5211_v62, %v6121_v9  ;;  %v6823_v9 = vld [vmem:[#allocation3_spill] sm:$0xff]  ;;  %v6831_v62 = vld [vmem:[#allocation8_spill] sm:$0xff] }
 0x34a   :  { %v1305_v51 = vadd.f32 %v3334_v14, %v1304_v8  ;;  %v6828_v14 = vld [vmem:[#allocation6_spill] sm:$0xff]  ;;  %v6829_v8 = vld [vmem:[#allocation7_spill] sm:$0xff] }
 0x34c   :  { %5212 = vtanh.f32 %v1305_v51  ;;  %4654 = vmatpush1.bf16.msra.mxu0 %v5699_v13  ;;  %4682 = vmatpush3.bf16.msra.mxu1 %v5792_v32  ;;  %v6830_v51 = vld [vmem:[#allocation11_spill] sm:$0xff] }
 0x34d   :  { %4656 = vmatprep.subr.bf16.mxu0 %v5706_v18  ;;  %4683 = vmatprep.subr.bf16.mxu1 %v6796_v60 }
 0x350   :  { %4658 = vmatpush1.bf16.msra.mxu0 %v5738_v41  ;;  %4685 = vmatpush3.bf16.msra.mxu1 %v5823_v35 }
 0x351   :  { %4660 = vmatprep.subr.bf16.mxu0 %v5744_v45  ;;  %4686 = vmatprep.subr.bf16.mxu1 %v6796_v60 }
 0x354   :  { %4662 = vmatpush1.bf16.msra.mxu0 %v5774_v7  ;;  %4688 = vmatpush3.bf16.msra.mxu1 %v5839_v24 }
 0x355   :  { %4664 = vmatprep.subr.bf16.mxu0 %v5780_v20  ;;  %4689 = vmatprep.subr.bf16.mxu1 %v6796_v60 }
 0x356   :  { %v5213_v50 = vpop.eup %5212 }
 0x357   :  { %v1308_v36 = vmul.f32 %v5213_v50, %v1307_v44  ;;  %v3343_v44 = vld [vmem:[%s6736_s1 + $0x48] sm:$0xff] }
 0x358   :  { %4666 = vmatpush1.bf16.msra.mxu0 %v5810_v63  ;;  %4691 = vmatpush3.bf16.msra.mxu1 %v5850_v12 }
 0x359   :  { %4668 = vmatprep.subr.bf16.mxu0 %v5814_v54  ;;  %4692 = vmatprep.subr.bf16.mxu1 %v6796_v60  ;;  %v1310_v46 = vadd.f32 %v1309_v19, %v1308_v36  ;;  %v6832_v36 = vld [vmem:[#allocation12_spill] sm:$0xff] }
 0x35b   :  { %v1316_v28 = vmul.f32 %v1314_v52, %v1310_v46 }
 0x35c   :  { %4670 = vmatpush1.bf16.msra.mxu0 %v5834_v49  ;;  %4694 = vmatpush3.bf16.msra.mxu1 %v5863_v6 }
 0x35d   :  { %v6235_v15 = vadd.f32 %v1323_v4, %v1316_v28  ;;  %4696 = vmatprep.subr.bf16.mxu0 %v5364_v5  ;;  %4727 = vmatprep.subr.bf16.mxu1 %v6796_v60  ;;  %v6833_v28 = vld [vmem:[#allocation13_spill] sm:$0xff] }
 0x35f   :  { %v1328_v2 = vmul.f32 %v6235_v15, %v1314_v52  ;;  %1590 = vmatmul.mubr.f32.vlgmr.msra.gmra.mrb[14].mxu0 %v6235_v15  ;;  %3965 = vmatmul.mubr.f32.vlgmr.msra.gmra.mrb[14].mxu1 %v6235_v15 }
 0x360   :  { %4698 = vmatpush1.bf16.msra.mxu0 %v5377_v10  ;;  %4729 = vmatpush3.bf16.msra.mxu1 %v5436_v30 }
 0x361   :  { %3338 = vst [vmem:[%s6739_s6 + $0x28] sm:$0xff] %v1328_v2  ;;  %4700 = vmatprep.subr.bf16.mxu0 %v5379_v11  ;;  %4730 = vmatprep.subr.bf16.mxu1 %v6796_v60 }
 0x362   :  { %1785 = vmatprep.mubr.f32.mxu0 %v6797_v37  ;;  %3999 = vmatprep.mubr.msk.f32.mxu1 %vm5316_vm0, %v6797_v37 }
 0x364   :  { %4702 = vmatpush1.bf16.msra.mxu0 %v5395_v16  ;;  %4732 = vmatpush3.bf16.msra.mxu1 %v5460_v38 }
 0x365   :  { %4704 = vmatprep.subr.bf16.mxu0 %v5398_v17  ;;  %4733 = vmatprep.subr.bf16.mxu1 %v6796_v60 }
 0x368   :  { %4706 = vmatpush1.bf16.msra.mxu0 %v5413_v22  ;;  %4735 = vmatpush3.bf16.msra.mxu1 %v5488_v47 }
 0x369   :  { %4708 = vmatprep.subr.bf16.mxu0 %v5416_v23  ;;  %4736 = vmatprep.subr.bf16.mxu1 %v6796_v60 }
 0x36c   :  { %4710 = vmatpush1.bf16.msra.mxu0 %v5445_v33  ;;  %4738 = vmatpush3.bf16.msra.mxu1 %v5516_v56 }
 0x36d   :  { %4712 = vmatprep.subr.bf16.mxu0 %v5448_v34  ;;  %4739 = vmatprep.subr.bf16.mxu1 %v6796_v60 }
 0x370   :  { %4714 = vmatpush1.bf16.msra.mxu0 %v5473_v42  ;;  %4741 = vmatpush3.bf16.msra.mxu1 %v5544_v1 }
 0x371   :  { %4716 = vmatprep.subr.bf16.mxu0 %v5476_v43  ;;  %4742 = vmatprep.subr.bf16.mxu1 %v6796_v60 }
 0x374   :  { %4718 = vmatpush1.bf16.msra.mxu0 %v6823_v9  ;;  %4744 = vmatpush3.bf16.msra.mxu1 %v6824_v31 }
 0x375   :  { %4720 = vmatprep.subr.bf16.mxu0 %v6825_v48  ;;  %4745 = vmatprep.subr.bf16.mxu1 %v6796_v60 }
 0x378   :  { %4722 = vmatpush1.bf16.msra.mxu0 %v6826_v61  ;;  %4747 = vmatpush3.bf16.msra.mxu1 %v6827_v57 }
 0x379   :  { %4724 = vmatprep.subr.bf16.mxu0 %v6828_v14  ;;  %4748 = vmatprep.subr.bf16.mxu1 %v6796_v60 }
 0x37c   :  { %4726 = vmatpush1.bf16.msra.mxu0 %v6829_v8  ;;  %4750 = vmatpush3.bf16.msra.mxu1 %v6830_v51  ;;  %v3344_v51 = vld [vmem:[%s6736_s1 + $0x50] sm:$0xff] }
 0x37d   :  { %4752 = vmatprep.subr.bf16.mxu0 %v6831_v62  ;;  %4783 = vmatprep.subr.bf16.mxu1 %v6796_v60 }
 0x412   :  { %v1411_v50 = vpop.f32.mrb[12].mxu0  ;;  %v1482_v19 = vpop.f32.mrb[12].mxu1 }
 0x413   :  { %v1412_v46 = vadd.f32 %v1411_v50, %v6832_v36  ;;  %v1413_v52 = vpop.f32.mrb[13].mxu0  ;;  %v3931_v3 = vpop.f32.mrb[13].mxu1  ;;  %v6834_v50 = vld [vmem:[#allocation14_spill] sm:$0xff] }
 0x414   :  { %v1414_v4 = vadd.f32 %v1413_v52, %v6833_v28  ;;  %v1483_v36 = vadd.f32 %v1482_v19, %v6834_v50  ;;  %v6835_v52 = vld [vmem:[#allocation16_spill] sm:$0xff] }
 0x415   :  { %v1486_v2 = vadd.f32 %v3343_v44, %v1412_v46  ;;  %v3345_v44 = vld [vmem:[%s6736_s1 + $0x58] sm:$0xff] }
 0x416   :  { %v1493_v8 = vadd.f32 %v3344_v51, %v1414_v4  ;;  %v3348_v51 = vld [vmem:[%s6737_s2 + $0x60] sm:$0xff] }
 0x417   :  { %v3346_v62 = vmul.f32 -1.442695, %v1486_v2 }
 0x418   :  { %v3347_v14 = vmul.f32 -1.442695, %v1493_v8 }
 0x419   :  { %5214 = vpow2.f32 %v3346_v62 }
 0x41a   :  { %5216 = vpow2.f32 %v3347_v14 }
 0x423   :  { %v5215_v57 = vpop.eup %5214 }
 0x424   :  { %v1490_v61 = vadd.f32 1.0, %v5215_v57  ;;  %v5217_v48 = vpop.eup %5216 }
 0x425   :  { %v1497_v31 = vadd.f32 1.0, %v5217_v48 }
 0x426   :  { %5218 = vrcp.f32 %v1490_v61 }
 0x427   :  { %5220 = vrcp.f32 %v1497_v31 }
 0x430   :  { %v5219_v3 = vpop.eup %5218 }
 0x431   :  { %v1500_v46 = vmul.f32 %v5219_v3, %v1483_v36  ;;  %v3349_v36 = vld [vmem:[%s6737_s2 + $0x68] sm:$0xff]  ;;  %v5221_v3 = vpop.eup %5220 }
 0x432   :  { %v1591_v8 = vpop.f32.mrb[14].mxu0  ;;  %v1662_v14 = vpop.f32.mrb[14].mxu1  ;;  %v1503_v28 = vsub.f32 1.0, %v5221_v3 }
 0x433   :  { %v1501_v62 = vadd.f32 %v3345_v44, %v1500_v46  ;;  %v1592_v61 = vadd.f32 %v1591_v8, %v6808_v29  ;;  %v1593_v57 = vpop.f32.mrb[15].mxu0  ;;  %v3966_v48 = vpop.f32.mrb[15].mxu1  ;;  %v1505_v44 = vmul.f32 %v5221_v3, %v6188_v53 }
 0x434   :  { %v1594_v19 = vadd.f32 %v1593_v57, %v6835_v52  ;;  %v1510_v57 = vpop.permute.xlu0 %1509 }
 0x435   :  { %5222 = vtanh.f32 %v1501_v62  ;;  %v1666_v4 = vadd.f32 %v3348_v51, %v1592_v61  ;;  %v1517_v62 = vpop.permute.xlu1 %1516 }
 0x436   :  { %v1673_v2 = vadd.f32 %v3349_v36, %v1594_v19  ;;  %v1519_v52 = vmul.f32 %v1517_v62, %v6188_v53 }
 0x437   :  { %v3351_v31 = vmul.f32 -1.442695, %v1666_v4 }
 0x438   :  { %v3352_v50 = vmul.f32 -1.442695, %v1673_v2 }
 0x439   :  { %5224 = vpow2.f32 %v3351_v31 }
 0x43a   :  { %5226 = vpow2.f32 %v3352_v50 }
 0x43f   :  { %v5223_v9 = vpop.eup %5222 }
 0x440   :  { %v1504_v46 = vmul.f32 %v5223_v9, %v1503_v28  ;;  %v1663_v28 = vadd.f32 %v1662_v14, %v5967_v26 }
 0x442   :  { %v1506_v8 = vadd.f32 %v1505_v44, %v1504_v46 }
 0x443   :  { %v5225_v48 = vpop.eup %5224 }
 0x444   :  { %v1670_v51 = vadd.f32 1.0, %v5225_v48  ;;  %v1512_v61 = vmul.f32 %v1510_v57, %v1506_v8  ;;  %v5227_v9 = vpop.eup %5226  ;;  %v1690_v48 = vpop.permute.xlu0 %1689 }
 0x445   :  { %v1677_v53 = vadd.f32 1.0, %v5227_v9  ;;  %v6837_v9 = vld [vmem:[#allocation9_spill] sm:$0xff] }
 0x446   :  { %5228 = vrcp.f32 %v1670_v51  ;;  %v6302_v4 = vadd.f32 %v1519_v52, %v1512_v61  ;;  %v3350_v52 = vld [vmem:[%s6737_s2 + $0x70] sm:$0xff] }
 0x447   :  { %5230 = vrcp.f32 %v1677_v53  ;;  %v6838_v53 = vld [vmem:[#allocation4_spill] sm:$0xff] }
 0x448   :  { %v1701_v19 = vmul.f32 %v6302_v4, %v1510_v57  ;;  %1786 = vmatmul.mubr.f32.vlgmr.msra.gmra.mrb[16].mxu0 %v6302_v4  ;;  %4000 = vmatmul.mubr.f32.vlgmr.msra.gmra.mrb[16].mxu1 %v6302_v4  ;;  %v1697_v57 = vpop.permute.xlu1 %1696 }
 0x449   :  { %4754 = vmatpush1.bf16.msra.mxu0 %v5585_v21  ;;  %4785 = vmatpush3.bf16.msra.mxu1 %v5681_v0  ;;  %v1699_v51 = vmul.f32 %v1697_v57, %v6235_v15 }
 0x44a   :  { %3353 = vst [vmem:[%s6738_s5 + $0x18] sm:$0xff] %v1701_v19  ;;  %4756 = vmatprep.subr.bf16.mxu0 %v5593_v25  ;;  %4786 = vmatprep.subr.bf16.mxu1 %v6796_v60 }
 0x44b   :  { %1965 = vmatprep.mubr.f32.mxu0 %v6797_v37  ;;  %4034 = vmatprep.mubr.msk.f32.mxu1 %vm5316_vm0, %v6797_v37 }
 0x44d   :  { %4758 = vmatpush1.bf16.msra.mxu0 %v5625_v39  ;;  %4788 = vmatpush3.bf16.msra.mxu1 %v5718_v27 }
 0x44e   :  { %4760 = vmatprep.subr.bf16.mxu0 %v5630_v40  ;;  %4789 = vmatprep.subr.bf16.mxu1 %v6796_v60 }
 0x450   :  { %v5229_v50 = vpop.eup %5228 }
 0x451   :  { %v1680_v36 = vmul.f32 %v5229_v50, %v1663_v28  ;;  %4762 = vmatpush1.bf16.msra.mxu0 %v5663_v55  ;;  %4791 = vmatpush3.bf16.msra.mxu1 %v5756_v59  ;;  %v5231_v14 = vpop.eup %5230  ;;  %v6839_v28 = vld [vmem:[#allocation5_spill] sm:$0xff]  ;;  %v6840_v50 = vld [vmem:[#allocation10_spill] sm:$0xff] }
 0x452   :  { %4764 = vmatprep.subr.bf16.mxu0 %v5669_v58  ;;  %4792 = vmatprep.subr.bf16.mxu1 %v6796_v60  ;;  %v1683_v2 = vsub.f32 1.0, %v5231_v14  ;;  %v1685_v44 = vmul.f32 %v5231_v14, %v6235_v15  ;;  %v6836_v15 = vld [vmem:[#allocation3_spill] sm:$0xff]  ;;  %v6844_v14 = vld [vmem:[#allocation8_spill] sm:$0xff] }
 0x453   :  { %v1681_v31 = vadd.f32 %v3350_v52, %v1680_v36  ;;  %v6841_v52 = vld [vmem:[#allocation6_spill] sm:$0xff]  ;;  %v6842_v36 = vld [vmem:[#allocation7_spill] sm:$0xff] }
 0x455   :  { %5232 = vtanh.f32 %v1681_v31  ;;  %4766 = vmatpush1.bf16.msra.mxu0 %v5699_v13  ;;  %4794 = vmatpush3.bf16.msra.mxu1 %v5792_v32  ;;  %v6843_v31 = vld [vmem:[#allocation11_spill] sm:$0xff] }
 0x456   :  { %4768 = vmatprep.subr.bf16.mxu0 %v5706_v18  ;;  %4795 = vmatprep.subr.bf16.mxu1 %v6796_v60 }
 0x459   :  { %4770 = vmatpush1.bf16.msra.mxu0 %v5738_v41  ;;  %4797 = vmatpush3.bf16.msra.mxu1 %v5823_v35 }
 0x45a   :  { %4772 = vmatprep.subr.bf16.mxu0 %v5744_v45  ;;  %4798 = vmatprep.subr.bf16.mxu1 %v6796_v60 }
 0x45d   :  { %4774 = vmatpush1.bf16.msra.mxu0 %v5774_v7  ;;  %4800 = vmatpush3.bf16.msra.mxu1 %v5839_v24 }
 0x45e   :  { %4776 = vmatprep.subr.bf16.mxu0 %v5780_v20  ;;  %4801 = vmatprep.subr.bf16.mxu1 %v6796_v60 }
 0x45f   :  { %v5233_v3 = vpop.eup %5232 }
 0x460   :  { %v1684_v46 = vmul.f32 %v5233_v3, %v1683_v2  ;;  %v3359_v2 = vld [vmem:[%s6736_s1 + $0x60] sm:$0xff] }
 0x461   :  { %4778 = vmatpush1.bf16.msra.mxu0 %v5810_v63  ;;  %4803 = vmatpush3.bf16.msra.mxu1 %v5850_v12 }
 0x462   :  { %4780 = vmatprep.subr.bf16.mxu0 %v5814_v54  ;;  %4804 = vmatprep.subr.bf16.mxu1 %v6796_v60  ;;  %v1686_v8 = vadd.f32 %v1685_v44, %v1684_v46  ;;  %v6845_v46 = vld [vmem:[#allocation12_spill] sm:$0xff] }
 0x464   :  { %v1692_v62 = vmul.f32 %v1690_v48, %v1686_v8 }
 0x465   :  { %4782 = vmatpush1.bf16.msra.mxu0 %v5834_v49  ;;  %4806 = vmatpush3.bf16.msra.mxu1 %v5863_v6 }
 0x466   :  { %v6349_v61 = vadd.f32 %v1699_v51, %v1692_v62  ;;  %4808 = vmatprep.subr.bf16.mxu0 %v5364_v5  ;;  %4839 = vmatprep.subr.bf16.mxu1 %v6796_v60  ;;  %v6846_v62 = vld [vmem:[#allocation13_spill] sm:$0xff] }
 0x468   :  { %v1704_v19 = vmul.f32 %v6349_v61, %v1690_v48  ;;  %1966 = vmatmul.mubr.f32.vlgmr.msra.gmra.mrb[18].mxu0 %v6349_v61  ;;  %4035 = vmatmul.mubr.f32.vlgmr.msra.gmra.mrb[18].mxu1 %v6349_v61 }
 0x469   :  { %4810 = vmatpush1.bf16.msra.mxu0 %v5377_v10  ;;  %4841 = vmatpush3.bf16.msra.mxu1 %v5436_v30 }
 0x46a   :  { %3354 = vst [vmem:[%s6739_s6 + $0x20] sm:$0xff] %v1704_v19  ;;  %4812 = vmatprep.subr.bf16.mxu0 %v5379_v11  ;;  %4842 = vmatprep.subr.bf16.mxu1 %v6796_v60 }
 0x46b   :  { %2161 = vmatprep.mubr.f32.mxu0 %v6797_v37  ;;  %4069 = vmatprep.mubr.msk.f32.mxu1 %vm5316_vm0, %v6797_v37 }
 0x46d   :  { %4814 = vmatpush1.bf16.msra.mxu0 %v5395_v16  ;;  %4844 = vmatpush3.bf16.msra.mxu1 %v5460_v38 }
 0x46e   :  { %4816 = vmatprep.subr.bf16.mxu0 %v5398_v17  ;;  %4845 = vmatprep.subr.bf16.mxu1 %v6796_v60 }
 0x471   :  { %4818 = vmatpush1.bf16.msra.mxu0 %v5413_v22  ;;  %4847 = vmatpush3.bf16.msra.mxu1 %v5488_v47 }
 0x472   :  { %4820 = vmatprep.subr.bf16.mxu0 %v5416_v23  ;;  %4848 = vmatprep.subr.bf16.mxu1 %v6796_v60 }
 0x475   :  { %4822 = vmatpush1.bf16.msra.mxu0 %v5445_v33  ;;  %4850 = vmatpush3.bf16.msra.mxu1 %v5516_v56 }
 0x476   :  { %4824 = vmatprep.subr.bf16.mxu0 %v5448_v34  ;;  %4851 = vmatprep.subr.bf16.mxu1 %v6796_v60 }
 0x479   :  { %4826 = vmatpush1.bf16.msra.mxu0 %v5473_v42  ;;  %4853 = vmatpush3.bf16.msra.mxu1 %v5544_v1 }
 0x47a   :  { %4828 = vmatprep.subr.bf16.mxu0 %v5476_v43  ;;  %4854 = vmatprep.subr.bf16.mxu1 %v6796_v60 }
 0x47d   :  { %4830 = vmatpush1.bf16.msra.mxu0 %v6836_v15  ;;  %4856 = vmatpush3.bf16.msra.mxu1 %v6837_v9 }
 0x47e   :  { %4832 = vmatprep.subr.bf16.mxu0 %v6838_v53  ;;  %4857 = vmatprep.subr.bf16.mxu1 %v6796_v60 }
 0x481   :  { %4834 = vmatpush1.bf16.msra.mxu0 %v6839_v28  ;;  %4859 = vmatpush3.bf16.msra.mxu1 %v6840_v50 }
 0x482   :  { %4836 = vmatprep.subr.bf16.mxu0 %v6841_v52  ;;  %4860 = vmatprep.subr.bf16.mxu1 %v6796_v60 }
 0x485   :  { %4838 = vmatpush1.bf16.msra.mxu0 %v6842_v36  ;;  %4862 = vmatpush3.bf16.msra.mxu1 %v6843_v31  ;;  %v3360_v31 = vld [vmem:[%s6736_s1 + $0x68] sm:$0xff] }
 0x486   :  { %4864 = vmatprep.subr.bf16.mxu0 %v6844_v14  ;;  %4895 = vmatprep.subr.bf16.mxu1 %v6796_v60 }
 0x51b   :  { %v1787_v3 = vpop.f32.mrb[16].mxu0  ;;  %v1858_v44 = vpop.f32.mrb[16].mxu1 }
 0x51c   :  { %v1788_v8 = vadd.f32 %v1787_v3, %v6845_v46  ;;  %v1789_v48 = vpop.f32.mrb[17].mxu0  ;;  %v4001_v57 = vpop.f32.mrb[17].mxu1  ;;  %v6847_v3 = vld [vmem:[#allocation14_spill] sm:$0xff] }
 0x51d   :  { %v1790_v51 = vadd.f32 %v1789_v48, %v6846_v62  ;;  %v1859_v46 = vadd.f32 %v1858_v44, %v6847_v3  ;;  %v6848_v48 = vld [vmem:[#allocation16_spill] sm:$0xff] }
 0x51e   :  { %v1862_v19 = vadd.f32 %v3359_v2, %v1788_v8  ;;  %v3361_v2 = vld [vmem:[%s6736_s1 + $0x70] sm:$0xff] }
 0x51f   :  { %v1869_v36 = vadd.f32 %v3360_v31, %v1790_v51  ;;  %v3364_v31 = vld [vmem:[%s6737_s2 + $0x48] sm:$0xff] }
 0x520   :  { %v3362_v14 = vmul.f32 -1.442695, %v1862_v19 }
 0x521   :  { %v3363_v52 = vmul.f32 -1.442695, %v1869_v36 }
 0x522   :  { %5234 = vpow2.f32 %v3362_v14 }
 0x523   :  { %5236 = vpow2.f32 %v3363_v52 }
 0x52c   :  { %v5235_v50 = vpop.eup %5234 }
 0x52d   :  { %v1866_v28 = vadd.f32 1.0, %v5235_v50  ;;  %v5237_v53 = vpop.eup %5236 }
 0x52e   :  { %v1873_v9 = vadd.f32 1.0, %v5237_v53 }
 0x52f   :  { %5238 = vrcp.f32 %v1866_v28 }
 0x530   :  { %5240 = vrcp.f32 %v1873_v9 }
 0x539   :  { %v5239_v57 = vpop.eup %5238 }
 0x53a   :  { %v1876_v8 = vmul.f32 %v5239_v57, %v1859_v46  ;;  %v3365_v46 = vld [vmem:[%s6737_s2 + $0x50] sm:$0xff]  ;;  %v5241_v57 = vpop.eup %5240 }
 0x53b   :  { %v1967_v36 = vpop.f32.mrb[18].mxu0  ;;  %v2038_v52 = vpop.f32.mrb[18].mxu1  ;;  %v1879_v62 = vsub.f32 1.0, %v5241_v57 }
 0x53c   :  { %v1877_v14 = vadd.f32 %v3361_v2, %v1876_v8  ;;  %v1968_v28 = vadd.f32 %v1967_v36, %v6808_v29  ;;  %v1969_v50 = vpop.f32.mrb[19].mxu0  ;;  %v4036_v53 = vpop.f32.mrb[19].mxu1  ;;  %v1881_v2 = vmul.f32 %v5241_v57, %v6302_v4 }
 0x53d   :  { %v1970_v44 = vadd.f32 %v1969_v50, %v6848_v48  ;;  %v1886_v50 = vpop.permute.xlu0 %1885 }
 0x53e   :  { %5242 = vtanh.f32 %v1877_v14  ;;  %v2042_v51 = vadd.f32 %v3364_v31, %v1968_v28  ;;  %v1893_v14 = vpop.permute.xlu1 %1892 }
 0x53f   :  { %v2049_v19 = vadd.f32 %v3365_v46, %v1970_v44  ;;  %v1895_v48 = vmul.f32 %v1893_v14, %v6302_v4 }
 0x540   :  { %v3367_v9 = vmul.f32 -1.442695, %v2042_v51 }
 0x541   :  { %v3368_v3 = vmul.f32 -1.442695, %v2049_v19 }
 0x542   :  { %5244 = vpow2.f32 %v3367_v9 }
 0x543   :  { %5246 = vpow2.f32 %v3368_v3 }
 0x548   :  { %v5243_v15 = vpop.eup %5242 }
 0x549   :  { %v1880_v8 = vmul.f32 %v5243_v15, %v1879_v62  ;;  %v2039_v62 = vadd.f32 %v2038_v52, %v5967_v26 }
 0x54b   :  { %v1882_v36 = vadd.f32 %v1881_v2, %v1880_v8 }
 0x54c   :  { %v5245_v53 = vpop.eup %5244 }
 0x54d   :  { %v2046_v31 = vadd.f32 1.0, %v5245_v53  ;;  %v1888_v28 = vmul.f32 %v1886_v50, %v1882_v36  ;;  %v5247_v15 = vpop.eup %5246  ;;  %v2066_v53 = vpop.permute.xlu0 %2065 }
 0x54e   :  { %v2053_v4 = vadd.f32 1.0, %v5247_v15  ;;  %v6850_v15 = vld [vmem:[#allocation9_spill] sm:$0xff] }
 0x54f   :  { %5248 = vrcp.f32 %v2046_v31  ;;  %v6416_v51 = vadd.f32 %v1895_v48, %v1888_v28  ;;  %v3366_v48 = vld [vmem:[%s6737_s2 + $0x58] sm:$0xff] }
 0x550   :  { %5250 = vrcp.f32 %v2053_v4  ;;  %v6851_v4 = vld [vmem:[#allocation4_spill] sm:$0xff] }
 0x551   :  { %v2077_v44 = vmul.f32 %v6416_v51, %v1886_v50  ;;  %2162 = vmatmul.mubr.f32.vlgmr.msra.gmra.mrb[20].mxu0 %v6416_v51  ;;  %4070 = vmatmul.mubr.f32.vlgmr.msra.gmra.mrb[20].mxu1 %v6416_v51  ;;  %v2073_v50 = vpop.permute.xlu1 %2072 }
 0x552   :  { %4866 = vmatpush1.bf16.msra.mxu0 %v5585_v21  ;;  %4897 = vmatpush3.bf16.msra.mxu1 %v5681_v0  ;;  %v2075_v31 = vmul.f32 %v2073_v50, %v6349_v61 }
 0x553   :  { %3369 = vst [vmem:[%s6738_s5 + $0x20] sm:$0xff] %v2077_v44  ;;  %4868 = vmatprep.subr.bf16.mxu0 %v5593_v25  ;;  %4898 = vmatprep.subr.bf16.mxu1 %v6796_v60 }
 0x554   :  { %2341 = vmatprep.mubr.f32.mxu0 %v6797_v37  ;;  %4104 = vmatprep.mubr.msk.f32.mxu1 %vm5316_vm0, %v6797_v37 }
 0x556   :  { %4870 = vmatpush1.bf16.msra.mxu0 %v5625_v39  ;;  %4900 = vmatpush3.bf16.msra.mxu1 %v5718_v27 }
 0x557   :  { %4872 = vmatprep.subr.bf16.mxu0 %v5630_v40  ;;  %4901 = vmatprep.subr.bf16.mxu1 %v6796_v60 }
 0x559   :  { %v5249_v3 = vpop.eup %5248 }
 0x55a   :  { %v2056_v46 = vmul.f32 %v5249_v3, %v2039_v62  ;;  %4874 = vmatpush1.bf16.msra.mxu0 %v5663_v55  ;;  %4903 = vmatpush3.bf16.msra.mxu1 %v5756_v59  ;;  %v5251_v52 = vpop.eup %5250  ;;  %v6852_v62 = vld [vmem:[#allocation5_spill] sm:$0xff]  ;;  %v6853_v3 = vld [vmem:[#allocation10_spill] sm:$0xff] }
 0x55b   :  { %4876 = vmatprep.subr.bf16.mxu0 %v5669_v58  ;;  %4904 = vmatprep.subr.bf16.mxu1 %v6796_v60  ;;  %v2059_v19 = vsub.f32 1.0, %v5251_v52  ;;  %v2061_v2 = vmul.f32 %v5251_v52, %v6349_v61  ;;  %v6849_v61 = vld [vmem:[#allocation3_spill] sm:$0xff]  ;;  %v6857_v52 = vld [vmem:[#allocation8_spill] sm:$0xff] }
 0x55c   :  { %v2057_v9 = vadd.f32 %v3366_v48, %v2056_v46  ;;  %v6854_v48 = vld [vmem:[#allocation6_spill] sm:$0xff]  ;;  %v6855_v46 = vld [vmem:[#allocation7_spill] sm:$0xff] }
 0x55e   :  { %5252 = vtanh.f32 %v2057_v9  ;;  %4878 = vmatpush1.bf16.msra.mxu0 %v5699_v13  ;;  %4906 = vmatpush3.bf16.msra.mxu1 %v5792_v32  ;;  %v6856_v9 = vld [vmem:[#allocation11_spill] sm:$0xff] }
 0x55f   :  { %4880 = vmatprep.subr.bf16.mxu0 %v5706_v18  ;;  %4907 = vmatprep.subr.bf16.mxu1 %v6796_v60 }
 0x562   :  { %4882 = vmatpush1.bf16.msra.mxu0 %v5738_v41  ;;  %4909 = vmatpush3.bf16.msra.mxu1 %v5823_v35 }
 0x563   :  { %4884 = vmatprep.subr.bf16.mxu0 %v5744_v45  ;;  %4910 = vmatprep.subr.bf16.mxu1 %v6796_v60 }
 0x566   :  { %4886 = vmatpush1.bf16.msra.mxu0 %v5774_v7  ;;  %4912 = vmatpush3.bf16.msra.mxu1 %v5839_v24 }
 0x567   :  { %4888 = vmatprep.subr.bf16.mxu0 %v5780_v20  ;;  %4913 = vmatprep.subr.bf16.mxu1 %v6796_v60 }
 0x568   :  { %v5253_v57 = vpop.eup %5252 }
 0x569   :  { %v2060_v8 = vmul.f32 %v5253_v57, %v2059_v19  ;;  %v3375_v19 = vld [vmem:[%s6736_s1 + $0x78] sm:$0xff] }
 0x56a   :  { %4890 = vmatpush1.bf16.msra.mxu0 %v5810_v63  ;;  %4915 = vmatpush3.bf16.msra.mxu1 %v5850_v12 }
 0x56b   :  { %4892 = vmatprep.subr.bf16.mxu0 %v5814_v54  ;;  %4916 = vmatprep.subr.bf16.mxu1 %v6796_v60  ;;  %v2062_v36 = vadd.f32 %v2061_v2, %v2060_v8  ;;  %v6858_v8 = vld [vmem:[#allocation12_spill] sm:$0xff] }
 0x56d   :  { %v2068_v14 = vmul.f32 %v2066_v53, %v2062_v36 }
 0x56e   :  { %4894 = vmatpush1.bf16.msra.mxu0 %v5834_v49  ;;  %4918 = vmatpush3.bf16.msra.mxu1 %v5863_v6 }
 0x56f   :  { %v6463_v28 = vadd.f32 %v2075_v31, %v2068_v14  ;;  %4920 = vmatprep.subr.bf16.mxu0 %v5364_v5  ;;  %4951 = vmatprep.subr.bf16.mxu1 %v6796_v60  ;;  %v6859_v14 = vld [vmem:[#allocation13_spill] sm:$0xff] }
 0x571   :  { %v2080_v44 = vmul.f32 %v6463_v28, %v2066_v53  ;;  %2342 = vmatmul.mubr.f32.vlgmr.msra.gmra.mrb[22].mxu0 %v6463_v28  ;;  %4105 = vmatmul.mubr.f32.vlgmr.msra.gmra.mrb[22].mxu1 %v6463_v28 }
 0x572   :  { %4922 = vmatpush1.bf16.msra.mxu0 %v5377_v10  ;;  %4953 = vmatpush3.bf16.msra.mxu1 %v5436_v30 }
 0x573   :  { %3370 = vst [vmem:[%s6739_s6 + $0x18] sm:$0xff] %v2080_v44  ;;  %4924 = vmatprep.subr.bf16.mxu0 %v5379_v11  ;;  %4954 = vmatprep.subr.bf16.mxu1 %v6796_v60 }
 0x574   :  { %2537 = vmatprep.mubr.f32.mxu0 %v6797_v37  ;;  %4139 = vmatprep.mubr.msk.f32.mxu1 %vm5316_vm0, %v6797_v37 }
 0x576   :  { %4926 = vmatpush1.bf16.msra.mxu0 %v5395_v16  ;;  %4956 = vmatpush3.bf16.msra.mxu1 %v5460_v38 }
 0x577   :  { %4928 = vmatprep.subr.bf16.mxu0 %v5398_v17  ;;  %4957 = vmatprep.subr.bf16.mxu1 %v6796_v60 }
 0x57a   :  { %4930 = vmatpush1.bf16.msra.mxu0 %v5413_v22  ;;  %4959 = vmatpush3.bf16.msra.mxu1 %v5488_v47 }
 0x57b   :  { %4932 = vmatprep.subr.bf16.mxu0 %v5416_v23  ;;  %4960 = vmatprep.subr.bf16.mxu1 %v6796_v60 }
 0x57e   :  { %4934 = vmatpush1.bf16.msra.mxu0 %v5445_v33  ;;  %4962 = vmatpush3.bf16.msra.mxu1 %v5516_v56 }
 0x57f   :  { %4936 = vmatprep.subr.bf16.mxu0 %v5448_v34  ;;  %4963 = vmatprep.subr.bf16.mxu1 %v6796_v60 }
 0x582   :  { %4938 = vmatpush1.bf16.msra.mxu0 %v5473_v42  ;;  %4965 = vmatpush3.bf16.msra.mxu1 %v5544_v1 }
 0x583   :  { %4940 = vmatprep.subr.bf16.mxu0 %v5476_v43  ;;  %4966 = vmatprep.subr.bf16.mxu1 %v6796_v60 }
 0x586   :  { %4942 = vmatpush1.bf16.msra.mxu0 %v6849_v61  ;;  %4968 = vmatpush3.bf16.msra.mxu1 %v6850_v15 }
 0x587   :  { %4944 = vmatprep.subr.bf16.mxu0 %v6851_v4  ;;  %4969 = vmatprep.subr.bf16.mxu1 %v6796_v60 }
 0x58a   :  { %4946 = vmatpush1.bf16.msra.mxu0 %v6852_v62  ;;  %4971 = vmatpush3.bf16.msra.mxu1 %v6853_v3 }
 0x58b   :  { %4948 = vmatprep.subr.bf16.mxu0 %v6854_v48  ;;  %4972 = vmatprep.subr.bf16.mxu1 %v6796_v60 }
 0x58e   :  { %4950 = vmatpush1.bf16.msra.mxu0 %v6855_v46  ;;  %4974 = vmatpush3.bf16.msra.mxu1 %v6856_v9  ;;  %v3376_v9 = vld [vmem:[%s6736_s1 + $0x80] sm:$0xff] }
 0x58f   :  { %4976 = vmatprep.subr.bf16.mxu0 %v6857_v52  ;;  %5007 = vmatprep.subr.bf16.mxu1 %v6796_v60 }
 0x624   :  { %v2163_v57 = vpop.f32.mrb[20].mxu0  ;;  %v2234_v2 = vpop.f32.mrb[20].mxu1 }
 0x625   :  { %v2164_v36 = vadd.f32 %v2163_v57, %v6858_v8  ;;  %v2165_v53 = vpop.f32.mrb[21].mxu0  ;;  %v4071_v50 = vpop.f32.mrb[21].mxu1  ;;  %v6860_v57 = vld [vmem:[#allocation14_spill] sm:$0xff] }
 0x626   :  { %v2166_v31 = vadd.f32 %v2165_v53, %v6859_v14  ;;  %v2235_v8 = vadd.f32 %v2234_v2, %v6860_v57  ;;  %v6861_v53 = vld [vmem:[#allocation16_spill] sm:$0xff] }
 0x627   :  { %v2238_v44 = vadd.f32 %v3375_v19, %v2164_v36  ;;  %v3377_v19 = vld [vmem:[%s6736_s1 + $0x88] sm:$0xff] }
 0x628   :  { %v2245_v46 = vadd.f32 %v3376_v9, %v2166_v31  ;;  %v3380_v9 = vld [vmem:[%s6737_s2 + $0x30] sm:$0xff] }
 0x629   :  { %v3378_v52 = vmul.f32 -1.442695, %v2238_v44 }
 0x62a   :  { %v3379_v48 = vmul.f32 -1.442695, %v2245_v46 }
 0x62b   :  { %5254 = vpow2.f32 %v3378_v52 }
 0x62c   :  { %5256 = vpow2.f32 %v3379_v48 }
 0x635   :  { %v5255_v3 = vpop.eup %5254 }
 0x636   :  { %v2242_v62 = vadd.f32 1.0, %v5255_v3  ;;  %v5257_v4 = vpop.eup %5256 }
 0x637   :  { %v2249_v15 = vadd.f32 1.0, %v5257_v4 }
 0x638   :  { %5258 = vrcp.f32 %v2242_v62 }
 0x639   :  { %5260 = vrcp.f32 %v2249_v15 }
 0x642   :  { %v5259_v50 = vpop.eup %5258 }
 0x643   :  { %v2252_v36 = vmul.f32 %v5259_v50, %v2235_v8  ;;  %v3381_v8 = vld [vmem:[%s6737_s2 + $0x38] sm:$0xff]  ;;  %v5261_v50 = vpop.eup %5260 }
 0x644   :  { %v2343_v46 = vpop.f32.mrb[22].mxu0  ;;  %v2414_v48 = vpop.f32.mrb[22].mxu1  ;;  %v2255_v14 = vsub.f32 1.0, %v5261_v50 }
 0x645   :  { %v2253_v52 = vadd.f32 %v3377_v19, %v2252_v36  ;;  %v2344_v62 = vadd.f32 %v2343_v46, %v6808_v29  ;;  %v2345_v3 = vpop.f32.mrb[23].mxu0  ;;  %v4106_v4 = vpop.f32.mrb[23].mxu1  ;;  %v2257_v19 = vmul.f32 %v5261_v50, %v6416_v51 }
 0x646   :  { %v2346_v2 = vadd.f32 %v2345_v3, %v6861_v53  ;;  %v2262_v3 = vpop.permute.xlu0 %2261 }
 0x647   :  { %5262 = vtanh.f32 %v2253_v52  ;;  %v2418_v31 = vadd.f32 %v3380_v9, %v2344_v62  ;;  %v2269_v52 = vpop.permute.xlu1 %2268 }
 0x648   :  { %v2425_v44 = vadd.f32 %v3381_v8, %v2346_v2  ;;  %v2271_v53 = vmul.f32 %v2269_v52, %v6416_v51 }
 0x649   :  { %v3383_v15 = vmul.f32 -1.442695, %v2418_v31 }
 0x64a   :  { %v3384_v57 = vmul.f32 -1.442695, %v2425_v44 }
 0x64b   :  { %5264 = vpow2.f32 %v3383_v15 }
 0x64c   :  { %5266 = vpow2.f32 %v3384_v57 }
 0x651   :  { %v5263_v61 = vpop.eup %5262 }
 0x652   :  { %v2256_v36 = vmul.f32 %v5263_v61, %v2255_v14  ;;  %v2415_v14 = vadd.f32 %v2414_v48, %v5967_v26 }
 0x654   :  { %v2258_v46 = vadd.f32 %v2257_v19, %v2256_v36 }
 0x655   :  { %v5265_v4 = vpop.eup %5264 }
 0x656   :  { %v2422_v9 = vadd.f32 1.0, %v5265_v4  ;;  %v2264_v62 = vmul.f32 %v2262_v3, %v2258_v46  ;;  %v5267_v61 = vpop.eup %5266  ;;  %v2442_v4 = vpop.permute.xlu0 %2441 }
 0x657   :  { %v2429_v51 = vadd.f32 1.0, %v5267_v61 }
 0x658   :  { %5268 = vrcp.f32 %v2422_v9  ;;  %v6530_v31 = vadd.f32 %v2271_v53, %v2264_v62  ;;  %v3382_v53 = vld [vmem:[%s6737_s2 + $0x40] sm:$0xff] }
 0x659   :  { %5270 = vrcp.f32 %v2429_v51 }
 0x65a   :  { %v2453_v2 = vmul.f32 %v6530_v31, %v2262_v3  ;;  %2538 = vmatmul.mubr.f32.vlgmr.msra.gmra.mrb[24].mxu0 %v6530_v31  ;;  %4140 = vmatmul.mubr.f32.vlgmr.msra.gmra.mrb[24].mxu1 %v6530_v31  ;;  %v2449_v3 = vpop.permute.xlu1 %2448 }
 0x65b   :  { %4978 = vmatpush1.bf16.msra.mxu0 %v5585_v21  ;;  %5009 = vmatpush3.bf16.msra.mxu1 %v5681_v0  ;;  %v2451_v9 = vmul.f32 %v2449_v3, %v6463_v28 }
 0x65c   :  { %3385 = vst [vmem:[%s6738_s5 + $0x28] sm:$0xff] %v2453_v2  ;;  %4980 = vmatprep.subr.bf16.mxu0 %v5593_v25  ;;  %5010 = vmatprep.subr.bf16.mxu1 %v6796_v60 }
 0x65d   :  { %2717 = vmatprep.mubr.f32.mxu0 %v6797_v37  ;;  %4174 = vmatprep.mubr.msk.f32.mxu1 %vm5316_vm0, %v6797_v37 }
 0x65f   :  { %4982 = vmatpush1.bf16.msra.mxu0 %v5625_v39  ;;  %5012 = vmatpush3.bf16.msra.mxu1 %v5718_v27 }
 0x660   :  { %4984 = vmatprep.subr.bf16.mxu0 %v5630_v40  ;;  %5013 = vmatprep.subr.bf16.mxu1 %v6796_v60 }
 0x662   :  { %v5269_v57 = vpop.eup %5268 }
 0x663   :  { %v2432_v8 = vmul.f32 %v5269_v57, %v2415_v14  ;;  %4986 = vmatpush1.bf16.msra.mxu0 %v5663_v55  ;;  %5015 = vmatpush3.bf16.msra.mxu1 %v5756_v59  ;;  %v5271_v48 = vpop.eup %5270  ;;  %v3392_v14 = vld [vmem:[%s6736_s1 + $0x98] sm:$0xff] }
 0x664   :  { %4988 = vmatprep.subr.bf16.mxu0 %v5669_v58  ;;  %5016 = vmatprep.subr.bf16.mxu1 %v6796_v60  ;;  %v2435_v44 = vsub.f32 1.0, %v5271_v48  ;;  %v2437_v19 = vmul.f32 %v5271_v48, %v6463_v28  ;;  %v6872_v28 = vld [vmem:[#allocation13_spill] sm:$0xff] }
 0x665   :  { %v2433_v15 = vadd.f32 %v3382_v53, %v2432_v8 }
 0x667   :  { %5272 = vtanh.f32 %v2433_v15  ;;  %4990 = vmatpush1.bf16.msra.mxu0 %v5699_v13  ;;  %5018 = vmatpush3.bf16.msra.mxu1 %v5792_v32 }
 0x668   :  { %4992 = vmatprep.subr.bf16.mxu0 %v5706_v18  ;;  %5019 = vmatprep.subr.bf16.mxu1 %v6796_v60 }
 0x66b   :  { %4994 = vmatpush1.bf16.msra.mxu0 %v5738_v41  ;;  %5021 = vmatpush3.bf16.msra.mxu1 %v5823_v35 }
 0x66c   :  { %4996 = vmatprep.subr.bf16.mxu0 %v5744_v45  ;;  %5022 = vmatprep.subr.bf16.mxu1 %v6796_v60 }
 0x66f   :  { %4998 = vmatpush1.bf16.msra.mxu0 %v5774_v7  ;;  %5024 = vmatpush3.bf16.msra.mxu1 %v5839_v24 }
 0x670   :  { %5000 = vmatprep.subr.bf16.mxu0 %v5780_v20  ;;  %5025 = vmatprep.subr.bf16.mxu1 %v6796_v60 }
 0x671   :  { %v5273_v50 = vpop.eup %5272 }
 0x672   :  { %v2436_v36 = vmul.f32 %v5273_v50, %v2435_v44 }
 0x673   :  { %5002 = vmatpush1.bf16.msra.mxu0 %v5810_v63  ;;  %5027 = vmatpush3.bf16.msra.mxu1 %v5850_v12 }
 0x674   :  { %5004 = vmatprep.subr.bf16.mxu0 %v5814_v54  ;;  %5028 = vmatprep.subr.bf16.mxu1 %v6796_v60  ;;  %v2438_v46 = vadd.f32 %v2437_v19, %v2436_v36  ;;  %v6873_v19 = vld [vmem:[#allocation14_spill] sm:$0xff] }
 0x676   :  { %v2444_v52 = vmul.f32 %v2442_v4, %v2438_v46 }
 0x677   :  { %5006 = vmatpush1.bf16.msra.mxu0 %v5834_v49  ;;  %5030 = vmatpush3.bf16.msra.mxu1 %v5863_v6 }
 0x678   :  { %v6577_v62 = vadd.f32 %v2451_v9, %v2444_v52  ;;  %5032 = vmatprep.subr.bf16.mxu0 %v5364_v5  ;;  %5063 = vmatprep.subr.bf16.mxu1 %v6796_v60  ;;  %v6862_v5 = vld [vmem:[#allocation3_spill] sm:$0xff]  ;;  %v3396_v52 = vld [vmem:[%s6737_s2 + $0x18] sm:$0xff] }
 0x67a   :  { %v2456_v2 = vmul.f32 %v6577_v62, %v2442_v4  ;;  %2718 = vmatmul.mubr.f32.vlgmr.msra.gmra.mrb[26].mxu0 %v6577_v62  ;;  %4175 = vmatmul.mubr.f32.vlgmr.msra.gmra.mrb[26].mxu1 %v6577_v62  ;;  %v3393_v4 = vld [vmem:[%s6736_s1 + $0xa0] sm:$0xff] }
 0x67b   :  { %5034 = vmatpush1.bf16.msra.mxu0 %v5377_v10  ;;  %5065 = vmatpush3.bf16.msra.mxu1 %v5436_v30  ;;  %v6863_v10 = vld [vmem:[#allocation9_spill] sm:$0xff]  ;;  %v6869_v30 = vld [vmem:[#allocation11_spill] sm:$0xff] }
 0x67c   :  { %3386 = vst [vmem:[%s6739_s6 + $0x10] sm:$0xff] %v2456_v2  ;;  %5036 = vmatprep.subr.bf16.mxu0 %v5379_v11  ;;  %5066 = vmatprep.subr.bf16.mxu1 %v6796_v60  ;;  %v6864_v11 = vld [vmem:[#allocation4_spill] sm:$0xff] }
 0x67d   :  { %2912 = vmatprep.mubr.f32.mxu0 %v6797_v37  ;;  %4209 = vmatprep.mubr.msk.f32.mxu1 %vm5316_vm0, %v6797_v37 }
 0x67f   :  { %5038 = vmatpush1.bf16.msra.mxu0 %v5395_v16  ;;  %5068 = vmatpush3.bf16.msra.mxu1 %v5460_v38  ;;  %v6865_v16 = vld [vmem:[#allocation5_spill] sm:$0xff] }
 0x680   :  { %5040 = vmatprep.subr.bf16.mxu0 %v5398_v17  ;;  %5069 = vmatprep.subr.bf16.mxu1 %v6796_v60  ;;  %v6866_v17 = vld [vmem:[#allocation10_spill] sm:$0xff] }
 0x683   :  { %5042 = vmatpush1.bf16.msra.mxu0 %v5413_v22  ;;  %5071 = vmatpush3.bf16.msra.mxu1 %v5488_v47  ;;  %v6867_v22 = vld [vmem:[#allocation6_spill] sm:$0xff] }
 0x684   :  { %5044 = vmatprep.subr.bf16.mxu0 %v5416_v23  ;;  %5072 = vmatprep.subr.bf16.mxu1 %v6796_v60  ;;  %v6868_v23 = vld [vmem:[#allocation7_spill] sm:$0xff] }
 0x687   :  { %5046 = vmatpush1.bf16.msra.mxu0 %v5445_v33  ;;  %5074 = vmatpush3.bf16.msra.mxu1 %v5516_v56  ;;  %v6870_v33 = vld [vmem:[#allocation8_spill] sm:$0xff] }
 0x688   :  { %5048 = vmatprep.subr.bf16.mxu0 %v5448_v34  ;;  %5075 = vmatprep.subr.bf16.mxu1 %v6796_v60  ;;  %v3391_v34 = vld [vmem:[%s6736_s1 + $0x90] sm:$0xff] }
 0x68b   :  { %5050 = vmatpush1.bf16.msra.mxu0 %v5473_v42  ;;  %5077 = vmatpush3.bf16.msra.mxu1 %v5544_v1 }
 0x68c   :  { %5052 = vmatprep.subr.bf16.mxu0 %v5476_v43  ;;  %5078 = vmatprep.subr.bf16.mxu1 %v6796_v60  ;;  %v6871_v43 = vld [vmem:[#allocation12_spill] sm:$0xff] }
 0x68f   :  { %5054 = vmatpush1.bf16.msra.mxu0 %v6862_v5  ;;  %5080 = vmatpush3.bf16.msra.mxu1 %v6863_v10 }
 0x690   :  { %5056 = vmatprep.subr.bf16.mxu0 %v6864_v11  ;;  %5081 = vmatprep.subr.bf16.mxu1 %v6796_v60 }
 0x693   :  { %5058 = vmatpush1.bf16.msra.mxu0 %v6865_v16  ;;  %5083 = vmatpush3.bf16.msra.mxu1 %v6866_v17  ;;  %v6874_v17 = vld [vmem:[#allocation16_spill] sm:$0xff] }
 0x694   :  { %5060 = vmatprep.subr.bf16.mxu0 %v6867_v22  ;;  %5084 = vmatprep.subr.bf16.mxu1 %v6796_v60 }
 0x697   :  { %5062 = vmatpush1.bf16.msra.mxu0 %v6868_v23  ;;  %5086 = vmatpush3.bf16.msra.mxu1 %v6869_v30  ;;  %v3397_v30 = vld [vmem:[%s6737_s2 + $0x20] sm:$0xff] }
 0x698   :  { %5088 = vmatprep.subr.bf16.mxu0 %v6870_v33  ;;  %5119 = vmatprep.subr.bf16.mxu1 %v6796_v60 }
 0x72d   :  { %v2539_v38 = vpop.f32.mrb[24].mxu0  ;;  %v2610_v42 = vpop.f32.mrb[24].mxu1 }
 0x72e   :  { %v2540_v47 = vadd.f32 %v2539_v38, %v6871_v43  ;;  %v2541_v56 = vpop.f32.mrb[25].mxu0  ;;  %v4141_v1 = vpop.f32.mrb[25].mxu1  ;;  %v2611_v36 = vadd.f32 %v2610_v42, %v6873_v19 }
 0x72f   :  { %v2542_v61 = vadd.f32 %v2541_v56, %v6872_v28 }
 0x730   :  { %v2614_v51 = vadd.f32 %v3391_v34, %v2540_v47 }
 0x731   :  { %v2621_v53 = vadd.f32 %v3392_v14, %v2542_v61 }
 0x732   :  { %v3394_v57 = vmul.f32 -1.442695, %v2614_v51 }
 0x733   :  { %v3395_v8 = vmul.f32 -1.442695, %v2621_v53  ;;  %v2645_v53 = vpop.permute.xlu1 %2644 }
 0x734   :  { %5274 = vpow2.f32 %v3394_v57  ;;  %v2638_v57 = vpop.permute.xlu0 %2637 }
 0x735   :  { %5276 = vpow2.f32 %v3395_v8 }
 0x73e   :  { %v5275_v15 = vpop.eup %5274 }
 0x73f   :  { %v2618_v48 = vadd.f32 1.0, %v5275_v15  ;;  %v5277_v44 = vpop.eup %5276 }
 0x740   :  { %v2625_v50 = vadd.f32 1.0, %v5277_v44 }
 0x741   :  { %5278 = vrcp.f32 %v2618_v48  ;;  %v2647_v48 = vmul.f32 %v2645_v53, %v6530_v31 }
 0x742   :  { %5280 = vrcp.f32 %v2625_v50 }
 0x74b   :  { %v5279_v46 = vpop.eup %5278 }
 0x74c   :  { %v2628_v3 = vmul.f32 %v5279_v46, %v2611_v36  ;;  %v5281_v38 = vpop.eup %5280 }
 0x74d   :  { %v2719_v9 = vpop.f32.mrb[26].mxu0  ;;  %v2790_v2 = vpop.f32.mrb[26].mxu1  ;;  %v2631_v47 = vsub.f32 1.0, %v5281_v38  ;;  %v2633_v1 = vmul.f32 %v5281_v38, %v6530_v31 }
 0x74e   :  { %v2629_v5 = vadd.f32 %v3393_v4, %v2628_v3  ;;  %v2720_v10 = vadd.f32 %v2719_v9, %v6808_v29  ;;  %v2721_v11 = vpop.f32.mrb[27].mxu0  ;;  %v4176_v16 = vpop.f32.mrb[27].mxu1 }
 0x74f   :  { %v2722_v22 = vadd.f32 %v2721_v11, %v6874_v17  ;;  %v3024_v16 = vld [vmem:[%s6737_s2] sm:$0xff] }
 0x750   :  { %5282 = vtanh.f32 %v2629_v5  ;;  %v2794_v23 = vadd.f32 %v3396_v52, %v2720_v10 }
 0x751   :  { %v2801_v34 = vadd.f32 %v3397_v30, %v2722_v22 }
 0x752   :  { %v3399_v33 = vmul.f32 -1.442695, %v2794_v23 }
 0x753   :  { %v3400_v42 = vmul.f32 -1.442695, %v2801_v34 }
 0x754   :  { %5284 = vpow2.f32 %v3399_v33 }
 0x755   :  { %5286 = vpow2.f32 %v3400_v42 }
 0x75a   :  { %v5283_v56 = vpop.eup %5282 }
 0x75b   :  { %v2632_v61 = vmul.f32 %v5283_v56, %v2631_v47  ;;  %v3025_v47 = vld [vmem:[%s6737_s2 + $0x8] sm:$0xff] }
 0x75d   :  { %v2634_v51 = vadd.f32 %v2633_v1, %v2632_v61 }
 0x75e   :  { %v5285_v14 = vpop.eup %5284 }
 0x75f   :  { %v2798_v8 = vadd.f32 1.0, %v5285_v14  ;;  %v2640_v15 = vmul.f32 %v2638_v57, %v2634_v51  ;;  %v5287_v36 = vpop.eup %5286 }
 0x760   :  { %v2805_v31 = vadd.f32 1.0, %v5287_v36 }
 0x761   :  { %5288 = vrcp.f32 %v2798_v8  ;;  %v6644_v44 = vadd.f32 %v2647_v48, %v2640_v15 }
 0x762   :  { %5290 = vrcp.f32 %v2805_v31 }
 0x763   :  { %v2829_v50 = vmul.f32 %v6644_v44, %v2638_v57  ;;  %2913 = vmatmul.mubr.f32.vlgmr.msra.gmra.mrb[28].mxu0 %v6644_v44  ;;  %4210 = vmatmul.mubr.f32.vlgmr.msra.gmra.mrb[28].mxu1 %v6644_v44 }
 0x764   :  { %5090 = vmatpush1.bf16.msra.mxu0 %v5585_v21  ;;  %5121 = vmatpush3.bf16.msra.mxu1 %v5681_v0  ;;  %v2791_v21 = vadd.f32 %v2790_v2, %v5967_v26 }
 0x765   :  { %3401 = vst [vmem:[%s6738_s5 + $0x30] sm:$0xff] %v2829_v50  ;;  %5092 = vmatprep.subr.bf16.mxu0 %v5593_v25  ;;  %5122 = vmatprep.subr.bf16.mxu1 %v6796_v60  ;;  %v3398_v25 = vld [vmem:[%s6737_s2 + $0x28] sm:$0xff] }
 0x766   :  { %3091 = vmatprep.mubr.f32.mxu0 %v6797_v37  ;;  %4244 = vmatprep.mubr.msk.f32.mxu1 %vm5316_vm0, %v6797_v37  ;;  %v3408_v37 = vld [vmem:[%s6736_s1 + $0xb0] sm:$0xff] }
 0x768   :  { %5094 = vmatpush1.bf16.msra.mxu0 %v5625_v39  ;;  %5124 = vmatpush3.bf16.msra.mxu1 %v5718_v27 }
 0x769   :  { %5096 = vmatprep.subr.bf16.mxu0 %v5630_v40  ;;  %5125 = vmatprep.subr.bf16.mxu1 %v6796_v60 }
 0x76b   :  { %v5289_v0 = vpop.eup %5288 }
 0x76c   :  { %v2808_v46 = vmul.f32 %v5289_v0, %v2791_v21  ;;  %5098 = vmatpush1.bf16.msra.mxu0 %v5663_v55  ;;  %5127 = vmatpush3.bf16.msra.mxu1 %v5756_v59  ;;  %v5291_v40 = vpop.eup %5290 }
 0x76d   :  { %5100 = vmatprep.subr.bf16.mxu0 %v5669_v58  ;;  %5128 = vmatprep.subr.bf16.mxu1 %v6796_v60  ;;  %v2811_v55 = vsub.f32 1.0, %v5291_v40 }
 0x76e   :  { %v2809_v39 = vadd.f32 %v3398_v25, %v2808_v46 }
 0x770   :  { %5292 = vtanh.f32 %v2809_v39  ;;  %5102 = vmatpush1.bf16.msra.mxu0 %v5699_v13  ;;  %5130 = vmatpush3.bf16.msra.mxu1 %v5792_v32  ;;  %v2813_v13 = vmul.f32 %v5291_v40, %v6577_v62 }
 0x771   :  { %5104 = vmatprep.subr.bf16.mxu0 %v5706_v18  ;;  %5131 = vmatprep.subr.bf16.mxu1 %v6796_v60 }
 0x774   :  { %5106 = vmatpush1.bf16.msra.mxu0 %v5738_v41  ;;  %5133 = vmatpush3.bf16.msra.mxu1 %v5823_v35  ;;  %v2818_v35 = vpop.permute.xlu0 %2817  ;;  %v2825_v41 = vpop.permute.xlu1 %2824 }
 0x775   :  { %5108 = vmatprep.subr.bf16.mxu0 %v5744_v45  ;;  %5134 = vmatprep.subr.bf16.mxu1 %v6796_v60  ;;  %v2827_v59 = vmul.f32 %v2825_v41, %v6577_v62 }
 0x778   :  { %5110 = vmatpush1.bf16.msra.mxu0 %v5774_v7  ;;  %5136 = vmatpush3.bf16.msra.mxu1 %v5839_v24  ;;  %v5151_v8 = vpop.permute.xlu0 %5150  ;;  %v3020_v50 = vpop.permute.xlu1 %3019 }
 0x779   :  { %5112 = vmatprep.subr.bf16.mxu0 %v5780_v20  ;;  %5137 = vmatprep.subr.bf16.mxu1 %v6796_v60  ;;  %v5152_v15 = vunpack.i.l.bf16 %v5151_v8  ;;  %v3022_v36 = vmul.f32 %v3020_v50, %v6644_v44 }
 0x77a   :  { %v5293_v58 = vpop.eup %5292 }
 0x77b   :  { %v2812_v18 = vmul.f32 %v5293_v58, %v2811_v55  ;;  %v3026_v58 = vld [vmem:[%s6737_s2 + $0x10] sm:$0xff] }
 0x77c   :  { %5114 = vmatpush1.bf16.msra.mxu0 %v5810_v63  ;;  %5139 = vmatpush3.bf16.msra.mxu1 %v5850_v12 }
 0x77d   :  { %5116 = vmatprep.subr.bf16.mxu0 %v5814_v54  ;;  %5140 = vmatprep.subr.bf16.mxu1 %v6796_v60  ;;  %v2814_v27 = vadd.f32 %v2813_v13, %v2812_v18  ;;  %v3407_v54 = vld [vmem:[%s6736_s1 + $0xa8] sm:$0xff] }
 0x77f   :  { %v2820_v45 = vmul.f32 %v2818_v35, %v2814_v27 }
 0x780   :  { %5118 = vmatpush1.bf16.msra.mxu0 %v5834_v49  ;;  %5142 = vmatpush3.bf16.msra.mxu1 %v5863_v6 }
 0x781   :  { %v6691_v7 = vadd.f32 %v2827_v59, %v2820_v45  ;;  %v5153_v59 = vunpack.i.h.bf16 %v5151_v8 }
 0x783   :  { %v2832_v20 = vmul.f32 %v6691_v7, %v2818_v35  ;;  %3092 = vmatmul.mubr.f32.vlgmr.msra.gmra.mrb[30].mxu0 %v6691_v7  ;;  %4245 = vmatmul.mubr.f32.vlgmr.msra.gmra.mrb[30].mxu1 %v6691_v7 }
 0x785   :  { %3402 = vst [vmem:[%s6739_s6 + $0x8] sm:$0xff] %v2832_v20 }
 0x836   :  { %v2914_v32 = vpop.f32.mrb[28].mxu0  ;;  %v2985_v63 = vpop.f32.mrb[28].mxu1 }
 0x837   :  { %v2915_v49 = vadd.f32 %v2914_v32, %v6871_v43  ;;  %v2916_v24 = vpop.f32.mrb[29].mxu0  ;;  %v4211_v12 = vpop.f32.mrb[29].mxu1  ;;  %v2986_v43 = vadd.f32 %v2985_v63, %v6873_v19 }
 0x838   :  { %v2917_v6 = vadd.f32 %v2916_v24, %v6872_v28  ;;  %v3409_v28 = vld [vmem:[%s6736_s1 + $0xb8] sm:$0xff] }
 0x839   :  { %v2989_v60 = vadd.f32 %v3407_v54, %v2915_v49  ;;  %v3199_v54 = vpop.permute.xlu0 %3198 }
 0x83a   :  { %v2996_v4 = vadd.f32 %v3408_v37, %v2917_v6 }
 0x83b   :  { %v3410_v62 = vmul.f32 -1.442695, %v2989_v60 }
 0x83c   :  { %v3411_v3 = vmul.f32 -1.442695, %v2996_v4 }
 0x83d   :  { %5294 = vpow2.f32 %v3410_v62 }
 0x83e   :  { %5296 = vpow2.f32 %v3411_v3 }
 0x847   :  { %v5295_v52 = vpop.eup %5294 }
 0x848   :  { %v2993_v9 = vadd.f32 1.0, %v5295_v52  ;;  %v5297_v2 = vpop.eup %5296 }
 0x849   :  { %v3000_v5 = vadd.f32 1.0, %v5297_v2 }
 0x84a   :  { %5298 = vrcp.f32 %v2993_v9 }
 0x84b   :  { %5300 = vrcp.f32 %v3000_v5 }
 0x854   :  { %v5299_v10 = vpop.eup %5298 }
 0x855   :  { %v3003_v11 = vmul.f32 %v5299_v10, %v2986_v43  ;;  %v5301_v61 = vpop.eup %5300 }
 0x856   :  { %v3093_v22 = vpop.f32.mrb[30].mxu0  ;;  %v3164_v23 = vpop.f32.mrb[30].mxu1  ;;  %v3006_v14 = vsub.f32 1.0, %v5301_v61 }
 0x857   :  { %v3004_v30 = vadd.f32 %v3409_v28, %v3003_v11  ;;  %v3094_v33 = vadd.f32 %v3093_v22, %v6808_v29  ;;  %v3095_v34 = vpop.f32.mrb[31].mxu0  ;;  %v4246_v38 = vpop.f32.mrb[31].mxu1  ;;  %v3008_v29 = vmul.f32 %v5301_v61, %v6644_v44  ;;  %v3165_v40 = vadd.f32 %v3164_v23, %v5967_v26 }
 0x858   :  { %v3096_v19 = vadd.f32 %v3095_v34, %v6874_v17  ;;  %v3201_v26 = vmul.f32 %v3199_v54, %v6691_v7 }
 0x859   :  { %5302 = vtanh.f32 %v3004_v30  ;;  %v3168_v42 = vadd.f32 %v3094_v33, %v3024_v16 }
 0x85a   :  { %v3175_v1 = vadd.f32 %v3096_v19, %v3025_v47 }
 0x85b   :  { %v3412_v56 = vmul.f32 -1.442695, %v3168_v42 }
 0x85c   :  { %v3413_v51 = vmul.f32 -1.442695, %v3175_v1 }
 0x85d   :  { %5304 = vpow2.f32 %v3412_v56 }
 0x85e   :  { %5306 = vpow2.f32 %v3413_v51 }
 0x863   :  { %v5303_v57 = vpop.eup %5302 }
 0x864   :  { %v3007_v53 = vmul.f32 %v5303_v57, %v3006_v14 }
 0x866   :  { %v3009_v17 = vadd.f32 %v3008_v29, %v3007_v53 }
 0x867   :  { %v5305_v48 = vpop.eup %5304 }
 0x868   :  { %v3015_v31 = vmul.f32 %v5152_v15, %v3009_v17  ;;  %v3172_v21 = vadd.f32 1.0, %v5305_v48  ;;  %v5307_v46 = vpop.eup %5306 }
 0x869   :  { %v3179_v39 = vadd.f32 1.0, %v5307_v46 }
 0x86a   :  { %v3023_v0 = vadd.f32 %v3022_v36, %v3015_v31  ;;  %5308 = vrcp.f32 %v3172_v21 }
 0x86b   :  { %5310 = vrcp.f32 %v3179_v39 }
 0x86c   :  { %v3203_v25 = vmul.f32 %v5152_v15, %v3023_v0 }
 0x86e   :  { %3414 = vst [vmem:[%s6738_s5 + $0x38] sm:$0xff] %v3203_v25 }
 0x874   :  { %v5309_v55 = vpop.eup %5308 }
 0x875   :  { %v3182_v13 = vmul.f32 %v5309_v55, %v3165_v40  ;;  %v5311_v18 = vpop.eup %5310 }
 0x876   :  { %v3185_v27 = vsub.f32 1.0, %v5311_v18  ;;  %v3187_v45 = vmul.f32 %v5311_v18, %v6691_v7 }
 0x877   :  { %v3183_v44 = vadd.f32 %v3182_v13, %v3026_v58 }
 0x879   :  { %5312 = vtanh.f32 %v3183_v44 }
 0x883   :  { %v5313_v35 = vpop.eup %5312 }
 0x884   :  { %v3186_v41 = vmul.f32 %v5313_v35, %v3185_v27 }
 0x886   :  { %v3188_v20 = vadd.f32 %v3187_v45, %v3186_v41 }
 0x888   :  { %v3194_v32 = vmul.f32 %v5153_v59, %v3188_v20 }
 0x88a   :  { %v3202_v63 = vadd.f32 %v3201_v26, %v3194_v32 }
 0x88c   :  { %v3206_v49 = vmul.f32 %v5153_v59, %v3202_v63 }
 0x88e   :  { %3207 = vst [vmem:[%s6739_s6] sm:$0xff] %v3206_v49 }

</bundles_post_ra>
